<compile_context>
chip_gen: v7x
topology: tpu7x:2x2x1
jax: 0.10.0
libtpu: 0.0.40
codegen_flags: <defaults>
</compile_context>

<pallas_src>
import functools

import jax
import jax.numpy as jnp
from jax import lax
from jax.experimental import pallas as pl
from jax.experimental.pallas import tpu as pltpu


# ----------------------------------------------------------------------------
# Fused forward kernel.
#   x_ref   : (rows, c)      activations, rows in (b, s, n) order
#   abd_ref : (rows, rows)   block-diagonal row-normalised adjacency
#   w_ref   : (4c + 2*K*c, c) packed weights [gcn1 | gcn2 | conv1 | conv2]
#   bnn_ref : (4, n, 1)      [bn1_g, bn1_b, bn2_g, bn2_b]
#   bnc_ref : (6, c)         [conv1_b, bn3_g, bn3_b, conv2_b, bn4_g, bn4_b]
#   o_ref   : (rows, c)      output rows in (b, s, n) order == (b, s, n, c)
# ----------------------------------------------------------------------------
def _fused_kernel(x_ref, abd_ref, w_ref, bnn_ref, bnc_ref, o_ref,
                  *, b, s, n, c, ksize):
    bs = b * s
    rows = bs * n
    pad = ksize // 2
    eps = 1e-5

    x = x_ref[...]                                    # (rows, c)
    abd = abd_ref[...]                                # (rows, rows)

    # Packed weights, static sublane slices (offsets are multiples of 8).
    wg1 = w_ref[0:2 * c, :]                           # (2c, c)
    wg2 = w_ref[2 * c:4 * c, :]                       # (2c, c)
    wc1 = w_ref[4 * c:(4 + ksize) * c, :]             # (K*c, c)
    wc2 = w_ref[(4 + ksize) * c:(4 + 2 * ksize) * c, :]

    def gcn_relu(h2d, wstk):
        # Mean aggregation == one (rows,rows)@(rows,c) matmul, K = rows = 256.
        agg = jnp.dot(abd, h2d, preferred_element_type=jnp.float32)
        # Fused rel/root transform: [agg | h] @ [wrel; wroot], one K=2c matmul.
        cat = jnp.concatenate([agg, h2d], axis=1)     # (rows, 2c), 64 lanes
        out = jnp.dot(cat, wstk, preferred_element_type=jnp.float32)
        return jnp.maximum(out, 0.0)                  # (rows, c)

    def bn_nodes(h3, g, bt):
        # BatchNorm1d(node_cnt) on (bs, n, c): stats over axes (0, 2), one pass.
        m = jnp.mean(jnp.mean(h3, axis=2, keepdims=True), axis=0, keepdims=True)
        m2 = jnp.mean(jnp.mean(h3 * h3, axis=2, keepdims=True), axis=0,
                      keepdims=True)
        v = m2 - m * m
        return (h3 - m) * lax.rsqrt(v + eps) * g + bt

    def bn_channels(h2d, g, bt):
        # BatchNorm1d(hidden_dim) on (rows, c): stats over the row axis, one pass.
        m = jnp.mean(h2d, axis=0, keepdims=True)
        m2 = jnp.mean(h2d * h2d, axis=0, keepdims=True)
        v = m2 - m * m
        return (h2d - m) * lax.rsqrt(v + eps) * g + bt

    def conv_relu(h2d, wtaps, bias):
        # Conv1d(kernel=ksize, padding=pad) along the temporal axis s, evaluated
        # directly in (b, s, n, c) layout (both PyTorch permutes eliminated).
        # Taps are grouped 4-at-a-time into a 128-lane operand -> 2 matmuls.
        h4 = h2d.reshape(b, s, n, c)
        zpad = jnp.zeros((b, pad, n, c), jnp.float32)
        hp = jnp.concatenate([zpad, h4, zpad], axis=1)       # (b, s+2p, n, c)
        taps = [hp[:, k:k + s, :, :].reshape(rows, c) for k in range(ksize)]
        acc = None
        k = 0
        while k < ksize:                                      # static unroll
            gsz = min(4, ksize - k)
            op = taps[k] if gsz == 1 else jnp.concatenate(taps[k:k + gsz], axis=1)
            part = jnp.dot(op, wtaps[k * c:(k + gsz) * c, :],
                           preferred_element_type=jnp.float32)
            acc = part if acc is None else acc + part
            k += gsz
        return jnp.maximum(acc + bias, 0.0)                   # (rows, c)

    # ---- graph stage (layout (b*s, n, c), flat rows for the MXU) ----
    h = gcn_relu(x, wg1)
    h = bn_nodes(h.reshape(bs, n, c), bnn_ref[0], bnn_ref[1])
    h = gcn_relu(h.reshape(rows, c), wg2)
    h = bn_nodes(h.reshape(bs, n, c), bnn_ref[2], bnn_ref[3])

    # ---- temporal stage (same memory order, viewed as (b, s, n, c)) ----
    h2 = conv_relu(h.reshape(rows, c), wc1, bnc_ref[0:1, :])
    h2 = bn_channels(h2, bnc_ref[1:2, :], bnc_ref[2:3, :])
    h2 = conv_relu(h2, wc2, bnc_ref[3:4, :])
    h2 = bn_channels(h2, bnc_ref[4:5, :], bnc_ref[5:6, :])

    # Rows are already in (b, s, n) order == the module's final (b, s, n, c).
    o_ref[...] = h2


# ----------------------------------------------------------------------------
# Wrapper: one pallas_call, everything resident in VMEM (no grid needed).
# Input prep (adjacency normalisation + block-diag packing + weight packing)
# is plain XLA fused inside the same jit.
# ----------------------------------------------------------------------------
@jax.jit
def graph_temporal_conv(x, adj, p):
    b, s, n, c = x.shape
    ksize = p["conv1_w_t"].shape[0]
    rows = b * s * n

    adj_f = adj.reshape(b * s, n, n).astype(jnp.float32)
    deg = jnp.maximum(jnp.sum(adj_f, axis=-1, keepdims=True), 1.0)
    adj_n = adj_f / deg                                       # row-normalised
    eye = jnp.eye(b * s, dtype=jnp.float32)
    a_bd = (adj_n[:, :, None, :] * eye[:, None, :, None]).reshape(rows, rows)

    w_all = jnp.concatenate([
        p["gcn1_wrel_t"], p["gcn1_wroot_t"],
        p["gcn2_wrel_t"], p["gcn2_wroot_t"],
        p["conv1_w_t"].reshape(ksize * c, c),
        p["conv2_w_t"].reshape(ksize * c, c),
    ], axis=0)                                                # (4c + 2Kc, c)

    bn_node = jnp.stack([
        p["bn1_g"].reshape(n, 1), p["bn1_b"].reshape(n, 1),
        p["bn2_g"].reshape(n, 1), p["bn2_b"].reshape(n, 1),
    ], axis=0)                                                # (4, n, 1)

    bn_ch = jnp.concatenate([
        p["conv1_b"].reshape(1, c),
        p["bn3_g"].reshape(1, c), p["bn3_b"].reshape(1, c),
        p["conv2_b"].reshape(1, c),
        p["bn4_g"].reshape(1, c), p["bn4_b"].reshape(1, c),
    ], axis=0)                                                # (6, c)

    kern = functools.partial(_fused_kernel, b=b, s=s, n=n, c=c, ksize=ksize)
    vmem = pl.BlockSpec(memory_space=pltpu.MemorySpace.VMEM)
    out = pl.pallas_call(
        kern,
        out_shape=jax.ShapeDtypeStruct((rows, c), jnp.float32),
        in_specs=[vmem] * 5,
        out_specs=vmem,
    )(x.reshape(rows, c), a_bd, w_all, bn_node, bn_ch)
    return out.reshape(b, s, n, c)        # contiguous view, no data movement


# ----------------------------------------------------------------------------
# Deterministic synthetic parameters (shapes per the module __init__).
# Linear weights are stored transposed (in, out); Conv1d weights as (K, Cin, Cout).
# ----------------------------------------------------------------------------
def init_params(key, hidden_dim, node_cnt, ksize=5):
    ks = jax.random.split(key, 16)

    def nrm(k, shape, scale=0.1):
        return scale * jax.random.normal(k, shape, jnp.float32)

    return dict(
        gcn1_wrel_t=nrm(ks[0], (hidden_dim, hidden_dim)),
        gcn1_wroot_t=nrm(ks[1], (hidden_dim, hidden_dim)),
        gcn2_wrel_t=nrm(ks[2], (hidden_dim, hidden_dim)),
        gcn2_wroot_t=nrm(ks[3], (hidden_dim, hidden_dim)),
        bn1_g=1.0 + nrm(ks[4], (1, node_cnt, 1)),
        bn1_b=nrm(ks[5], (1, node_cnt, 1)),
        bn2_g=1.0 + nrm(ks[6], (1, node_cnt, 1)),
        bn2_b=nrm(ks[7], (1, node_cnt, 1)),
        conv1_w_t=nrm(ks[8], (ksize, hidden_dim, hidden_dim)),
        conv1_b=nrm(ks[9], (1, hidden_dim)),
        conv2_w_t=nrm(ks[10], (ksize, hidden_dim, hidden_dim)),
        conv2_b=nrm(ks[11], (1, hidden_dim)),
        bn3_g=1.0 + nrm(ks[12], (1, hidden_dim)),
        bn3_b=nrm(ks[13], (1, hidden_dim)),
        bn4_g=1.0 + nrm(ks[14], (1, hidden_dim)),
        bn4_b=nrm(ks[15], (1, hidden_dim)),
    )


# ----------------------------------------------------------------------------
# Pure-JAX reference that mirrors the PyTorch module literally (including the
# permutes into the (b*n, ..., s) conv layout and back).  HIGHEST matmul
# precision so the f32 kernel is compared against an accurate f32 reference.
# ----------------------------------------------------------------------------
def reference_forward(x, adj, p):
    b, s, n, c = x.shape
    hi = lax.Precision.HIGHEST
    h = x.reshape(b * s, n, c)
    a = adj.reshape(b * s, n, n)

    def gcn(h, a, wrel, wroot):
        agg = jnp.einsum("bij,bjc->bic", a, h, precision=hi)
        deg = jnp.maximum(a.sum(-1, keepdims=True), 1.0)
        return jax.nn.relu(jnp.dot(agg / deg, wrel, precision=hi)
                           + jnp.dot(h, wroot, precision=hi))

    def bn(h, g, bt, axes):
        m = h.mean(axis=axes, keepdims=True)
        v = ((h - m) ** 2).mean(axis=axes, keepdims=True)
        return (h - m) * lax.rsqrt(v + 1e-5) * g + bt

    def conv(hcl, wt, bias):                 # hcl: (b*n, s, c) channels-last
        k = wt.shape[0]
        pd = k // 2
        hp = jnp.pad(hcl, ((0, 0), (pd, pd), (0, 0)))
        acc = sum(jnp.einsum("bsi,io->bso", hp[:, kk:kk + hcl.shape[1], :],
                             wt[kk], precision=hi)
                  for kk in range(k))
        return jax.nn.relu(acc + bias[None])

    h = gcn(h, a, p["gcn1_wrel_t"], p["gcn1_wroot_t"])
    h = bn(h, p["bn1_g"], p["bn1_b"], (0, 2))
    h = gcn(h, a, p["gcn2_wrel_t"], p["gcn2_wroot_t"])
    h = bn(h, p["bn2_g"], p["bn2_b"], (0, 2))
    # PyTorch: reshape(b,s,n,c) -> permute(0,2,3,1) -> view(b*n, c, s);
    # channels-last equivalent is (b*n, s, c).
    h = h.reshape(b, s, n, c).transpose(0, 2, 1, 3).reshape(b * n, s, c)
    h = conv(h, p["conv1_w_t"], p["conv1_b"])
    h = bn(h, p["bn3_g"][None], p["bn3_b"][None], (0, 1))
    h = conv(h, p["conv2_w_t"], p["conv2_b"])
    h = bn(h, p["bn4_g"][None], p["bn4_b"][None], (0, 1))
    # PyTorch: view(b, n, c, s) -> permute(0, 3, 1, 2)  ==  (b, s, n, c).
    return h.reshape(b, n, s, c).transpose(0, 2, 1, 3)


if __name__ == "__main__":
    B, S, N, C = 2, 8, 16, 32   # batch, seq_len, node_cnt, hidden_dim
    key = jax.random.PRNGKey(0)
    kx, ka, kp = jax.random.split(key, 3)

    x = jax.random.normal(kx, (B, S, N, C), jnp.float32)
    adj = (jax.random.uniform(ka, (B, S, N, N)) < 0.3).astype(jnp.float32)
    adj = jnp.maximum(adj, jnp.swapaxes(adj, -1, -2))   # symmetric 0/1 adjacency

    params = init_params(kp, hidden_dim=C, node_cnt=N)

    out = jax.block_until_ready(graph_temporal_conv(x, adj, params))
    ref = reference_forward(x, adj, params)

    assert out.shape == (B, S, N, C), out.shape
    assert jnp.allclose(out, ref, atol=1e-2, rtol=1e-2), float(
        jnp.max(jnp.abs(out - ref)))
    print("KERNEL_OK")
</pallas_src>

<mosaic_0001>
module attributes {stable_mosaic.version = 11 : i64} {
  func.func @_fused_kernel(%arg0: memref<256x32xf32, #tpu.memory_space<vmem>>, %arg1: memref<256x256xf32, #tpu.memory_space<vmem>>, %arg2: memref<448x32xf32, #tpu.memory_space<vmem>>, %arg3: memref<4x16x1xf32, #tpu.memory_space<vmem>>, %arg4: memref<6x32xf32, #tpu.memory_space<vmem>>, %arg5: memref<256x32xf32, #tpu.memory_space<vmem>>) attributes {dimension_semantics = [], scalar_prefetch = 0 : i64, scratch_operands = 0 : i64, tpu.core_type = #tpu.core_type<tc>} {
    %c0 = arith.constant 0 : index
    %c0_0 = arith.constant 0 : index
    %0 = vector.load %arg0[%c0, %c0_0] : memref<256x32xf32, #tpu.memory_space<vmem>>, vector<256x32xf32>
    %c0_1 = arith.constant 0 : index
    %c0_2 = arith.constant 0 : index
    %1 = vector.load %arg1[%c0_1, %c0_2] : memref<256x256xf32, #tpu.memory_space<vmem>>, vector<256x256xf32>
    %c0_3 = arith.constant 0 : index
    %c0_4 = arith.constant 0 : index
    %2 = vector.load %arg2[%c0_3, %c0_4] : memref<448x32xf32, #tpu.memory_space<vmem>>, vector<64x32xf32>
    %c64 = arith.constant 64 : index
    %c0_5 = arith.constant 0 : index
    %3 = vector.load %arg2[%c64, %c0_5] : memref<448x32xf32, #tpu.memory_space<vmem>>, vector<64x32xf32>
    %c128 = arith.constant 128 : index
    %c0_6 = arith.constant 0 : index
    %4 = vector.load %arg2[%c128, %c0_6] : memref<448x32xf32, #tpu.memory_space<vmem>>, vector<160x32xf32>
    %c288 = arith.constant 288 : index
    %c0_7 = arith.constant 0 : index
    %5 = vector.load %arg2[%c288, %c0_7] : memref<448x32xf32, #tpu.memory_space<vmem>>, vector<160x32xf32>
    %cst = arith.constant dense<0.000000e+00> : vector<256x32xf32>
    %6 = tpu.matmul %1, %0, %cst {dimension_numbers = #tpu.dot_dimension_numbers<[1], [0], [0], [1], [0, 0, 1, 1], [], []>} : vector<256x256xf32>, vector<256x32xf32>, vector<256x32xf32> -> vector<256x32xf32>
    %7 = tpu.concatenate %6, %0 in 1 : vector<256x32xf32>, vector<256x32xf32> -> vector<256x64xf32>
    %cst_8 = arith.constant dense<0.000000e+00> : vector<256x32xf32>
    %8 = tpu.matmul %7, %2, %cst_8 {dimension_numbers = #tpu.dot_dimension_numbers<[1], [0], [0], [1], [0, 0, 1, 1], [], []>} : vector<256x64xf32>, vector<64x32xf32>, vector<256x32xf32> -> vector<256x32xf32>
    %cst_9 = arith.constant 0.000000e+00 : f32
    %9 = vector.broadcast %cst_9 : f32 to vector<256x32xf32>
    %10 = arith.maximumf %8, %9 : vector<256x32xf32>
    %11 = vector.shape_cast %10 : vector<256x32xf32> to vector<16x16x32xf32>
    %c0_10 = arith.constant 0 : index
    %c0_11 = arith.constant 0 : index
    %c0_12 = arith.constant 0 : index
    %12 = vector.load %arg3[%c0_10, %c0_11, %c0_12] : memref<4x16x1xf32, #tpu.memory_space<vmem>>, vector<1x16x1xf32>
    %13 = vector.shape_cast %12 : vector<1x16x1xf32> to vector<16x1xf32>
    %c1 = arith.constant 1 : index
    %c0_13 = arith.constant 0 : index
    %c0_14 = arith.constant 0 : index
    %14 = vector.load %arg3[%c1, %c0_13, %c0_14] : memref<4x16x1xf32, #tpu.memory_space<vmem>>, vector<1x16x1xf32>
    %15 = vector.shape_cast %14 : vector<1x16x1xf32> to vector<16x1xf32>
    %cst_15 = arith.constant dense<0.000000e+00> : vector<16x16xf32>
    %16 = vector.multi_reduction <add>, %11, %cst_15 [2] : vector<16x16x32xf32> to vector<16x16xf32>
    %17 = vector.shape_cast %16 : vector<16x16xf32> to vector<16x16x1xf32>
    %cst_16 = arith.constant 3.200000e+01 : f32
    %18 = vector.broadcast %cst_16 : f32 to vector<16x16x1xf32>
    %19 = arith.divf %17, %18 : vector<16x16x1xf32>
    %cst_17 = arith.constant dense<0.000000e+00> : vector<16x1xf32>
    %20 = vector.multi_reduction <add>, %19, %cst_17 [0] : vector<16x16x1xf32> to vector<16x1xf32>
    %21 = vector.shape_cast %20 : vector<16x1xf32> to vector<1x16x1xf32>
    %cst_18 = arith.constant 1.600000e+01 : f32
    %22 = vector.broadcast %cst_18 : f32 to vector<1x16x1xf32>
    %23 = arith.divf %21, %22 : vector<1x16x1xf32>
    %24 = arith.mulf %11, %11 : vector<16x16x32xf32>
    %cst_19 = arith.constant dense<0.000000e+00> : vector<16x16xf32>
    %25 = vector.multi_reduction <add>, %24, %cst_19 [2] : vector<16x16x32xf32> to vector<16x16xf32>
    %26 = vector.shape_cast %25 : vector<16x16xf32> to vector<16x16x1xf32>
    %cst_20 = arith.constant 3.200000e+01 : f32
    %27 = vector.broadcast %cst_20 : f32 to vector<16x16x1xf32>
    %28 = arith.divf %26, %27 : vector<16x16x1xf32>
    %cst_21 = arith.constant dense<0.000000e+00> : vector<16x1xf32>
    %29 = vector.multi_reduction <add>, %28, %cst_21 [0] : vector<16x16x1xf32> to vector<16x1xf32>
    %30 = vector.shape_cast %29 : vector<16x1xf32> to vector<1x16x1xf32>
    %cst_22 = arith.constant 1.600000e+01 : f32
    %31 = vector.broadcast %cst_22 : f32 to vector<1x16x1xf32>
    %32 = arith.divf %30, %31 : vector<1x16x1xf32>
    %33 = arith.mulf %23, %23 : vector<1x16x1xf32>
    %34 = arith.subf %32, %33 : vector<1x16x1xf32>
    %35 = vector.broadcast %23 : vector<1x16x1xf32> to vector<16x16x32xf32>
    %36 = arith.subf %11, %35 : vector<16x16x32xf32>
    %cst_23 = arith.constant 9.99999974E-6 : f32
    %37 = vector.broadcast %cst_23 : f32 to vector<1x16x1xf32>
    %38 = arith.addf %34, %37 : vector<1x16x1xf32>
    %39 = math.rsqrt %38 : vector<1x16x1xf32>
    %40 = vector.broadcast %39 : vector<1x16x1xf32> to vector<16x16x32xf32>
    %41 = arith.mulf %36, %40 : vector<16x16x32xf32>
    %42 = vector.shape_cast %13 : vector<16x1xf32> to vector<1x16x1xf32>
    %43 = vector.broadcast %42 : vector<1x16x1xf32> to vector<16x16x32xf32>
    %44 = arith.mulf %41, %43 : vector<16x16x32xf32>
    %45 = vector.shape_cast %15 : vector<16x1xf32> to vector<1x16x1xf32>
    %46 = vector.broadcast %45 : vector<1x16x1xf32> to vector<16x16x32xf32>
    %47 = arith.addf %44, %46 : vector<16x16x32xf32>
    %48 = vector.shape_cast %47 : vector<16x16x32xf32> to vector<256x32xf32>
    %cst_24 = arith.constant dense<0.000000e+00> : vector<256x32xf32>
    %49 = tpu.matmul %1, %48, %cst_24 {dimension_numbers = #tpu.dot_dimension_numbers<[1], [0], [0], [1], [0, 0, 1, 1], [], []>} : vector<256x256xf32>, vector<256x32xf32>, vector<256x32xf32> -> vector<256x32xf32>
    %50 = tpu.concatenate %49, %48 in 1 : vector<256x32xf32>, vector<256x32xf32> -> vector<256x64xf32>
    %cst_25 = arith.constant dense<0.000000e+00> : vector<256x32xf32>
    %51 = tpu.matmul %50, %3, %cst_25 {dimension_numbers = #tpu.dot_dimension_numbers<[1], [0], [0], [1], [0, 0, 1, 1], [], []>} : vector<256x64xf32>, vector<64x32xf32>, vector<256x32xf32> -> vector<256x32xf32>
    %cst_26 = arith.constant 0.000000e+00 : f32
    %52 = vector.broadcast %cst_26 : f32 to vector<256x32xf32>
    %53 = arith.maximumf %51, %52 : vector<256x32xf32>
    %54 = vector.shape_cast %53 : vector<256x32xf32> to vector<16x16x32xf32>
    %c2 = arith.constant 2 : index
    %c0_27 = arith.constant 0 : index
    %c0_28 = arith.constant 0 : index
    %55 = vector.load %arg3[%c2, %c0_27, %c0_28] : memref<4x16x1xf32, #tpu.memory_space<vmem>>, vector<1x16x1xf32>
    %56 = vector.shape_cast %55 : vector<1x16x1xf32> to vector<16x1xf32>
    %c3 = arith.constant 3 : index
    %c0_29 = arith.constant 0 : index
    %c0_30 = arith.constant 0 : index
    %57 = vector.load %arg3[%c3, %c0_29, %c0_30] : memref<4x16x1xf32, #tpu.memory_space<vmem>>, vector<1x16x1xf32>
    %58 = vector.shape_cast %57 : vector<1x16x1xf32> to vector<16x1xf32>
    %cst_31 = arith.constant dense<0.000000e+00> : vector<16x16xf32>
    %59 = vector.multi_reduction <add>, %54, %cst_31 [2] : vector<16x16x32xf32> to vector<16x16xf32>
    %60 = vector.shape_cast %59 : vector<16x16xf32> to vector<16x16x1xf32>
    %cst_32 = arith.constant 3.200000e+01 : f32
    %61 = vector.broadcast %cst_32 : f32 to vector<16x16x1xf32>
    %62 = arith.divf %60, %61 : vector<16x16x1xf32>
    %cst_33 = arith.constant dense<0.000000e+00> : vector<16x1xf32>
    %63 = vector.multi_reduction <add>, %62, %cst_33 [0] : vector<16x16x1xf32> to vector<16x1xf32>
    %64 = vector.shape_cast %63 : vector<16x1xf32> to vector<1x16x1xf32>
    %cst_34 = arith.constant 1.600000e+01 : f32
    %65 = vector.broadcast %cst_34 : f32 to vector<1x16x1xf32>
    %66 = arith.divf %64, %65 : vector<1x16x1xf32>
    %67 = arith.mulf %54, %54 : vector<16x16x32xf32>
    %cst_35 = arith.constant dense<0.000000e+00> : vector<16x16xf32>
    %68 = vector.multi_reduction <add>, %67, %cst_35 [2] : vector<16x16x32xf32> to vector<16x16xf32>
    %69 = vector.shape_cast %68 : vector<16x16xf32> to vector<16x16x1xf32>
    %cst_36 = arith.constant 3.200000e+01 : f32
    %70 = vector.broadcast %cst_36 : f32 to vector<16x16x1xf32>
    %71 = arith.divf %69, %70 : vector<16x16x1xf32>
    %cst_37 = arith.constant dense<0.000000e+00> : vector<16x1xf32>
    %72 = vector.multi_reduction <add>, %71, %cst_37 [0] : vector<16x16x1xf32> to vector<16x1xf32>
    %73 = vector.shape_cast %72 : vector<16x1xf32> to vector<1x16x1xf32>
    %cst_38 = arith.constant 1.600000e+01 : f32
    %74 = vector.broadcast %cst_38 : f32 to vector<1x16x1xf32>
    %75 = arith.divf %73, %74 : vector<1x16x1xf32>
    %76 = arith.mulf %66, %66 : vector<1x16x1xf32>
    %77 = arith.subf %75, %76 : vector<1x16x1xf32>
    %78 = vector.broadcast %66 : vector<1x16x1xf32> to vector<16x16x32xf32>
    %79 = arith.subf %54, %78 : vector<16x16x32xf32>
    %cst_39 = arith.constant 9.99999974E-6 : f32
    %80 = vector.broadcast %cst_39 : f32 to vector<1x16x1xf32>
    %81 = arith.addf %77, %80 : vector<1x16x1xf32>
    %82 = math.rsqrt %81 : vector<1x16x1xf32>
    %83 = vector.broadcast %82 : vector<1x16x1xf32> to vector<16x16x32xf32>
    %84 = arith.mulf %79, %83 : vector<16x16x32xf32>
    %85 = vector.shape_cast %56 : vector<16x1xf32> to vector<1x16x1xf32>
    %86 = vector.broadcast %85 : vector<1x16x1xf32> to vector<16x16x32xf32>
    %87 = arith.mulf %84, %86 : vector<16x16x32xf32>
    %88 = vector.shape_cast %58 : vector<16x1xf32> to vector<1x16x1xf32>
    %89 = vector.broadcast %88 : vector<1x16x1xf32> to vector<16x16x32xf32>
    %90 = arith.addf %87, %89 : vector<16x16x32xf32>
    %91 = vector.shape_cast %90 : vector<16x16x32xf32> to vector<256x32xf32>
    %c0_40 = arith.constant 0 : index
    %c0_41 = arith.constant 0 : index
    %92 = vector.load %arg4[%c0_40, %c0_41] : memref<6x32xf32, #tpu.memory_space<vmem>>, vector<1x32xf32>
    %93 = vector.shape_cast %91 : vector<256x32xf32> to vector<2x8x16x32xf32>
    %cst_42 = arith.constant 0.000000e+00 : f32
    %94 = vector.broadcast %cst_42 : f32 to vector<2x2x16x32xf32>
    %95 = tpu.concatenate %94, %93, %94 in 1 : vector<2x2x16x32xf32>, vector<2x8x16x32xf32>, vector<2x2x16x32xf32> -> vector<2x12x16x32xf32>
    %96 = vector.extract_strided_slice %95 {offsets = [0, 0, 0, 0], sizes = [2, 8, 16, 32], strides = [1, 1, 1, 1]} : vector<2x12x16x32xf32> to vector<2x8x16x32xf32>
    %97 = vector.shape_cast %96 : vector<2x8x16x32xf32> to vector<256x32xf32>
    %98 = vector.extract_strided_slice %95 {offsets = [0, 1, 0, 0], sizes = [2, 8, 16, 32], strides = [1, 1, 1, 1]} : vector<2x12x16x32xf32> to vector<2x8x16x32xf32>
    %99 = vector.shape_cast %98 : vector<2x8x16x32xf32> to vector<256x32xf32>
    %100 = vector.extract_strided_slice %95 {offsets = [0, 2, 0, 0], sizes = [2, 8, 16, 32], strides = [1, 1, 1, 1]} : vector<2x12x16x32xf32> to vector<2x8x16x32xf32>
    %101 = vector.shape_cast %100 : vector<2x8x16x32xf32> to vector<256x32xf32>
    %102 = vector.extract_strided_slice %95 {offsets = [0, 3, 0, 0], sizes = [2, 8, 16, 32], strides = [1, 1, 1, 1]} : vector<2x12x16x32xf32> to vector<2x8x16x32xf32>
    %103 = vector.shape_cast %102 : vector<2x8x16x32xf32> to vector<256x32xf32>
    %104 = vector.extract_strided_slice %95 {offsets = [0, 4, 0, 0], sizes = [2, 8, 16, 32], strides = [1, 1, 1, 1]} : vector<2x12x16x32xf32> to vector<2x8x16x32xf32>
    %105 = vector.shape_cast %104 : vector<2x8x16x32xf32> to vector<256x32xf32>
    %106 = tpu.concatenate %97, %99, %101, %103 in 1 : vector<256x32xf32>, vector<256x32xf32>, vector<256x32xf32>, vector<256x32xf32> -> vector<256x128xf32>
    %107 = vector.extract_strided_slice %4 {offsets = [0, 0], sizes = [128, 32], strides = [1, 1]} : vector<160x32xf32> to vector<128x32xf32>
    %cst_43 = arith.constant dense<0.000000e+00> : vector<256x32xf32>
    %108 = tpu.matmul %106, %107, %cst_43 {dimension_numbers = #tpu.dot_dimension_numbers<[1], [0], [0], [1], [0, 0, 1, 1], [], []>} : vector<256x128xf32>, vector<128x32xf32>, vector<256x32xf32> -> vector<256x32xf32>
    %109 = vector.extract_strided_slice %4 {offsets = [128, 0], sizes = [32, 32], strides = [1, 1]} : vector<160x32xf32> to vector<32x32xf32>
    %cst_44 = arith.constant dense<0.000000e+00> : vector<256x32xf32>
    %110 = tpu.matmul %105, %109, %cst_44 {dimension_numbers = #tpu.dot_dimension_numbers<[1], [0], [0], [1], [0, 0, 1, 1], [], []>} : vector<256x32xf32>, vector<32x32xf32>, vector<256x32xf32> -> vector<256x32xf32>
    %111 = arith.addf %108, %110 : vector<256x32xf32>
    %112 = vector.broadcast %92 : vector<1x32xf32> to vector<256x32xf32>
    %113 = arith.addf %111, %112 : vector<256x32xf32>
    %cst_45 = arith.constant 0.000000e+00 : f32
    %114 = vector.broadcast %cst_45 : f32 to vector<256x32xf32>
    %115 = arith.maximumf %113, %114 : vector<256x32xf32>
    %c1_46 = arith.constant 1 : index
    %c0_47 = arith.constant 0 : index
    %116 = vector.load %arg4[%c1_46, %c0_47] : memref<6x32xf32, #tpu.memory_space<vmem>>, vector<1x32xf32>
    %c2_48 = arith.constant 2 : index
    %c0_49 = arith.constant 0 : index
    %117 = vector.load %arg4[%c2_48, %c0_49] : memref<6x32xf32, #tpu.memory_space<vmem>>, vector<1x32xf32>
    %cst_50 = arith.constant dense<0.000000e+00> : vector<32xf32>
    %118 = vector.multi_reduction <add>, %115, %cst_50 [0] : vector<256x32xf32> to vector<32xf32>
    %119 = vector.shape_cast %118 : vector<32xf32> to vector<1x32xf32>
    %cst_51 = arith.constant 2.560000e+02 : f32
    %120 = vector.broadcast %cst_51 : f32 to vector<1x32xf32>
    %121 = arith.divf %119, %120 : vector<1x32xf32>
    %122 = arith.mulf %115, %115 : vector<256x32xf32>
    %cst_52 = arith.constant dense<0.000000e+00> : vector<32xf32>
    %123 = vector.multi_reduction <add>, %122, %cst_52 [0] : vector<256x32xf32> to vector<32xf32>
    %124 = vector.shape_cast %123 : vector<32xf32> to vector<1x32xf32>
    %cst_53 = arith.constant 2.560000e+02 : f32
    %125 = vector.broadcast %cst_53 : f32 to vector<1x32xf32>
    %126 = arith.divf %124, %125 : vector<1x32xf32>
    %127 = arith.mulf %121, %121 : vector<1x32xf32>
    %128 = arith.subf %126, %127 : vector<1x32xf32>
    %129 = vector.broadcast %121 : vector<1x32xf32> to vector<256x32xf32>
    %130 = arith.subf %115, %129 : vector<256x32xf32>
    %cst_54 = arith.constant 9.99999974E-6 : f32
    %131 = vector.broadcast %cst_54 : f32 to vector<1x32xf32>
    %132 = arith.addf %128, %131 : vector<1x32xf32>
    %133 = math.rsqrt %132 : vector<1x32xf32>
    %134 = vector.broadcast %133 : vector<1x32xf32> to vector<256x32xf32>
    %135 = arith.mulf %130, %134 : vector<256x32xf32>
    %136 = vector.broadcast %116 : vector<1x32xf32> to vector<256x32xf32>
    %137 = arith.mulf %135, %136 : vector<256x32xf32>
    %138 = vector.broadcast %117 : vector<1x32xf32> to vector<256x32xf32>
    %139 = arith.addf %137, %138 : vector<256x32xf32>
    %c3_55 = arith.constant 3 : index
    %c0_56 = arith.constant 0 : index
    %140 = vector.load %arg4[%c3_55, %c0_56] : memref<6x32xf32, #tpu.memory_space<vmem>>, vector<1x32xf32>
    %141 = vector.shape_cast %139 : vector<256x32xf32> to vector<2x8x16x32xf32>
    %cst_57 = arith.constant 0.000000e+00 : f32
    %142 = vector.broadcast %cst_57 : f32 to vector<2x2x16x32xf32>
    %143 = tpu.concatenate %142, %141, %142 in 1 : vector<2x2x16x32xf32>, vector<2x8x16x32xf32>, vector<2x2x16x32xf32> -> vector<2x12x16x32xf32>
    %144 = vector.extract_strided_slice %143 {offsets = [0, 0, 0, 0], sizes = [2, 8, 16, 32], strides = [1, 1, 1, 1]} : vector<2x12x16x32xf32> to vector<2x8x16x32xf32>
    %145 = vector.shape_cast %144 : vector<2x8x16x32xf32> to vector<256x32xf32>
    %146 = vector.extract_strided_slice %143 {offsets = [0, 1, 0, 0], sizes = [2, 8, 16, 32], strides = [1, 1, 1, 1]} : vector<2x12x16x32xf32> to vector<2x8x16x32xf32>
    %147 = vector.shape_cast %146 : vector<2x8x16x32xf32> to vector<256x32xf32>
    %148 = vector.extract_strided_slice %143 {offsets = [0, 2, 0, 0], sizes = [2, 8, 16, 32], strides = [1, 1, 1, 1]} : vector<2x12x16x32xf32> to vector<2x8x16x32xf32>
    %149 = vector.shape_cast %148 : vector<2x8x16x32xf32> to vector<256x32xf32>
    %150 = vector.extract_strided_slice %143 {offsets = [0, 3, 0, 0], sizes = [2, 8, 16, 32], strides = [1, 1, 1, 1]} : vector<2x12x16x32xf32> to vector<2x8x16x32xf32>
    %151 = vector.shape_cast %150 : vector<2x8x16x32xf32> to vector<256x32xf32>
    %152 = vector.extract_strided_slice %143 {offsets = [0, 4, 0, 0], sizes = [2, 8, 16, 32], strides = [1, 1, 1, 1]} : vector<2x12x16x32xf32> to vector<2x8x16x32xf32>
    %153 = vector.shape_cast %152 : vector<2x8x16x32xf32> to vector<256x32xf32>
    %154 = tpu.concatenate %145, %147, %149, %151 in 1 : vector<256x32xf32>, vector<256x32xf32>, vector<256x32xf32>, vector<256x32xf32> -> vector<256x128xf32>
    %155 = vector.extract_strided_slice %5 {offsets = [0, 0], sizes = [128, 32], strides = [1, 1]} : vector<160x32xf32> to vector<128x32xf32>
    %cst_58 = arith.constant dense<0.000000e+00> : vector<256x32xf32>
    %156 = tpu.matmul %154, %155, %cst_58 {dimension_numbers = #tpu.dot_dimension_numbers<[1], [0], [0], [1], [0, 0, 1, 1], [], []>} : vector<256x128xf32>, vector<128x32xf32>, vector<256x32xf32> -> vector<256x32xf32>
    %157 = vector.extract_strided_slice %5 {offsets = [128, 0], sizes = [32, 32], strides = [1, 1]} : vector<160x32xf32> to vector<32x32xf32>
    %cst_59 = arith.constant dense<0.000000e+00> : vector<256x32xf32>
    %158 = tpu.matmul %153, %157, %cst_59 {dimension_numbers = #tpu.dot_dimension_numbers<[1], [0], [0], [1], [0, 0, 1, 1], [], []>} : vector<256x32xf32>, vector<32x32xf32>, vector<256x32xf32> -> vector<256x32xf32>
    %159 = arith.addf %156, %158 : vector<256x32xf32>
    %160 = vector.broadcast %140 : vector<1x32xf32> to vector<256x32xf32>
    %161 = arith.addf %159, %160 : vector<256x32xf32>
    %cst_60 = arith.constant 0.000000e+00 : f32
    %162 = vector.broadcast %cst_60 : f32 to vector<256x32xf32>
    %163 = arith.maximumf %161, %162 : vector<256x32xf32>
    %c4 = arith.constant 4 : index
    %c0_61 = arith.constant 0 : index
    %164 = vector.load %arg4[%c4, %c0_61] : memref<6x32xf32, #tpu.memory_space<vmem>>, vector<1x32xf32>
    %c5 = arith.constant 5 : index
    %c0_62 = arith.constant 0 : index
    %165 = vector.load %arg4[%c5, %c0_62] : memref<6x32xf32, #tpu.memory_space<vmem>>, vector<1x32xf32>
    %cst_63 = arith.constant dense<0.000000e+00> : vector<32xf32>
    %166 = vector.multi_reduction <add>, %163, %cst_63 [0] : vector<256x32xf32> to vector<32xf32>
    %167 = vector.shape_cast %166 : vector<32xf32> to vector<1x32xf32>
    %cst_64 = arith.constant 2.560000e+02 : f32
    %168 = vector.broadcast %cst_64 : f32 to vector<1x32xf32>
    %169 = arith.divf %167, %168 : vector<1x32xf32>
    %170 = arith.mulf %163, %163 : vector<256x32xf32>
    %cst_65 = arith.constant dense<0.000000e+00> : vector<32xf32>
    %171 = vector.multi_reduction <add>, %170, %cst_65 [0] : vector<256x32xf32> to vector<32xf32>
    %172 = vector.shape_cast %171 : vector<32xf32> to vector<1x32xf32>
    %cst_66 = arith.constant 2.560000e+02 : f32
    %173 = vector.broadcast %cst_66 : f32 to vector<1x32xf32>
    %174 = arith.divf %172, %173 : vector<1x32xf32>
    %175 = arith.mulf %169, %169 : vector<1x32xf32>
    %176 = arith.subf %174, %175 : vector<1x32xf32>
    %177 = vector.broadcast %169 : vector<1x32xf32> to vector<256x32xf32>
    %178 = arith.subf %163, %177 : vector<256x32xf32>
    %cst_67 = arith.constant 9.99999974E-6 : f32
    %179 = vector.broadcast %cst_67 : f32 to vector<1x32xf32>
    %180 = arith.addf %176, %179 : vector<1x32xf32>
    %181 = math.rsqrt %180 : vector<1x32xf32>
    %182 = vector.broadcast %181 : vector<1x32xf32> to vector<256x32xf32>
    %183 = arith.mulf %178, %182 : vector<256x32xf32>
    %184 = vector.broadcast %164 : vector<1x32xf32> to vector<256x32xf32>
    %185 = arith.mulf %183, %184 : vector<256x32xf32>
    %186 = vector.broadcast %165 : vector<1x32xf32> to vector<256x32xf32>
    %187 = arith.addf %185, %186 : vector<256x32xf32>
    %c0_68 = arith.constant 0 : index
    %c0_69 = arith.constant 0 : index
    %188 = vector.load %arg5[%c0_68, %c0_69] : memref<256x32xf32, #tpu.memory_space<vmem>>, vector<256x32xf32>
    tpu.vector_store %arg5[%c0_68, %c0_69], %187 {strides = array<i32>} : memref<256x32xf32, #tpu.memory_space<vmem>>, vector<256x32xf32>,
    return
  }
}

</mosaic_0001>

<bundles_post_ra>
// kernel: graph_temporal_conv.1
= control target key start
LH: loop header
LB: loop body
LE: loop exit
PB: predicated region body
PF: predicated region fallthrough
CT: control target
= control target key end

     0   :  { %v10577_v3 = vmov 0.0|0.0   ;;  %s10571_s0 = inlined_call_operand.vmem [shape: f32[256,32], index: 0, kind: input, shape index: {}]   ;;  %s10572_s1 = inlined_call_operand.vmem [shape: f32[256,256], index: 1, kind: input, shape index: {}]   ;;  %s10573_s2 = inlined_call_operand.vmem [shape: f32[448,32], index: 2, kind: input, shape index: {}]   ;;  %s10574_s3 = inlined_call_operand.vmem [shape: f32[4,16,1], index: 3, kind: input, shape index: {}]   ;;  %s10575_s4 = inlined_call_operand.vmem [shape: f32[6,32], index: 4, kind: input, shape index: {}]   ;;  %s10576_s5 = inlined_call_operand.hbm [shape: f32[256,32], index: 5, kind: output, shape index: {}]  }
   0x1   :  { %v21_v0 = vld [vmem:[%s10571_s0] sm:$0xff]  ;;  %v22_v1 = vld [vmem:[%s10571_s0 + $0x8] sm:$0xff]  ;;  %v23_v2 = vld [vmem:[%s10571_s0 + $0x10] sm:$0xff]  ;;  %6050 = vmatprep.subr.bf16.mxu0 %v10577_v3 }
   0x2   :  { %v6051_v4 = vpack.c.bf16 %v22_v1, %v21_v0  ;;  %v24_v5 = vld [vmem:[%s10571_s0 + $0x18] sm:$0xff]  ;;  %v25_v7 = vld [vmem:[%s10571_s0 + $0x20] sm:$0xff]  ;;  %v26_v8 = vld [vmem:[%s10571_s0 + $0x28] sm:$0xff] }
   0x3   :  { %v6054_v6 = vpack.c.bf16 %v24_v5, %v23_v2  ;;  %v6057_v9 = vpack.c.bf16 %v26_v8, %v25_v7  ;;  %v27_v10 = vld [vmem:[%s10571_s0 + $0x30] sm:$0xff]  ;;  %v28_v11 = vld [vmem:[%s10571_s0 + $0x38] sm:$0xff]  ;;  %v6949_v12 = vld [vmem:[%s10572_s1 + $0x8] sm:$0xff] }
   0x4   :  { %6052 = vmatpush1.bf16.msra.mxu0 %v6051_v4  ;;  %v6060_v13 = vpack.c.bf16 %v28_v11, %v27_v10  ;;  %237 = vmatprep.mubr.f32.mxu0 %v6949_v12  ;;  %v29_v14 = vld [vmem:[%s10571_s0 + $0x40] sm:$0xff]  ;;  %v30_v15 = vld [vmem:[%s10571_s0 + $0x48] sm:$0xff]  ;;  %v31_v17 = vld [vmem:[%s10571_s0 + $0x50] sm:$0xff] }
   0x5   :  { %6053 = vmatprep.subr.bf16.mxu0 %v10577_v3  ;;  %v6063_v16 = vpack.c.bf16 %v30_v15, %v29_v14  ;;  %v6966_v18 = vld [vmem:[%s10571_s0 + $0x58] sm:$0xff]  ;;  %v6973_v20 = vld [vmem:[%s10571_s0 + $0x60] sm:$0xff]  ;;  %v6978_v21 = vld [vmem:[%s10571_s0 + $0x68] sm:$0xff] }
   0x6   :  { %v6066_v19 = vpack.c.bf16 %v6966_v18, %v31_v17  ;;  %v6069_v22 = vpack.c.bf16 %v6978_v21, %v6973_v20  ;;  %v6986_v23 = vld [vmem:[%s10571_s0 + $0x70] sm:$0xff]  ;;  %v6991_v24 = vld [vmem:[%s10571_s0 + $0x78] sm:$0xff] }
   0x8   :  { %6055 = vmatpush1.bf16.msra.mxu0 %v6054_v6 }
   0x9   :  { %6056 = vmatprep.subr.bf16.mxu0 %v10577_v3 }
   0xc   :  { %6058 = vmatpush1.bf16.msra.mxu0 %v6057_v9 }
   0xd   :  { %6059 = vmatprep.subr.bf16.mxu0 %v10577_v3 }
  0x10   :  { %6061 = vmatpush1.bf16.msra.mxu0 %v6060_v13 }
  0x11   :  { %6062 = vmatprep.subr.bf16.mxu0 %v10577_v3 }
  0x14   :  { %6064 = vmatpush1.bf16.msra.mxu0 %v6063_v16 }
  0x15   :  { %6065 = vmatprep.subr.bf16.mxu0 %v10577_v3 }
  0x18   :  { %6067 = vmatpush1.bf16.msra.mxu0 %v6066_v19 }
  0x19   :  { %6068 = vmatprep.subr.bf16.mxu0 %v10577_v3 }
  0x1a   :  { %10 = vsyncpa [#allocation3], 0  ;;  %v6072_v25 = vpack.c.bf16 %v6991_v24, %v6986_v23  ;;  %v6999_v26 = vld [vmem:[%s10571_s0 + $0x80] sm:$0xff]  ;;  %v7004_v27 = vld [vmem:[%s10571_s0 + $0x88] sm:$0xff]  ;;  %s6881_s10 = smov 32   ;;  %vm526_vm0 = vcmask 261120  }
  0x1b   :  { %v6075_v28 = vpack.c.bf16 %v7004_v27, %v6999_v26  ;;  %v7012_v29 = vld [vmem:[%s10571_s0 + $0x90] sm:$0xff]  ;;  %v7017_v30 = vld [vmem:[%s10571_s0 + $0x98] sm:$0xff]  ;;  %430 = vrot.lane.b32.xlu0 %v21_v0, %s6881_s10  ;;  %v7026_v32 = vld [vmem:[%s10571_s0 + $0xa0] sm:$0xff]  ;;  %vm559_vm1 = vcmask 523264   ;;  %s6883_s20 = smov 96   ;;  %s6885_s25 = smov 64  }
  0x1c   :  { %6070 = vmatpush1.bf16.msra.mxu0 %v6069_v22  ;;  %v6078_v31 = vpack.c.bf16 %v7017_v30, %v7012_v29  ;;  %v7031_v33 = vld [vmem:[%s10571_s0 + $0xa8] sm:$0xff]  ;;  %434 = vrot.lane.b32.xlu1 %v23_v2, %s6881_s10  ;;  %v7041_v35 = vld [vmem:[%s10571_s0 + $0xb0] sm:$0xff]  ;;  %v7046_v36 = vld [vmem:[%s10571_s0 + $0xb8] sm:$0xff]  ;;  %vm3045_vm2 = vcmask 785408  }
  0x1d   :  { %6071 = vmatprep.subr.bf16.mxu0 %v10577_v3  ;;  %v6081_v34 = vpack.c.bf16 %v7031_v33, %v7026_v32  ;;  %v6084_v37 = vpack.c.bf16 %v7046_v36, %v7041_v35  ;;  %v7056_v38 = vld [vmem:[%s10571_s0 + $0xc0] sm:$0xff]  ;;  %v7061_v39 = vld [vmem:[%s10571_s0 + $0xc8] sm:$0xff]  ;;  %v7071_v41 = vld [vmem:[%s10571_s0 + $0xd0] sm:$0xff] }
  0x1e   :  { %v6087_v40 = vpack.c.bf16 %v7061_v39, %v7056_v38  ;;  %v7076_v42 = vld [vmem:[%s10571_s0 + $0xd8] sm:$0xff]  ;;  %v7086_v44 = vld [vmem:[%s10571_s0 + $0xe0] sm:$0xff]  ;;  %v7091_v45 = vld [vmem:[%s10571_s0 + $0xe8] sm:$0xff] }
  0x1f   :  { %432 = vrot.lane.b32.xlu0 %v22_v1, %s6881_s10  ;;  %v6090_v43 = vpack.c.bf16 %v7076_v42, %v7071_v41  ;;  %v6093_v46 = vpack.c.bf16 %v7091_v45, %v7086_v44  ;;  %v7101_v47 = vld [vmem:[%s10571_s0 + $0xf0] sm:$0xff]  ;;  %v7106_v48 = vld [vmem:[%s10571_s0 + $0xf8] sm:$0xff]  ;;  %v117_v50 = vld [vmem:[%s10573_s2] sm:$0xff] }
  0x20   :  { %6073 = vmatpush1.bf16.msra.mxu0 %v6072_v25  ;;  %436 = vrot.lane.b32.xlu1 %v24_v5, %s6881_s10  ;;  %v6096_v49 = vpack.c.bf16 %v7106_v48, %v7101_v47  ;;  %v118_v51 = vld [vmem:[%s10573_s2 + $0x8] sm:$0xff]  ;;  %v119_v52 = vld [vmem:[%s10573_s2 + $0x10] sm:$0xff]  ;;  %v53_v53 = vld [vmem:[%s10572_s1] sm:$0xff] }
  0x21   :  { %6074 = vmatprep.subr.bf16.mxu0 %v10577_v3  ;;  %v6098_v54 = vpack.c.bf16 %v118_v51, %v117_v50  ;;  %v120_v55 = vld [vmem:[%s10573_s2 + $0x18] sm:$0xff]  ;;  %v121_v58 = vld [vmem:[%s10573_s2 + $0x20] sm:$0xff]  ;;  %v122_v59 = vld [vmem:[%s10573_s2 + $0x28] sm:$0xff] }
  0x22   :  { %v56_v56 = vld [vmem:[%s10572_s1 + $0x18] sm:$0xff]  ;;  %v6102_v57 = vpack.c.bf16 %v120_v55, %v119_v52  ;;  %v55_v60 = vld [vmem:[%s10572_s1 + $0x10] sm:$0xff]  ;;  %v58_v61 = vld [vmem:[%s10572_s1 + $0x28] sm:$0xff]  ;;  %v6106_v62 = vpack.c.bf16 %v122_v59, %v121_v58 }
  0x23   :  { %438 = vrot.lane.b32.xlu0 %v25_v7, %s6881_s10  ;;  %6099 = vmatprep.subr.bf16.mxu1 %v6098_v54  ;;  %v57_v63 = vld [vmem:[%s10572_s1 + $0x20] sm:$0xff]  ;;  %v60_v0 = vld [vmem:[%s10572_s1 + $0x38] sm:$0xff]  ;;  %v59_v1 = vld [vmem:[%s10572_s1 + $0x30] sm:$0xff] }
  0x24   :  { %6076 = vmatpush1.bf16.msra.mxu0 %v6075_v28  ;;  %440 = vrot.lane.b32.xlu1 %v26_v8, %s6881_s10  ;;  %v62_v2 = vld [vmem:[%s10572_s1 + $0x48] sm:$0xff]  ;;  %v61_v4 = vld [vmem:[%s10572_s1 + $0x40] sm:$0xff]  ;;  %v64_v5 = vld [vmem:[%s10572_s1 + $0x58] sm:$0xff] }
  0x25   :  { %6077 = vmatprep.subr.bf16.mxu0 %v10577_v3  ;;  %6101 = vmatpush3.bf16.msra.mxu1 %v6098_v54  ;;  %v63_v6 = vld [vmem:[%s10572_s1 + $0x50] sm:$0xff]  ;;  %v66_v7 = vld [vmem:[%s10572_s1 + $0x68] sm:$0xff]  ;;  %v65_v8 = vld [vmem:[%s10572_s1 + $0x60] sm:$0xff] }
  0x26   :  { %6103 = vmatprep.subr.bf16.mxu1 %v6102_v57  ;;  %v68_v9 = vld [vmem:[%s10572_s1 + $0x78] sm:$0xff]  ;;  %v69_v13 = vld [vmem:[%s10572_s1 + $0x80] sm:$0xff]  ;;  %v74_v16 = vld [vmem:[%s10572_s1 + $0xa8] sm:$0xff] }
  0x27   :  { %442 = vrot.lane.b32.xlu0 %v27_v10, %s6881_s10  ;;  %v67_v10 = vld [vmem:[%s10572_s1 + $0x70] sm:$0xff]  ;;  %v80_v22 = vld [vmem:[%s10572_s1 + $0xd8] sm:$0xff]  ;;  %v81_v25 = vld [vmem:[%s10572_s1 + $0xe0] sm:$0xff] }
  0x28   :  { %6079 = vmatpush1.bf16.msra.mxu0 %v6078_v31  ;;  %444 = vrot.lane.b32.xlu1 %v28_v11, %s6881_s10  ;;  %v70_v11 = vld [vmem:[%s10572_s1 + $0x88] sm:$0xff]  ;;  %v75_v19 = vld [vmem:[%s10572_s1 + $0xb0] sm:$0xff]  ;;  %v105_v52 = vld [vmem:[%s10572_s1 + $0x1a0] sm:$0xff] }
  0x29   :  { %6080 = vmatprep.subr.bf16.mxu0 %v10577_v3  ;;  %6105 = vmatpush3.bf16.msra.mxu1 %v6102_v57  ;;  %v86_v28 = vld [vmem:[%s10572_s1 + $0x108] sm:$0xff]  ;;  %v87_v31 = vld [vmem:[%s10572_s1 + $0x110] sm:$0xff]  ;;  %v112_v57 = vld [vmem:[%s10572_s1 + $0x1d8] sm:$0xff] }
  0x2a   :  { %6107 = vmatprep.subr.bf16.mxu1 %v6106_v62  ;;  %v103_v50 = vld [vmem:[%s10572_s1 + $0x190] sm:$0xff]  ;;  %v106_v51 = vld [vmem:[%s10572_s1 + $0x1a8] sm:$0xff] }
  0x2b   :  { %446 = vrot.lane.b32.xlu0 %v29_v14, %s6881_s10  ;;  %v72_v14 = vld [vmem:[%s10572_s1 + $0x98] sm:$0xff]  ;;  %v107_v54 = vld [vmem:[%s10572_s1 + $0x1b0] sm:$0xff]  ;;  %v110_v55 = vld [vmem:[%s10572_s1 + $0x1c8] sm:$0xff] }
  0x2c   :  { %6082 = vmatpush1.bf16.msra.mxu0 %v6081_v34  ;;  %448 = vrot.lane.b32.xlu1 %v30_v15, %s6881_s10  ;;  %v71_v15 = vld [vmem:[%s10572_s1 + $0x90] sm:$0xff]  ;;  %v92_v34 = vld [vmem:[%s10572_s1 + $0x138] sm:$0xff]  ;;  %v114_v59 = vld [vmem:[%s10572_s1 + $0x1e8] sm:$0xff] }
  0x2d   :  { %6083 = vmatprep.subr.bf16.mxu0 %v10577_v3  ;;  %6109 = vmatpush3.bf16.msra.mxu1 %v6106_v62  ;;  %v111_v58 = vld [vmem:[%s10572_s1 + $0x1d0] sm:$0xff] }
  0x2e   :  { %v115_v62 = vld [vmem:[%s10572_s1 + $0x1f0] sm:$0xff] }
  0x2f   :  { %450 = vrot.lane.b32.xlu0 %v31_v17, %s6881_s10  ;;  %v73_v17 = vld [vmem:[%s10572_s1 + $0xa0] sm:$0xff] }
  0x30   :  { %6085 = vmatpush1.bf16.msra.mxu0 %v6084_v37  ;;  %452 = vrot.lane.b32.xlu1 %v6966_v18, %s6881_s10  ;;  %v76_v18 = vld [vmem:[%s10572_s1 + $0xb8] sm:$0xff]  ;;  %v93_v37 = vld [vmem:[%s10572_s1 + $0x140] sm:$0xff] }
  0x31   :  { %6086 = vmatprep.subr.bf16.mxu0 %v10577_v3 }
  0x33   :  { %454 = vrot.lane.b32.xlu0 %v6973_v20, %s6881_s10  ;;  %v78_v20 = vld [vmem:[%s10572_s1 + $0xc8] sm:$0xff] }
  0x34   :  { %6088 = vmatpush1.bf16.msra.mxu0 %v6087_v40  ;;  %456 = vrot.lane.b32.xlu1 %v6978_v21, %s6881_s10  ;;  %v77_v21 = vld [vmem:[%s10572_s1 + $0xc0] sm:$0xff]  ;;  %v98_v40 = vld [vmem:[%s10572_s1 + $0x168] sm:$0xff] }
  0x35   :  { %6089 = vmatprep.subr.bf16.mxu0 %v10577_v3 }
  0x37   :  { %458 = vrot.lane.b32.xlu0 %v6986_v23, %s6881_s10  ;;  %v79_v23 = vld [vmem:[%s10572_s1 + $0xd0] sm:$0xff] }
  0x38   :  { %6091 = vmatpush1.bf16.msra.mxu0 %v6090_v43  ;;  %460 = vrot.lane.b32.xlu1 %v6991_v24, %s6881_s10  ;;  %v82_v24 = vld [vmem:[%s10572_s1 + $0xe8] sm:$0xff] }
  0x39   :  { %6092 = vmatprep.subr.bf16.mxu0 %v10577_v3 }
  0x3b   :  { %462 = vrot.lane.b32.xlu0 %v6999_v26, %s6881_s10  ;;  %v84_v26 = vld [vmem:[%s10572_s1 + $0xf8] sm:$0xff] }
  0x3c   :  { %6094 = vmatpush1.bf16.msra.mxu0 %v6093_v46  ;;  %464 = vrot.lane.b32.xlu1 %v7004_v27, %s6881_s10  ;;  %v83_v27 = vld [vmem:[%s10572_s1 + $0xf0] sm:$0xff] }
  0x3d   :  { %6095 = vmatprep.subr.bf16.mxu0 %v10577_v3  ;;  %v99_v46 = vld [vmem:[%s10572_s1 + $0x170] sm:$0xff] }
  0x3f   :  { %466 = vrot.lane.b32.xlu0 %v7012_v29, %s6881_s10  ;;  %v85_v29 = vld [vmem:[%s10572_s1 + $0x100] sm:$0xff] }
  0x40   :  { %6097 = vmatpush1.bf16.msra.mxu0 %v6096_v49  ;;  %468 = vrot.lane.b32.xlu1 %v7017_v30, %s6881_s10  ;;  %v88_v30 = vld [vmem:[%s10572_s1 + $0x118] sm:$0xff] }
  0x41   :  { %v104_v49 = vld [vmem:[%s10572_s1 + $0x198] sm:$0xff] }
  0x43   :  { %238 = vmatmul.mubr.f32.vlgmr.msra.gmra.mrb[0].mxu0 %v53_v53  ;;  %470 = vrot.lane.b32.xlu0 %v7026_v32, %s6881_s10  ;;  %v90_v32 = vld [vmem:[%s10572_s1 + $0x128] sm:$0xff]  ;;  %v108_v53 = vld [vmem:[%s10572_s1 + $0x1b8] sm:$0xff] }
  0x44   :  { %242 = vmatprep.mubr.f32.mxu0 %v56_v56  ;;  %472 = vrot.lane.b32.xlu1 %v7031_v33, %s6881_s10  ;;  %v89_v33 = vld [vmem:[%s10572_s1 + $0x120] sm:$0xff] }
  0x45   :  { %v109_v56 = vld [vmem:[%s10572_s1 + $0x1c0] sm:$0xff] }
  0x47   :  { %243 = vmatmul.mubr.f32.gmra.mrb[2].mxu0 %v55_v60  ;;  %474 = vrot.lane.b32.xlu0 %v7041_v35, %s6881_s10  ;;  %v91_v35 = vld [vmem:[%s10572_s1 + $0x130] sm:$0xff]  ;;  %v113_v60 = vld [vmem:[%s10572_s1 + $0x1e0] sm:$0xff] }
  0x48   :  { %247 = vmatprep.mubr.f32.mxu0 %v58_v61  ;;  %476 = vrot.lane.b32.xlu1 %v7046_v36, %s6881_s10  ;;  %v94_v36 = vld [vmem:[%s10572_s1 + $0x148] sm:$0xff]  ;;  %v116_v61 = vld [vmem:[%s10572_s1 + $0x1f8] sm:$0xff] }
  0x4b   :  { %248 = vmatmul.mubr.f32.gmra.mrb[4].mxu0 %v57_v63  ;;  %478 = vrot.lane.b32.xlu0 %v7056_v38, %s6881_s10  ;;  %v96_v38 = vld [vmem:[%s10572_s1 + $0x158] sm:$0xff] }
  0x4c   :  { %252 = vmatprep.mubr.f32.mxu0 %v60_v0  ;;  %480 = vrot.lane.b32.xlu1 %v7061_v39, %s6881_s10  ;;  %v95_v39 = vld [vmem:[%s10572_s1 + $0x150] sm:$0xff]  ;;  %v913_v0 = vld [vmem:[%s10574_s3] sm:$0xff] }
  0x4f   :  { %253 = vmatmul.mubr.f32.gmra.mrb[6].mxu0 %v59_v1  ;;  %482 = vrot.lane.b32.xlu0 %v7071_v41, %s6881_s10  ;;  %v123_v41 = vld [vmem:[%s10573_s2 + $0x30] sm:$0xff]  ;;  %v6882_v1 = vmov 0  }
  0x50   :  { %257 = vmatprep.mubr.f32.mxu0 %v62_v2  ;;  %484 = vrot.lane.b32.xlu1 %v7076_v42, %s6881_s10  ;;  %v124_v42 = vld [vmem:[%s10573_s2 + $0x38] sm:$0xff] }
  0x51   :  { %v6110_v43 = vpack.c.bf16 %v124_v42, %v123_v41  ;;  %6339 = vset.pattern.permute.xlu1 %v6882_v1  ;;  %6340 = vset.pattern.permute.xlu0 %v6882_v1 }
  0x53   :  { %258 = vmatmul.mubr.f32.gmra.mrb[8].mxu0 %v61_v4  ;;  %486 = vrot.lane.b32.xlu0 %v7086_v44, %s6881_s10  ;;  %v97_v44 = vld [vmem:[%s10572_s1 + $0x160] sm:$0xff] }
  0x54   :  { %262 = vmatprep.mubr.f32.mxu0 %v64_v5  ;;  %488 = vrot.lane.b32.xlu1 %v7091_v45, %s6881_s10  ;;  %v100_v45 = vld [vmem:[%s10572_s1 + $0x178] sm:$0xff] }
  0x55   :  { %6111 = vmatprep.subr.bf16.mxu1 %v6110_v43 }
  0x56   :  { %6113 = vmatpush3.bf16.msra.mxu1 %v6110_v43 }
  0x57   :  { %263 = vmatmul.mubr.f32.gmra.mrb[10].mxu0 %v63_v6  ;;  %490 = vrot.lane.b32.xlu0 %v7101_v47, %s6881_s10  ;;  %v102_v47 = vld [vmem:[%s10572_s1 + $0x188] sm:$0xff] }
  0x58   :  { %267 = vmatprep.mubr.f32.mxu0 %v66_v7  ;;  %492 = vrot.lane.b32.xlu1 %v7106_v48, %s6881_s10  ;;  %v101_v48 = vld [vmem:[%s10572_s1 + $0x180] sm:$0xff] }
  0x59   :  { %6114 = vmatprep.subr.bf16.mxu1 %v10577_v3 }
  0x5b   :  { %268 = vmatmul.mubr.f32.gmra.mrb[12].mxu0 %v65_v8 }
  0x5c   :  { %272 = vmatprep.mubr.f32.mxu0 %v68_v9  ;;  %1346 = vperm.xlu1 %6339, %v913_v0  }
  0x5f   :  { %273 = vmatmul.mubr.f32.gmra.mrb[14].mxu0 %v67_v10 }
  0x60   :  { %277 = vmatprep.mubr.f32.mxu0 %v70_v11 }
  0x63   :  { %278 = vmatmul.mubr.f32.gmra.mrb[16].mxu0 %v69_v13 }
  0x64   :  { %282 = vmatprep.mubr.f32.mxu0 %v72_v14 }
  0x67   :  { %283 = vmatmul.mubr.f32.gmra.mrb[18].mxu0 %v71_v15 }
  0x68   :  { %287 = vmatprep.mubr.f32.mxu0 %v74_v16 }
  0x6b   :  { %288 = vmatmul.mubr.f32.gmra.mrb[20].mxu0 %v73_v17 }
  0x6c   :  { %292 = vmatprep.mubr.f32.mxu0 %v76_v18 }
  0x6f   :  { %293 = vmatmul.mubr.f32.gmra.mrb[22].mxu0 %v75_v19 }
  0x70   :  { %297 = vmatprep.mubr.f32.mxu0 %v78_v20 }
  0x73   :  { %298 = vmatmul.mubr.f32.gmra.mrb[24].mxu0 %v77_v21 }
  0x74   :  { %302 = vmatprep.mubr.f32.mxu0 %v80_v22 }
  0x77   :  { %303 = vmatmul.mubr.f32.gmra.mrb[26].mxu0 %v79_v23 }
  0x78   :  { %307 = vmatprep.mubr.f32.mxu0 %v82_v24 }
  0x7b   :  { %308 = vmatmul.mubr.f32.gmra.mrb[28].mxu0 %v81_v25 }
  0x7c   :  { %312 = vmatprep.mubr.f32.mxu0 %v84_v26 }
  0x7f   :  { %313 = vmatmul.mubr.f32.gmra.mrb[30].mxu0 %v83_v27 }
  0x80   :  { %317 = vmatprep.mubr.f32.mxu0 %v86_v28 }
  0x83   :  { %318 = vmatmul.mubr.f32.gmra.mrb[32].mxu0 %v85_v29 }
  0x84   :  { %322 = vmatprep.mubr.f32.mxu0 %v88_v30 }
  0x87   :  { %323 = vmatmul.mubr.f32.gmra.mrb[34].mxu0 %v87_v31 }
  0x88   :  { %327 = vmatprep.mubr.f32.mxu0 %v90_v32 }
  0x8b   :  { %328 = vmatmul.mubr.f32.gmra.mrb[36].mxu0 %v89_v33 }
  0x8c   :  { %332 = vmatprep.mubr.f32.mxu0 %v92_v34 }
  0x8d   :  { %v431_v63 = vpop.permute.xlu0 %430 }
  0x8e   :  { %v435_v8 = vpop.permute.xlu1 %434 }
  0x8f   :  { %333 = vmatmul.mubr.f32.gmra.mrb[38].mxu0 %v91_v35 }
  0x90   :  { %337 = vmatprep.mubr.f32.mxu0 %v94_v36 }
  0x91   :  { %v433_v6 = vpop.permute.xlu0 %432 }
  0x92   :  { %v437_v15 = vpop.permute.xlu1 %436 }
  0x93   :  { %338 = vmatmul.mubr.f32.gmra.mrb[40].mxu0 %v93_v37 }
  0x94   :  { %342 = vmatprep.mubr.f32.mxu0 %v96_v38 }
  0x95   :  { %v439_v19 = vpop.permute.xlu0 %438 }
  0x96   :  { %v441_v23 = vpop.permute.xlu1 %440 }
  0x97   :  { %343 = vmatmul.mubr.f32.gmra.mrb[42].mxu0 %v95_v39 }
  0x98   :  { %347 = vmatprep.mubr.f32.mxu0 %v98_v40 }
  0x99   :  { %v443_v27 = vpop.permute.xlu0 %442 }
  0x9a   :  { %v445_v31 = vpop.permute.xlu1 %444 }
  0x9b   :  { %348 = vmatmul.mubr.f32.gmra.mrb[44].mxu0 %v97_v44 }
  0x9c   :  { %352 = vmatprep.mubr.f32.mxu0 %v100_v45 }
  0x9d   :  { %v447_v35 = vpop.permute.xlu0 %446 }
  0x9e   :  { %v449_v39 = vpop.permute.xlu1 %448 }
  0x9f   :  { %353 = vmatmul.mubr.f32.gmra.mrb[46].mxu0 %v99_v46 }
  0xa0   :  { %357 = vmatprep.mubr.f32.mxu0 %v102_v47 }
  0xa1   :  { %v451_v43 = vpop.permute.xlu0 %450 }
  0xa2   :  { %v453_v47 = vpop.permute.xlu1 %452 }
  0xa3   :  { %358 = vmatmul.mubr.f32.gmra.mrb[48].mxu0 %v101_v48 }
  0xa4   :  { %362 = vmatprep.mubr.f32.mxu0 %v104_v49 }
  0xa7   :  { %363 = vmatmul.mubr.f32.gmra.mrb[50].mxu0 %v103_v50 }
  0xa8   :  { %367 = vmatprep.mubr.f32.mxu0 %v106_v51  ;;  %v455_v51 = vpop.permute.xlu0 %454 }
  0xab   :  { %368 = vmatmul.mubr.f32.gmra.mrb[52].mxu0 %v105_v52 }
  0xac   :  { %372 = vmatprep.mubr.f32.mxu0 %v108_v53 }
  0xaf   :  { %373 = vmatmul.mubr.f32.gmra.mrb[54].mxu0 %v107_v54 }
  0xb0   :  { %377 = vmatprep.mubr.f32.mxu0 %v110_v55  ;;  %v457_v55 = vpop.permute.xlu1 %456 }
  0xb3   :  { %378 = vmatmul.mubr.f32.gmra.mrb[56].mxu0 %v109_v56 }
  0xb4   :  { %382 = vmatprep.mubr.f32.mxu0 %v112_v57 }
  0xb7   :  { %383 = vmatmul.mubr.f32.gmra.mrb[58].mxu0 %v111_v58 }
  0xb8   :  { %387 = vmatprep.mubr.f32.mxu0 %v114_v59  ;;  %v459_v59 = vpop.permute.xlu0 %458 }
  0xbb   :  { %388 = vmatmul.mubr.f32.gmra.mrb[60].mxu0 %v113_v60 }
  0xbc   :  { %392 = vmatprep.mubr.f32.mxu0 %v116_v61 }
  0xbf   :  { %393 = vmatmul.mubr.f32.gmra.mrb[62].mxu0 %v115_v62 }
 0x116   :  { %v239_v2 = vpop.f32.mrb[0].mxu0 }
 0x117   :  { %v241_v4 = vpop.f32.mrb[1].mxu0  ;;  %v527_v5 = vsel %vm526_vm0, %v239_v2, %v431_v63  ;;  %v461_v63 = vpop.permute.xlu1 %460 }
 0x118   :  { %5666 = vmatprep.mubr.msk.f32.mxu1 %vm559_vm1, %v527_v5  ;;  %v463_v4 = vpop.permute.xlu0 %462 }
 0x11a   :  { %v244_v7 = vpop.f32.mrb[2].mxu0 }
 0x11b   :  { %v528_v9 = vsel %vm526_vm0, %v244_v7, %v433_v6  ;;  %v246_v10 = vpop.f32.mrb[3].mxu0 }
 0x11c   :  { %5667 = vmatmul.mubr.msk.f32.vlgmr.msra.gmra.mrb[0].mxu1 %vm559_vm1, %v528_v9 }
 0x11e   :  { %v249_v11 = vpop.f32.mrb[4].mxu0 }
 0x11f   :  { %v529_v13 = vsel %vm526_vm0, %v249_v11, %v435_v8  ;;  %v251_v14 = vpop.f32.mrb[5].mxu0  ;;  %v465_v8 = vpop.permute.xlu1 %464 }
 0x120   :  { %5669 = vmatprep.mubr.msk.f32.mxu1 %vm559_vm1, %v529_v13  ;;  %v467_v13 = vpop.permute.xlu0 %466 }
 0x122   :  { %v254_v16 = vpop.f32.mrb[6].mxu0 }
 0x123   :  { %v530_v17 = vsel %vm526_vm0, %v254_v16, %v437_v15  ;;  %v256_v18 = vpop.f32.mrb[7].mxu0 }
 0x124   :  { %5670 = vmatmul.mubr.msk.f32.gmra.mrb[2].mxu1 %vm559_vm1, %v530_v17  ;;  %v469_v17 = vpop.permute.xlu1 %468 }
 0x126   :  { %v259_v20 = vpop.f32.mrb[8].mxu0 }
 0x127   :  { %v531_v21 = vsel %vm526_vm0, %v259_v20, %v439_v19  ;;  %v261_v22 = vpop.f32.mrb[9].mxu0 }
 0x128   :  { %5672 = vmatprep.mubr.msk.f32.mxu1 %vm559_vm1, %v531_v21  ;;  %v471_v21 = vpop.permute.xlu0 %470 }
 0x12a   :  { %v264_v24 = vpop.f32.mrb[10].mxu0 }
 0x12b   :  { %v532_v25 = vsel %vm526_vm0, %v264_v24, %v441_v23  ;;  %v266_v26 = vpop.f32.mrb[11].mxu0 }
 0x12c   :  { %5673 = vmatmul.mubr.msk.f32.gmra.mrb[4].mxu1 %vm559_vm1, %v532_v25  ;;  %v473_v25 = vpop.permute.xlu1 %472 }
 0x12e   :  { %v269_v28 = vpop.f32.mrb[12].mxu0 }
 0x12f   :  { %v533_v29 = vsel %vm526_vm0, %v269_v28, %v443_v27  ;;  %v271_v30 = vpop.f32.mrb[13].mxu0 }
 0x130   :  { %5675 = vmatprep.mubr.msk.f32.mxu1 %vm559_vm1, %v533_v29  ;;  %v475_v29 = vpop.permute.xlu0 %474 }
 0x132   :  { %v274_v32 = vpop.f32.mrb[14].mxu0 }
 0x133   :  { %v534_v33 = vsel %vm526_vm0, %v274_v32, %v445_v31  ;;  %v276_v34 = vpop.f32.mrb[15].mxu0 }
 0x134   :  { %5676 = vmatmul.mubr.msk.f32.gmra.mrb[6].mxu1 %vm559_vm1, %v534_v33  ;;  %v477_v33 = vpop.permute.xlu1 %476 }
 0x136   :  { %v279_v36 = vpop.f32.mrb[16].mxu0 }
 0x137   :  { %v535_v37 = vsel %vm526_vm0, %v279_v36, %v447_v35  ;;  %v281_v38 = vpop.f32.mrb[17].mxu0 }
 0x138   :  { %5678 = vmatprep.mubr.msk.f32.mxu1 %vm559_vm1, %v535_v37  ;;  %v479_v37 = vpop.permute.xlu0 %478 }
 0x13a   :  { %v284_v40 = vpop.f32.mrb[18].mxu0 }
 0x13b   :  { %v536_v41 = vsel %vm526_vm0, %v284_v40, %v449_v39  ;;  %v286_v42 = vpop.f32.mrb[19].mxu0 }
 0x13c   :  { %5679 = vmatmul.mubr.msk.f32.gmra.mrb[8].mxu1 %vm559_vm1, %v536_v41  ;;  %v481_v41 = vpop.permute.xlu1 %480 }
 0x13e   :  { %v289_v44 = vpop.f32.mrb[20].mxu0 }
 0x13f   :  { %v537_v45 = vsel %vm526_vm0, %v289_v44, %v451_v43  ;;  %v291_v46 = vpop.f32.mrb[21].mxu0 }
 0x140   :  { %5681 = vmatprep.mubr.msk.f32.mxu1 %vm559_vm1, %v537_v45  ;;  %v483_v45 = vpop.permute.xlu0 %482 }
 0x142   :  { %v294_v48 = vpop.f32.mrb[22].mxu0 }
 0x143   :  { %v538_v49 = vsel %vm526_vm0, %v294_v48, %v453_v47  ;;  %v296_v50 = vpop.f32.mrb[23].mxu0 }
 0x144   :  { %5682 = vmatmul.mubr.msk.f32.gmra.mrb[10].mxu1 %vm559_vm1, %v538_v49  ;;  %v485_v49 = vpop.permute.xlu1 %484 }
 0x146   :  { %v299_v52 = vpop.f32.mrb[24].mxu0 }
 0x147   :  { %v539_v53 = vsel %vm526_vm0, %v299_v52, %v455_v51  ;;  %v301_v54 = vpop.f32.mrb[25].mxu0 }
 0x148   :  { %5684 = vmatprep.mubr.msk.f32.mxu1 %vm559_vm1, %v539_v53  ;;  %v487_v53 = vpop.permute.xlu0 %486 }
 0x14a   :  { %v304_v56 = vpop.f32.mrb[26].mxu0 }
 0x14b   :  { %v540_v57 = vsel %vm526_vm0, %v304_v56, %v457_v55  ;;  %v306_v58 = vpop.f32.mrb[27].mxu0 }
 0x14c   :  { %5685 = vmatmul.mubr.msk.f32.gmra.mrb[12].mxu1 %vm559_vm1, %v540_v57  ;;  %v489_v57 = vpop.permute.xlu1 %488 }
 0x14e   :  { %v309_v60 = vpop.f32.mrb[28].mxu0 }
 0x14f   :  { %v541_v61 = vsel %vm526_vm0, %v309_v60, %v459_v59  ;;  %v311_v62 = vpop.f32.mrb[29].mxu0 }
 0x150   :  { %5687 = vmatprep.mubr.msk.f32.mxu1 %vm559_vm1, %v541_v61  ;;  %v491_v61 = vpop.permute.xlu0 %490 }
 0x152   :  { %v314_v0 = vpop.f32.mrb[30].mxu0 }
 0x153   :  { %v542_v1 = vsel %vm526_vm0, %v314_v0, %v461_v63  ;;  %v316_v2 = vpop.f32.mrb[31].mxu0 }
 0x154   :  { %5688 = vmatmul.mubr.msk.f32.gmra.mrb[14].mxu1 %vm559_vm1, %v542_v1  ;;  %v493_v1 = vpop.permute.xlu1 %492 }
 0x156   :  { %v319_v5 = vpop.f32.mrb[32].mxu0 }
 0x157   :  { %v543_v6 = vsel %vm526_vm0, %v319_v5, %v463_v4  ;;  %v321_v7 = vpop.f32.mrb[33].mxu0 }
 0x158   :  { %5690 = vmatprep.mubr.msk.f32.mxu1 %vm559_vm1, %v543_v6 }
 0x15a   :  { %v324_v9 = vpop.f32.mrb[34].mxu0 }
 0x15b   :  { %v544_v10 = vsel %vm526_vm0, %v324_v9, %v465_v8  ;;  %v326_v11 = vpop.f32.mrb[35].mxu0 }
 0x15c   :  { %5691 = vmatmul.mubr.msk.f32.gmra.mrb[16].mxu1 %vm559_vm1, %v544_v10 }
 0x15e   :  { %v329_v14 = vpop.f32.mrb[36].mxu0 }
 0x15f   :  { %v545_v15 = vsel %vm526_vm0, %v329_v14, %v467_v13  ;;  %v331_v16 = vpop.f32.mrb[37].mxu0 }
 0x160   :  { %5693 = vmatprep.mubr.msk.f32.mxu1 %vm559_vm1, %v545_v15 }
 0x162   :  { %v334_v18 = vpop.f32.mrb[38].mxu0 }
 0x163   :  { %v546_v19 = vsel %vm526_vm0, %v334_v18, %v469_v17  ;;  %v336_v20 = vpop.f32.mrb[39].mxu0 }
 0x164   :  { %5694 = vmatmul.mubr.msk.f32.gmra.mrb[18].mxu1 %vm559_vm1, %v546_v19 }
 0x166   :  { %v339_v22 = vpop.f32.mrb[40].mxu0 }
 0x167   :  { %v547_v23 = vsel %vm526_vm0, %v339_v22, %v471_v21  ;;  %v341_v24 = vpop.f32.mrb[41].mxu0 }
 0x168   :  { %5696 = vmatprep.mubr.msk.f32.mxu1 %vm559_vm1, %v547_v23 }
 0x16a   :  { %v344_v26 = vpop.f32.mrb[42].mxu0 }
 0x16b   :  { %v548_v27 = vsel %vm526_vm0, %v344_v26, %v473_v25  ;;  %v346_v28 = vpop.f32.mrb[43].mxu0 }
 0x16c   :  { %5697 = vmatmul.mubr.msk.f32.gmra.mrb[20].mxu1 %vm559_vm1, %v548_v27 }
 0x16e   :  { %v349_v30 = vpop.f32.mrb[44].mxu0 }
 0x16f   :  { %v549_v31 = vsel %vm526_vm0, %v349_v30, %v475_v29  ;;  %v351_v32 = vpop.f32.mrb[45].mxu0 }
 0x170   :  { %5699 = vmatprep.mubr.msk.f32.mxu1 %vm559_vm1, %v549_v31 }
 0x172   :  { %v354_v34 = vpop.f32.mrb[46].mxu0 }
 0x173   :  { %v550_v35 = vsel %vm526_vm0, %v354_v34, %v477_v33  ;;  %v356_v36 = vpop.f32.mrb[47].mxu0 }
 0x174   :  { %5700 = vmatmul.mubr.msk.f32.gmra.mrb[22].mxu1 %vm559_vm1, %v550_v35 }
 0x176   :  { %v359_v38 = vpop.f32.mrb[48].mxu0 }
 0x177   :  { %v551_v39 = vsel %vm526_vm0, %v359_v38, %v479_v37  ;;  %v361_v40 = vpop.f32.mrb[49].mxu0 }
 0x178   :  { %5702 = vmatprep.mubr.msk.f32.mxu1 %vm559_vm1, %v551_v39 }
 0x17a   :  { %v364_v42 = vpop.f32.mrb[50].mxu0 }
 0x17b   :  { %v552_v43 = vsel %vm526_vm0, %v364_v42, %v481_v41  ;;  %v366_v44 = vpop.f32.mrb[51].mxu0 }
 0x17c   :  { %5703 = vmatmul.mubr.msk.f32.gmra.mrb[24].mxu1 %vm559_vm1, %v552_v43 }
 0x17e   :  { %v369_v46 = vpop.f32.mrb[52].mxu0 }
 0x17f   :  { %v553_v47 = vsel %vm526_vm0, %v369_v46, %v483_v45  ;;  %v371_v48 = vpop.f32.mrb[53].mxu0 }
 0x180   :  { %5705 = vmatprep.mubr.msk.f32.mxu1 %vm559_vm1, %v553_v47 }
 0x182   :  { %v374_v50 = vpop.f32.mrb[54].mxu0 }
 0x183   :  { %v554_v51 = vsel %vm526_vm0, %v374_v50, %v485_v49  ;;  %v376_v52 = vpop.f32.mrb[55].mxu0 }
 0x184   :  { %5706 = vmatmul.mubr.msk.f32.gmra.mrb[26].mxu1 %vm559_vm1, %v554_v51 }
 0x186   :  { %v379_v54 = vpop.f32.mrb[56].mxu0 }
 0x187   :  { %v555_v55 = vsel %vm526_vm0, %v379_v54, %v487_v53  ;;  %v381_v56 = vpop.f32.mrb[57].mxu0 }
 0x188   :  { %5708 = vmatprep.mubr.msk.f32.mxu1 %vm559_vm1, %v555_v55 }
 0x18a   :  { %v384_v58 = vpop.f32.mrb[58].mxu0 }
 0x18b   :  { %v556_v59 = vsel %vm526_vm0, %v384_v58, %v489_v57  ;;  %v386_v60 = vpop.f32.mrb[59].mxu0 }
 0x18c   :  { %5709 = vmatmul.mubr.msk.f32.gmra.mrb[28].mxu1 %vm559_vm1, %v556_v59 }
 0x18e   :  { %v389_v62 = vpop.f32.mrb[60].mxu0 }
 0x18f   :  { %v557_v63 = vsel %vm526_vm0, %v389_v62, %v491_v61  ;;  %v391_v0 = vpop.f32.mrb[61].mxu0 }
 0x190   :  { %5711 = vmatprep.mubr.msk.f32.mxu1 %vm559_vm1, %v557_v63 }
 0x192   :  { %v394_v2 = vpop.f32.mrb[62].mxu0 }
 0x193   :  { %v558_v4 = vsel %vm526_vm0, %v394_v2, %v493_v1  ;;  %v396_v5 = vpop.f32.mrb[63].mxu0 }
 0x194   :  { %5712 = vmatmul.mubr.msk.f32.gmra.mrb[30].mxu1 %vm559_vm1, %v558_v4 }
 0x195   :  { %1492 = vmatprep.mubr.f32.mxu1 %v6949_v12 }
 0x1ef   :  { %v5668_v6 = vpop.f32.mrb[0].mxu1 }
 0x1f0   :  { %v7435_v7 = vmax.f32 %v5668_v6, 0.0  ;;  %v722_v8 = vpop.f32.mrb[1].mxu1 }
 0x1f1   :  { %v7437_v9 = vmax.f32 %v722_v8, 0.0 }
 0x1f2   :  { %10634 = vst [vmem:[#allocation5_spill] sm:$0xff] %v7435_v7  ;;  %v921_v10 = vsel %vm526_vm0, %v7435_v7, 0.0  ;;  %v1081_v14 = vmul.f32 %v7435_v7, %v7435_v7 }
 0x1f3   :  { %10635 = vst [vmem:[#allocation6_spill] sm:$0xff] %v7437_v9  ;;  %922 = vadd.xlane.f32.xlu1 %v921_v10  ;;  %v918_v11 = vsel %vm526_vm0, %v7437_v9, 0.0  ;;  %v1080_v13 = vmul.f32 %v7437_v9, %v7437_v9 }
 0x1f4   :  { %919 = vadd.xlane.f32.xlu0 %v918_v11  ;;  %v1115_v16 = vsel %vm526_vm0, %v1081_v14, 0.0 }
 0x1f5   :  { %v1112_v12 = vsel %vm526_vm0, %v1080_v13, 0.0 }
 0x1f7   :  { %1113 = vadd.xlane.f32.xlu1 %v1112_v12  ;;  %v5671_v15 = vpop.f32.mrb[2].mxu1 }
 0x1f8   :  { %v7449_v17 = vmax.f32 %v5671_v15, 0.0  ;;  %1116 = vadd.xlane.f32.xlu0 %v1115_v16  ;;  %v732_v18 = vpop.f32.mrb[3].mxu1 }
 0x1f9   :  { %v7451_v19 = vmax.f32 %v732_v18, 0.0 }
 0x1fa   :  { %10636 = vst [vmem:[#allocation7_spill] sm:$0xff] %v7449_v17  ;;  %v927_v20 = vsel %vm526_vm0, %v7449_v17, 0.0  ;;  %v1083_v25 = vmul.f32 %v7449_v17, %v7449_v17 }
 0x1fb   :  { %10637 = vst [vmem:[#allocation8_spill] sm:$0xff] %v7451_v19  ;;  %v1082_v21 = vmul.f32 %v7451_v19, %v7451_v19  ;;  %v924_v24 = vsel %vm526_vm0, %v7451_v19, 0.0 }
 0x1fc   :  { %928 = vadd.xlane.f32.xlu0 %v927_v20  ;;  %v1121_v29 = vsel %vm526_vm0, %v1083_v25, 0.0 }
 0x1fd   :  { %v1118_v22 = vsel %vm526_vm0, %v1082_v21, 0.0 }
 0x1fe   :  { %1119 = vadd.xlane.f32.xlu1 %v1118_v22 }
 0x1ff   :  { %v5674_v23 = vpop.f32.mrb[4].mxu1 }
 0x200   :  { %925 = vadd.xlane.f32.xlu0 %v924_v24  ;;  %v742_v26 = vpop.f32.mrb[5].mxu1  ;;  %v7464_v28 = vmax.f32 %v5674_v23, 0.0 }
 0x201   :  { %v7462_v27 = vmax.f32 %v742_v26, 0.0 }
 0x202   :  { %10639 = vst [vmem:[#allocation10_spill] sm:$0xff] %v7464_v28  ;;  %v933_v33 = vsel %vm526_vm0, %v7464_v28, 0.0  ;;  %v1085_v35 = vmul.f32 %v7464_v28, %v7464_v28 }
 0x203   :  { %10638 = vst [vmem:[#allocation9_spill] sm:$0xff] %v7462_v27  ;;  %v930_v30 = vsel %vm526_vm0, %v7462_v27, 0.0  ;;  %v1084_v31 = vmul.f32 %v7462_v27, %v7462_v27 }
 0x204   :  { %1122 = vadd.xlane.f32.xlu0 %v1121_v29  ;;  %931 = vadd.xlane.f32.xlu1 %v930_v30  ;;  %v1127_v39 = vsel %vm526_vm0, %v1085_v35, 0.0 }
 0x205   :  { %v1124_v34 = vsel %vm526_vm0, %v1084_v31, 0.0 }
 0x207   :  { %v5677_v32 = vpop.f32.mrb[6].mxu1 }
 0x208   :  { %934 = vadd.xlane.f32.xlu0 %v933_v33  ;;  %1125 = vadd.xlane.f32.xlu1 %v1124_v34  ;;  %v752_v36 = vpop.f32.mrb[7].mxu1  ;;  %v7478_v38 = vmax.f32 %v5677_v32, 0.0 }
 0x209   :  { %v7476_v37 = vmax.f32 %v752_v36, 0.0 }
 0x20a   :  { %10641 = vst [vmem:[#allocation12_spill] sm:$0xff] %v7478_v38  ;;  %v939_v43 = vsel %vm526_vm0, %v7478_v38, 0.0  ;;  %v1087_v45 = vmul.f32 %v7478_v38, %v7478_v38 }
 0x20b   :  { %10640 = vst [vmem:[#allocation11_spill] sm:$0xff] %v7476_v37  ;;  %v936_v40 = vsel %vm526_vm0, %v7476_v37, 0.0  ;;  %v1086_v41 = vmul.f32 %v7476_v37, %v7476_v37 }
 0x20c   :  { %1128 = vadd.xlane.f32.xlu0 %v1127_v39  ;;  %937 = vadd.xlane.f32.xlu1 %v936_v40  ;;  %v1133_v49 = vsel %vm526_vm0, %v1087_v45, 0.0 }
 0x20d   :  { %v1130_v44 = vsel %vm526_vm0, %v1086_v41, 0.0 }
 0x20f   :  { %v5680_v42 = vpop.f32.mrb[8].mxu1 }
 0x210   :  { %940 = vadd.xlane.f32.xlu0 %v939_v43  ;;  %1131 = vadd.xlane.f32.xlu1 %v1130_v44  ;;  %v762_v46 = vpop.f32.mrb[9].mxu1  ;;  %v7492_v48 = vmax.f32 %v5680_v42, 0.0 }
 0x211   :  { %v7490_v47 = vmax.f32 %v762_v46, 0.0 }
 0x212   :  { %10643 = vst [vmem:[#allocation14_spill] sm:$0xff] %v7492_v48  ;;  %v945_v53 = vsel %vm526_vm0, %v7492_v48, 0.0  ;;  %v1089_v55 = vmul.f32 %v7492_v48, %v7492_v48 }
 0x213   :  { %10642 = vst [vmem:[#allocation13_spill] sm:$0xff] %v7490_v47  ;;  %v942_v50 = vsel %vm526_vm0, %v7490_v47, 0.0  ;;  %v1088_v51 = vmul.f32 %v7490_v47, %v7490_v47 }
 0x214   :  { %1134 = vadd.xlane.f32.xlu0 %v1133_v49  ;;  %943 = vadd.xlane.f32.xlu1 %v942_v50  ;;  %v1139_v59 = vsel %vm526_vm0, %v1089_v55, 0.0 }
 0x215   :  { %v1136_v54 = vsel %vm526_vm0, %v1088_v51, 0.0 }
 0x217   :  { %v5683_v52 = vpop.f32.mrb[10].mxu1 }
 0x218   :  { %946 = vadd.xlane.f32.xlu0 %v945_v53  ;;  %1137 = vadd.xlane.f32.xlu1 %v1136_v54  ;;  %v772_v56 = vpop.f32.mrb[11].mxu1  ;;  %v7506_v58 = vmax.f32 %v5683_v52, 0.0 }
 0x219   :  { %v7504_v57 = vmax.f32 %v772_v56, 0.0 }
 0x21a   :  { %10645 = vst [vmem:[#allocation16_spill] sm:$0xff] %v7506_v58  ;;  %v951_v63 = vsel %vm526_vm0, %v7506_v58, 0.0  ;;  %v1091_v1 = vmul.f32 %v7506_v58, %v7506_v58 }
 0x21b   :  { %10644 = vst [vmem:[#allocation15_spill] sm:$0xff] %v7504_v57  ;;  %v948_v60 = vsel %vm526_vm0, %v7504_v57, 0.0  ;;  %v1090_v61 = vmul.f32 %v7504_v57, %v7504_v57 }
 0x21c   :  { %1140 = vadd.xlane.f32.xlu0 %v1139_v59  ;;  %949 = vadd.xlane.f32.xlu1 %v948_v60  ;;  %v1145_v6 = vsel %vm526_vm0, %v1091_v1, 0.0 }
 0x21d   :  { %v1142_v0 = vsel %vm526_vm0, %v1090_v61, 0.0 }
 0x21f   :  { %v5686_v62 = vpop.f32.mrb[12].mxu1 }
 0x220   :  { %952 = vadd.xlane.f32.xlu0 %v951_v63  ;;  %1143 = vadd.xlane.f32.xlu1 %v1142_v0  ;;  %v782_v2 = vpop.f32.mrb[13].mxu1  ;;  %v7520_v5 = vmax.f32 %v5686_v62, 0.0 }
 0x221   :  { %v7518_v4 = vmax.f32 %v782_v2, 0.0 }
 0x222   :  { %10647 = vst [vmem:[#allocation18_spill] sm:$0xff] %v7520_v5  ;;  %v957_v13 = vsel %vm526_vm0, %v7520_v5, 0.0  ;;  %v1093_v12 = vmul.f32 %v7520_v5, %v7520_v5 }
 0x223   :  { %10646 = vst [vmem:[#allocation17_spill] sm:$0xff] %v7518_v4  ;;  %v954_v8 = vsel %vm526_vm0, %v7518_v4, 0.0  ;;  %v1092_v10 = vmul.f32 %v7518_v4, %v7518_v4 }
 0x224   :  { %1146 = vadd.xlane.f32.xlu0 %v1145_v6  ;;  %955 = vadd.xlane.f32.xlu1 %v954_v8  ;;  %v1151_v20 = vsel %vm526_vm0, %v1093_v12, 0.0 }
 0x225   :  { %v1148_v14 = vsel %vm526_vm0, %v1092_v10, 0.0 }
 0x227   :  { %v5689_v11 = vpop.f32.mrb[14].mxu1 }
 0x228   :  { %958 = vadd.xlane.f32.xlu0 %v957_v13  ;;  %1149 = vadd.xlane.f32.xlu1 %v1148_v14  ;;  %v792_v15 = vpop.f32.mrb[15].mxu1  ;;  %v7534_v18 = vmax.f32 %v5689_v11, 0.0 }
 0x229   :  { %v7532_v16 = vmax.f32 %v792_v15, 0.0 }
 0x22a   :  { %10649 = vst [vmem:[#allocation20_spill] sm:$0xff] %v7534_v18  ;;  %v963_v24 = vsel %vm526_vm0, %v7534_v18, 0.0  ;;  %v1095_v26 = vmul.f32 %v7534_v18, %v7534_v18 }
 0x22b   :  { %10648 = vst [vmem:[#allocation19_spill] sm:$0xff] %v7532_v16  ;;  %v960_v21 = vsel %vm526_vm0, %v7532_v16, 0.0  ;;  %v1094_v22 = vmul.f32 %v7532_v16, %v7532_v16 }
 0x22c   :  { %1152 = vadd.xlane.f32.xlu0 %v1151_v20  ;;  %961 = vadd.xlane.f32.xlu1 %v960_v21  ;;  %v1157_v32 = vsel %vm526_vm0, %v1095_v26, 0.0 }
 0x22d   :  { %v1154_v25 = vsel %vm526_vm0, %v1094_v22, 0.0 }
 0x22f   :  { %v5692_v23 = vpop.f32.mrb[16].mxu1 }
 0x230   :  { %964 = vadd.xlane.f32.xlu0 %v963_v24  ;;  %1155 = vadd.xlane.f32.xlu1 %v1154_v25  ;;  %v802_v29 = vpop.f32.mrb[17].mxu1  ;;  %v7548_v31 = vmax.f32 %v5692_v23, 0.0 }
 0x231   :  { %v7546_v30 = vmax.f32 %v802_v29, 0.0 }
 0x232   :  { %10651 = vst [vmem:[#allocation22_spill] sm:$0xff] %v7548_v31  ;;  %v969_v36 = vsel %vm526_vm0, %v7548_v31, 0.0  ;;  %v1097_v40 = vmul.f32 %v7548_v31, %v7548_v31 }
 0x233   :  { %10650 = vst [vmem:[#allocation21_spill] sm:$0xff] %v7546_v30  ;;  %v966_v33 = vsel %vm526_vm0, %v7546_v30, 0.0  ;;  %v1096_v34 = vmul.f32 %v7546_v30, %v7546_v30 }
 0x234   :  { %1158 = vadd.xlane.f32.xlu0 %v1157_v32  ;;  %967 = vadd.xlane.f32.xlu1 %v966_v33  ;;  %v1163_v44 = vsel %vm526_vm0, %v1097_v40, 0.0 }
 0x235   :  { %v1160_v39 = vsel %vm526_vm0, %v1096_v34, 0.0 }
 0x237   :  { %v5695_v35 = vpop.f32.mrb[18].mxu1 }
 0x238   :  { %970 = vadd.xlane.f32.xlu0 %v969_v36  ;;  %1161 = vadd.xlane.f32.xlu1 %v1160_v39  ;;  %v812_v41 = vpop.f32.mrb[19].mxu1  ;;  %v7562_v43 = vmax.f32 %v5695_v35, 0.0 }
 0x239   :  { %v7560_v42 = vmax.f32 %v812_v41, 0.0 }
 0x23a   :  { %10653 = vst [vmem:[#allocation24_spill] sm:$0xff] %v7562_v43  ;;  %v975_v50 = vsel %vm526_vm0, %v7562_v43, 0.0  ;;  %v1099_v52 = vmul.f32 %v7562_v43, %v7562_v43 }
 0x23b   :  { %10652 = vst [vmem:[#allocation23_spill] sm:$0xff] %v7560_v42  ;;  %v972_v45 = vsel %vm526_vm0, %v7560_v42, 0.0  ;;  %v1098_v46 = vmul.f32 %v7560_v42, %v7560_v42 }
 0x23c   :  { %1164 = vadd.xlane.f32.xlu0 %v1163_v44  ;;  %973 = vadd.xlane.f32.xlu1 %v972_v45  ;;  %v1169_v56 = vsel %vm526_vm0, %v1099_v52, 0.0 }
 0x23d   :  { %v1166_v51 = vsel %vm526_vm0, %v1098_v46, 0.0 }
 0x23f   :  { %v5698_v49 = vpop.f32.mrb[20].mxu1 }
 0x240   :  { %976 = vadd.xlane.f32.xlu0 %v975_v50  ;;  %1167 = vadd.xlane.f32.xlu1 %v1166_v51  ;;  %v822_v53 = vpop.f32.mrb[21].mxu1  ;;  %v7576_v55 = vmax.f32 %v5698_v49, 0.0 }
 0x241   :  { %v7574_v54 = vmax.f32 %v822_v53, 0.0 }
 0x242   :  { %10655 = vst [vmem:[#allocation26_spill] sm:$0xff] %v7576_v55  ;;  %v981_v62 = vsel %vm526_vm0, %v7576_v55, 0.0  ;;  %v1101_v0 = vmul.f32 %v7576_v55, %v7576_v55 }
 0x243   :  { %10654 = vst [vmem:[#allocation25_spill] sm:$0xff] %v7574_v54  ;;  %v978_v59 = vsel %vm526_vm0, %v7574_v54, 0.0  ;;  %v1100_v60 = vmul.f32 %v7574_v54, %v7574_v54 }
 0x244   :  { %1170 = vadd.xlane.f32.xlu0 %v1169_v56  ;;  %979 = vadd.xlane.f32.xlu1 %v978_v59  ;;  %v1175_v8 = vsel %vm526_vm0, %v1101_v0, 0.0 }
 0x245   :  { %v1172_v63 = vsel %vm526_vm0, %v1100_v60, 0.0 }
 0x247   :  { %v5701_v61 = vpop.f32.mrb[22].mxu1 }
 0x248   :  { %982 = vadd.xlane.f32.xlu0 %v981_v62  ;;  %1173 = vadd.xlane.f32.xlu1 %v1172_v63  ;;  %v832_v1 = vpop.f32.mrb[23].mxu1  ;;  %v7590_v6 = vmax.f32 %v5701_v61, 0.0 }
 0x249   :  { %v7588_v2 = vmax.f32 %v832_v1, 0.0 }
 0x24a   :  { %10657 = vst [vmem:[#allocation28_spill] sm:$0xff] %v7590_v6  ;;  %v987_v14 = vsel %vm526_vm0, %v7590_v6, 0.0  ;;  %v1103_v15 = vmul.f32 %v7590_v6, %v7590_v6 }
 0x24b   :  { %10656 = vst [vmem:[#allocation27_spill] sm:$0xff] %v7588_v2  ;;  %v984_v10 = vsel %vm526_vm0, %v7588_v2, 0.0  ;;  %v1102_v11 = vmul.f32 %v7588_v2, %v7588_v2 }
 0x24c   :  { %1176 = vadd.xlane.f32.xlu0 %v1175_v8  ;;  %985 = vadd.xlane.f32.xlu1 %v984_v10  ;;  %v1181_v23 = vsel %vm526_vm0, %v1103_v15, 0.0  ;;  %v5310_v15 = vld [vmem:[%s10574_s3 + $0x10] sm:$0xff] }
 0x24d   :  { %v1178_v12 = vsel %vm526_vm0, %v1102_v11, 0.0 }
 0x24f   :  { %v5704_v13 = vpop.f32.mrb[24].mxu1 }
 0x250   :  { %988 = vadd.xlane.f32.xlu0 %v987_v14  ;;  %1179 = vadd.xlane.f32.xlu1 %v1178_v12  ;;  %v842_v20 = vpop.f32.mrb[25].mxu1  ;;  %v7604_v22 = vmax.f32 %v5704_v13, 0.0 }
 0x251   :  { %v7602_v21 = vmax.f32 %v842_v20, 0.0  ;;  %v7659_v20 = vpop.permute.xlu1 %1346 }
 0x252   :  { %v993_v29 = vsel %vm526_vm0, %v7604_v22, 0.0  ;;  %v1105_v33 = vmul.f32 %v7604_v22, %v7604_v22  ;;  %10662 = vst [vmem:[#allocation33_spill] sm:$0xff] %v7659_v20 }
 0x253   :  { %10658 = vst [vmem:[#allocation29_spill] sm:$0xff] %v7602_v21  ;;  %v990_v24 = vsel %vm526_vm0, %v7602_v21, 0.0  ;;  %v1104_v25 = vmul.f32 %v7602_v21, %v7602_v21 }
 0x254   :  { %1182 = vadd.xlane.f32.xlu0 %v1181_v23  ;;  %991 = vadd.xlane.f32.xlu1 %v990_v24  ;;  %v1187_v39 = vsel %vm526_vm0, %v1105_v33, 0.0 }
 0x255   :  { %v1184_v32 = vsel %vm526_vm0, %v1104_v25, 0.0 }
 0x257   :  { %v5707_v26 = vpop.f32.mrb[26].mxu1 }
 0x258   :  { %994 = vadd.xlane.f32.xlu0 %v993_v29  ;;  %1185 = vadd.xlane.f32.xlu1 %v1184_v32  ;;  %v852_v34 = vpop.f32.mrb[27].mxu1  ;;  %v7618_v36 = vmax.f32 %v5707_v26, 0.0  ;;  %v914_v26 = vld [vmem:[%s10574_s3 + $0x8] sm:$0xff] }
 0x259   :  { %v7616_v35 = vmax.f32 %v852_v34, 0.0 }
 0x25a   :  { %v999_v45 = vsel %vm526_vm0, %v7618_v36, 0.0  ;;  %v1107_v49 = vmul.f32 %v7618_v36, %v7618_v36 }
 0x25b   :  { %10659 = vst [vmem:[#allocation30_spill] sm:$0xff] %v7616_v35  ;;  %v996_v40 = vsel %vm526_vm0, %v7616_v35, 0.0  ;;  %v1106_v41 = vmul.f32 %v7616_v35, %v7616_v35 }
 0x25c   :  { %1188 = vadd.xlane.f32.xlu0 %v1187_v39  ;;  %997 = vadd.xlane.f32.xlu1 %v996_v40  ;;  %v1193_v53 = vsel %vm526_vm0, %v1107_v49, 0.0 }
 0x25d   :  { %v1190_v46 = vsel %vm526_vm0, %v1106_v41, 0.0 }
 0x25f   :  { %v5710_v44 = vpop.f32.mrb[28].mxu1 }
 0x260   :  { %1000 = vadd.xlane.f32.xlu0 %v999_v45  ;;  %1191 = vadd.xlane.f32.xlu1 %v1190_v46  ;;  %v862_v50 = vpop.f32.mrb[29].mxu1  ;;  %v7632_v52 = vmax.f32 %v5710_v44, 0.0 }
 0x261   :  { %v7630_v51 = vmax.f32 %v862_v50, 0.0 }
 0x262   :  { %v1005_v61 = vsel %vm526_vm0, %v7632_v52, 0.0  ;;  %v1109_v63 = vmul.f32 %v7632_v52, %v7632_v52 }
 0x263   :  { %10660 = vst [vmem:[#allocation31_spill] sm:$0xff] %v7630_v51  ;;  %v1002_v56 = vsel %vm526_vm0, %v7630_v51, 0.0  ;;  %v1108_v59 = vmul.f32 %v7630_v51, %v7630_v51 }
 0x264   :  { %1194 = vadd.xlane.f32.xlu0 %v1193_v53  ;;  %1003 = vadd.xlane.f32.xlu1 %v1002_v56  ;;  %v1199_v10 = vsel %vm526_vm0, %v1109_v63, 0.0 }
 0x265   :  { %v1196_v62 = vsel %vm526_vm0, %v1108_v59, 0.0 }
 0x267   :  { %v5713_v60 = vpop.f32.mrb[30].mxu1 }
 0x268   :  { %1006 = vadd.xlane.f32.xlu0 %v1005_v61  ;;  %1197 = vadd.xlane.f32.xlu1 %v1196_v62  ;;  %v872_v0 = vpop.f32.mrb[31].mxu1  ;;  %v7646_v8 = vmax.f32 %v5713_v60, 0.0 }
 0x269   :  { %v7644_v1 = vmax.f32 %v872_v0, 0.0 }
 0x26a   :  { %v1011_v13 = vsel %vm526_vm0, %v7646_v8, 0.0  ;;  %v1111_v14 = vmul.f32 %v7646_v8, %v7646_v8 }
 0x26b   :  { %10661 = vst [vmem:[#allocation32_spill] sm:$0xff] %v7644_v1  ;;  %v1008_v11 = vsel %vm526_vm0, %v7644_v1, 0.0  ;;  %v1110_v49 = vmul.f32 %v7644_v1, %v7644_v1 }
 0x26c   :  { %1200 = vadd.xlane.f32.xlu0 %v1199_v10  ;;  %1009 = vadd.xlane.f32.xlu1 %v1008_v11  ;;  %v1205_v12 = vsel %vm526_vm0, %v1111_v14, 0.0  ;;  %v5311_v11 = vld [vmem:[%s10574_s3 + $0x18] sm:$0xff] }
 0x26d   :  { %v1202_v56 = vsel %vm526_vm0, %v1110_v49, 0.0 }
 0x270   :  { %1012 = vadd.xlane.f32.xlu0 %v1011_v13 }
 0x274   :  { %1206 = vadd.xlane.f32.xlu0 %v1205_v12 }
 0x27d   :  { %1388 = vperm.xlu1 %6339, %v5310_v15  }
 0x280   :  { %v923_v24 = vpop.xlane.xlu1 %922 }
 0x281   :  { %v7661_v23 = vpop.xlane.xlu0 %919  ;;  %v1016_v4 = vmul.f32 0.03125, %v923_v24 }
 0x284   :  { %v7666_v29 = vpop.xlane.xlu1 %1113 }
 0x285   :  { %v1117_v25 = vpop.xlane.xlu0 %1116 }
 0x286   :  { %v1209_v37 = vmul.f32 0.03125, %v1117_v25 }
 0x289   :  { %v929_v32 = vpop.xlane.xlu0 %928 }
 0x28a   :  { %1351 = vperm.xlu0 %6340, %v914_v26   ;;  %v1018_v16 = vmul.f32 0.03125, %v929_v32 }
 0x28b   :  { %v7668_v33 = vpop.xlane.xlu1 %1119 }
 0x28c   :  { %v1062_v27 = vadd.f32 %v1018_v16, %v1016_v4 }
 0x28d   :  { %v7670_v34 = vpop.xlane.xlu0 %925 }
 0x291   :  { %v1123_v39 = vpop.xlane.xlu0 %1122  ;;  %v7672_v40 = vpop.xlane.xlu1 %931 }
 0x292   :  { %v1211_v19 = vmul.f32 0.03125, %v1123_v39 }
 0x294   :  { %v1255_v43 = vadd.f32 %v1211_v19, %v1209_v37 }
 0x295   :  { %v935_v41 = vpop.xlane.xlu0 %934  ;;  %v7674_v44 = vpop.xlane.xlu1 %1125 }
 0x296   :  { %v1020_v20 = vmul.f32 0.03125, %v935_v41 }
 0x298   :  { %v1063_v48 = vadd.f32 %v1062_v27, %v1020_v20 }
 0x299   :  { %v1129_v45 = vpop.xlane.xlu0 %1128  ;;  %v7676_v46 = vpop.xlane.xlu1 %937 }
 0x29a   :  { %v1213_v38 = vmul.f32 0.03125, %v1129_v45 }
 0x29d   :  { %v941_v50 = vpop.xlane.xlu0 %940  ;;  %v7680_v53 = vpop.xlane.xlu1 %1131 }
 0x29e   :  { %v1022_v47 = vmul.f32 0.03125, %v941_v50 }
 0x2a0   :  { %v1064_v17 = vadd.f32 %v1063_v48, %v1022_v47 }
 0x2a1   :  { %v1135_v59 = vpop.xlane.xlu0 %1134  ;;  %v7683_v60 = vpop.xlane.xlu1 %943  ;;  %1203 = vadd.xlane.f32.xlu1 %v1202_v56 }
 0x2a2   :  { %v1215_v31 = vmul.f32 0.03125, %v1135_v59 }
 0x2a5   :  { %v947_v61 = vpop.xlane.xlu0 %946  ;;  %v7685_v62 = vpop.xlane.xlu1 %1137 }
 0x2a6   :  { %v1024_v28 = vmul.f32 0.03125, %v947_v61 }
 0x2a8   :  { %v1065_v24 = vadd.f32 %v1064_v17, %v1024_v28 }
 0x2a9   :  { %v1141_v63 = vpop.xlane.xlu0 %1140  ;;  %v7687_v0 = vpop.xlane.xlu1 %949 }
 0x2aa   :  { %v1217_v41 = vmul.f32 0.03125, %v1141_v63 }
 0x2ad   :  { %v953_v10 = vpop.xlane.xlu0 %952  ;;  %v7692_v14 = vpop.xlane.xlu1 %1143 }
 0x2ae   :  { %v1026_v7 = vmul.f32 0.03125, %v953_v10 }
 0x2b0   :  { %v1066_v4 = vadd.f32 %v1065_v24, %v1026_v7 }
 0x2b1   :  { %v1147_v13 = vpop.xlane.xlu0 %1146  ;;  %v7694_v15 = vpop.xlane.xlu1 %955 }
 0x2b2   :  { %1393 = vperm.xlu1 %6339, %v5311_v11   ;;  %v1219_v16 = vmul.f32 0.03125, %v1147_v13 }
 0x2b5   :  { %v959_v12 = vpop.xlane.xlu0 %958  ;;  %v7696_v56 = vpop.xlane.xlu1 %1149 }
 0x2b9   :  { %v1153_v26 = vpop.xlane.xlu0 %1152  ;;  %v7698_v21 = vpop.xlane.xlu1 %961 }
 0x2ba   :  { %v1221_v20 = vmul.f32 0.03125, %v1153_v26 }
 0x2bd   :  { %v965_v49 = vpop.xlane.xlu0 %964  ;;  %v7700_v51 = vpop.xlane.xlu1 %1155 }
 0x2be   :  { %v1030_v39 = vmul.f32 0.03125, %v965_v49 }
 0x2c1   :  { %v1159_v3 = vpop.xlane.xlu0 %1158  ;;  %v7702_v35 = vpop.xlane.xlu1 %967 }
 0x2c2   :  { %v1223_v48 = vmul.f32 0.03125, %v1159_v3 }
 0x2c5   :  { %v971_v1 = vpop.xlane.xlu0 %970  ;;  %v7704_v11 = vpop.xlane.xlu1 %1161 }
 0x2c6   :  { %10663 = vst [vmem:[#allocation34_spill] sm:$0xff] %v7704_v11  ;;  %v1256_v11 = vadd.f32 %v1255_v43, %v1213_v38  ;;  %v1032_v45 = vmul.f32 0.03125, %v971_v1 }
 0x2c9   :  { %v1165_v2 = vpop.xlane.xlu0 %1164  ;;  %v7706_v30 = vpop.xlane.xlu1 %973 }
 0x2ca   :  { %10664 = vst [vmem:[#allocation35_spill] sm:$0xff] %v7706_v30  ;;  %v1028_v30 = vmul.f32 0.03125, %v959_v12  ;;  %v1225_v28 = vmul.f32 0.03125, %v1165_v2 }
 0x2cc   :  { %v1067_v27 = vadd.f32 %v1066_v4, %v1028_v30 }
 0x2cd   :  { %v977_v54 = vpop.xlane.xlu0 %976  ;;  %v7708_v57 = vpop.xlane.xlu1 %1167 }
 0x2ce   :  { %10665 = vst [vmem:[#allocation36_spill] sm:$0xff] %v7708_v57  ;;  %v1257_v57 = vadd.f32 %v1256_v11, %v1215_v31  ;;  %v1068_v47 = vadd.f32 %v1067_v27, %v1030_v39  ;;  %v1034_v59 = vmul.f32 0.03125, %v977_v54 }
 0x2d0   :  { %v1258_v25 = vadd.f32 %v1257_v57, %v1217_v41  ;;  %v1069_v17 = vadd.f32 %v1068_v47, %v1032_v45 }
 0x2d1   :  { %v1171_v6 = vpop.xlane.xlu0 %1170  ;;  %v7710_v18 = vpop.xlane.xlu1 %979 }
 0x2d2   :  { %v1259_v37 = vadd.f32 %v1258_v25, %v1219_v16  ;;  %v1070_v7 = vadd.f32 %v1069_v17, %v1034_v59  ;;  %v1227_v63 = vmul.f32 0.03125, %v1171_v6 }
 0x2d4   :  { %v1260_v38 = vadd.f32 %v1259_v37, %v1221_v20 }
 0x2d5   :  { %v983_v42 = vpop.xlane.xlu0 %982  ;;  %v7712_v19 = vpop.xlane.xlu1 %1173 }
 0x2d6   :  { %v1036_v43 = vmul.f32 0.03125, %v983_v42  ;;  %v1261_v31 = vadd.f32 %v1260_v38, %v1223_v48 }
 0x2d8   :  { %v1262_v13 = vadd.f32 %v1261_v31, %v1225_v28  ;;  %v1071_v1 = vadd.f32 %v1070_v7, %v1036_v43  ;;  %v1017_v43 = vmul.f32 0.03125, %v7670_v34 }
 0x2d9   :  { %v1177_v55 = vpop.xlane.xlu0 %1176  ;;  %v7714_v10 = vpop.xlane.xlu1 %985 }
 0x2da   :  { %v1229_v12 = vmul.f32 0.03125, %v1177_v55  ;;  %v1263_v49 = vadd.f32 %v1262_v13, %v1227_v63  ;;  %v1015_v63 = vmul.f32 0.03125, %v7661_v23  ;;  %v1214_v23 = vmul.f32 0.03125, %v7680_v53 }
 0x2db   :  { %v1220_v53 = vmul.f32 0.03125, %v7696_v56 }
 0x2dc   :  { %v1264_v41 = vadd.f32 %v1263_v49, %v1229_v12  ;;  %v1047_v13 = vadd.f32 %v1017_v43, %v1015_v63  ;;  %v1208_v12 = vmul.f32 0.03125, %v7666_v29  ;;  %v1212_v49 = vmul.f32 0.03125, %v7674_v44 }
 0x2dd   :  { %v989_v5 = vpop.xlane.xlu0 %988  ;;  %v7716_v4 = vpop.xlane.xlu1 %1179  ;;  %v1029_v44 = vmul.f32 0.03125, %v7698_v21 }
 0x2de   :  { %v1038_v57 = vmul.f32 0.03125, %v989_v5 }
 0x2e0   :  { %v1072_v11 = vadd.f32 %v1071_v1, %v1038_v57  ;;  %v1019_v57 = vmul.f32 0.03125, %v7672_v40  ;;  %v1021_v1 = vmul.f32 0.03125, %v7676_v46  ;;  %v1025_v40 = vmul.f32 0.03125, %v7687_v0 }
 0x2e1   :  { %v1183_v58 = vpop.xlane.xlu0 %1182  ;;  %v1027_v46 = vmul.f32 0.03125, %v7694_v15  ;;  %v1031_v0 = vmul.f32 0.03125, %v7702_v35 }
 0x2e2   :  { %v1231_v3 = vmul.f32 0.03125, %v1183_v58 }
 0x2e4   :  { %v1265_v6 = vadd.f32 %v1264_v41, %v1231_v3  ;;  %v1216_v41 = vmul.f32 0.03125, %v7685_v62 }
 0x2e5   :  { %v995_v9 = vpop.xlane.xlu0 %994 }
 0x2e6   :  { %v1040_v26 = vmul.f32 0.03125, %v995_v9  ;;  %v7718_v9 = vpop.xlane.xlu1 %991 }
 0x2e8   :  { %v1073_v42 = vadd.f32 %v1072_v11, %v1040_v26  ;;  %v1048_v26 = vadd.f32 %v1047_v13, %v1019_v57  ;;  %v1023_v11 = vmul.f32 0.03125, %v7683_v60 }
 0x2e9   :  { %v1189_v32 = vpop.xlane.xlu0 %1188 }
 0x2ea   :  { %v1233_v2 = vmul.f32 0.03125, %v1189_v32  ;;  %v7722_v32 = vpop.xlane.xlu1 %1185 }
 0x2ec   :  { %v1266_v27 = vadd.f32 %v1265_v6, %v1233_v2  ;;  %v1218_v2 = vmul.f32 0.03125, %v7692_v14 }
 0x2ed   :  { %v1001_v50 = vpop.xlane.xlu0 %1000 }
 0x2ee   :  { %v1042_v54 = vmul.f32 0.03125, %v1001_v50  ;;  %v998_v7 = vpop.xlane.xlu1 %997 }
 0x2ef   :  { %v1041_v57 = vmul.f32 0.03125, %v998_v7  ;;  %v10669_v7 = vld [vmem:[#allocation20_spill] sm:$0xff] }
 0x2f0   :  { %v1074_v39 = vadd.f32 %v1073_v42, %v1042_v54  ;;  %v1049_v54 = vadd.f32 %v1048_v26, %v1021_v1 }
 0x2f1   :  { %v1195_v61 = vpop.xlane.xlu0 %1194 }
 0x2f2   :  { %v1235_v25 = vmul.f32 0.03125, %v1195_v61  ;;  %v1192_v34 = vpop.xlane.xlu1 %1191 }
 0x2f4   :  { %v1267_v37 = vadd.f32 %v1266_v27, %v1235_v25  ;;  %v1222_v27 = vmul.f32 0.03125, %v7700_v51 }
 0x2f5   :  { %v1007_v30 = vpop.xlane.xlu0 %1006 }
 0x2f6   :  { %v1044_v16 = vmul.f32 0.03125, %v1007_v30  ;;  %v1210_v30 = vmul.f32 0.03125, %v7668_v33  ;;  %v1050_v33 = vadd.f32 %v1049_v54, %v1023_v11  ;;  %v1004_v60 = vpop.xlane.xlu1 %1003  ;;  %v1234_v54 = vmul.f32 0.03125, %v1192_v34 }
 0x2f8   :  { %v1075_v20 = vadd.f32 %v1074_v39, %v1044_v16  ;;  %v1240_v3 = vadd.f32 %v1210_v30, %v1208_v12  ;;  %v1051_v29 = vadd.f32 %v1050_v33, %v1025_v40  ;;  %v1043_v12 = vmul.f32 0.03125, %v1004_v60 }
 0x2f9   :  { %v1201_v24 = vpop.xlane.xlu0 %1200 }
 0x2fa   :  { %v1237_v45 = vmul.f32 0.03125, %v1201_v24  ;;  %v1241_v24 = vadd.f32 %v1240_v3, %v1212_v49  ;;  %v1052_v39 = vadd.f32 %v1051_v29, %v1027_v46 }
 0x2fc   :  { %v1268_v47 = vadd.f32 %v1267_v37, %v1237_v45  ;;  %v1242_v42 = vadd.f32 %v1241_v24, %v1214_v23  ;;  %v10667_v37 = vld [vmem:[#allocation34_spill] sm:$0xff] }
 0x2fd   :  { %v1013_v5 = vpop.xlane.xlu0 %1012  ;;  %v1224_v51 = vmul.f32 0.03125, %v10667_v37 }
 0x2fe   :  { %v1046_v55 = vmul.f32 0.03125, %v1013_v5  ;;  %v1243_v6 = vadd.f32 %v1242_v42, %v1216_v41  ;;  %v1053_v5 = vadd.f32 %v1052_v39, %v1029_v44 }
 0x300   :  { %v1076_v58 = vadd.f32 %v1075_v20, %v1046_v55  ;;  %v1244_v25 = vadd.f32 %v1243_v6, %v1218_v2  ;;  %v10666_v20 = vld [vmem:[#allocation35_spill] sm:$0xff]  ;;  %v1054_v45 = vadd.f32 %v1053_v5, %v1031_v0  ;;  %v10671_v2 = vld [vmem:[#allocation22_spill] sm:$0xff] }
 0x301   :  { %v1207_v50 = vpop.xlane.xlu0 %1206  ;;  %v1033_v56 = vmul.f32 0.03125, %v10666_v20 }
 0x302   :  { %v7720_v48 = vmul.f32 0.0625, %v1076_v58  ;;  %v1239_v59 = vmul.f32 0.03125, %v1207_v50  ;;  %v1245_v55 = vadd.f32 %v1244_v25, %v1220_v53  ;;  %v1198_v58 = vpop.xlane.xlu1 %1197  ;;  %v10672_v53 = vld [vmem:[#allocation7_spill] sm:$0xff] }
 0x303   :  { %v1055_v50 = vadd.f32 %v1054_v45, %v1033_v56  ;;  %v10674_v56 = vld [vmem:[#allocation10_spill] sm:$0xff] }
 0x304   :  { %v1269_v38 = vadd.f32 %v1268_v47, %v1239_v59  ;;  %v1273_v61 = vmul.f32 %v7720_v48, %v7720_v48  ;;  %v1301_v62 = vsub.f32 %v7604_v22, %v7720_v48  ;;  %v1303_v15 = vsub.f32 %v7618_v36, %v7720_v48 }
 0x305   :  { %v1305_v14 = vsub.f32 %v7632_v52, %v7720_v48  ;;  %v1307_v21 = vsub.f32 %v7646_v8, %v7720_v48  ;;  %v1035_v8 = vmul.f32 0.03125, %v7710_v18  ;;  %v1037_v47 = vmul.f32 0.03125, %v7714_v10 }
 0x306   :  { %v1271_v17 = vmul.f32 0.0625, %v1269_v38  ;;  %v1246_v59 = vadd.f32 %v1245_v55, %v1222_v27  ;;  %v10668_v38 = vld [vmem:[#allocation36_spill] sm:$0xff]  ;;  %v1230_v18 = vmul.f32 0.03125, %v7716_v4  ;;  %v1010_v13 = vpop.xlane.xlu1 %1009  ;;  %v1232_v10 = vmul.f32 0.03125, %v7722_v32  ;;  %v10670_v4 = vld [vmem:[#allocation5_spill] sm:$0xff] }
 0x307   :  { %v1045_v11 = vmul.f32 0.03125, %v1010_v13  ;;  %v1291_v33 = vsub.f32 %v10669_v7, %v7720_v48  ;;  %v1277_v41 = vsub.f32 %v10670_v4, %v7720_v48  ;;  %v1293_v44 = vsub.f32 %v10671_v2, %v7720_v48  ;;  %v10673_v27 = vld [vmem:[#allocation24_spill] sm:$0xff] }
 0x308   :  { %v1275_v28 = vsub.f32 %v1271_v17, %v1273_v61  ;;  %v1226_v61 = vmul.f32 0.03125, %v10668_v38  ;;  %v1056_v17 = vadd.f32 %v1055_v50, %v1035_v8  ;;  %v1247_v43 = vadd.f32 %v1246_v59, %v1224_v51  ;;  %v10680_v7 = vld [vmem:[#allocation8_spill] sm:$0xff] }
 0x309   :  { %v7782_v29 = vpop.permute.xlu0 %1351  ;;  %v1279_v0 = vsub.f32 %v10672_v53, %v7720_v48  ;;  %v1295_v20 = vsub.f32 %v10673_v27, %v7720_v48  ;;  %v1281_v45 = vsub.f32 %v10674_v56, %v7720_v48  ;;  %v10683_v53 = vld [vmem:[#allocation33_spill] sm:$0xff] }
 0x30a   :  { %v1309_v31 = vadd.f32 1e-05, %v1275_v28  ;;  %v1039_v28 = vmul.f32 0.03125, %v7718_v9  ;;  %v1057_v63 = vadd.f32 %v1056_v17, %v1037_v47  ;;  %v1248_v30 = vadd.f32 %v1247_v43, %v1226_v61  ;;  %v7774_v40 = vpop.permute.xlu1 %1388  ;;  %v10675_v43 = vld [vmem:[#allocation12_spill] sm:$0xff]  ;;  %v10684_v56 = vld [vmem:[#allocation17_spill] sm:$0xff] }
 0x30c   :  { %6781 = vrsqrt.f32 %v1309_v31  ;;  %v1228_v31 = vmul.f32 0.03125, %v7712_v19  ;;  %v1058_v1 = vadd.f32 %v1057_v63, %v1039_v28  ;;  %v1236_v19 = vmul.f32 0.03125, %v1198_v58 }
 0x30e   :  { %v1249_v26 = vadd.f32 %v1248_v30, %v1228_v31  ;;  %v1059_v49 = vadd.f32 %v1058_v1, %v1041_v57  ;;  %v1283_v31 = vsub.f32 %v10675_v43, %v7720_v48  ;;  %v10676_v1 = vld [vmem:[#allocation14_spill] sm:$0xff]  ;;  %v10686_v43 = vmov 0.0|0.0  }
 0x310   :  { %v1250_v3 = vadd.f32 %v1249_v26, %v1230_v18  ;;  %v1060_v23 = vadd.f32 %v1059_v49, %v1043_v12  ;;  %v1285_v12 = vsub.f32 %v10676_v1, %v7720_v48 }
 0x312   :  { %v1251_v9 = vadd.f32 %v1250_v3, %v1232_v10  ;;  %v1061_v24 = vadd.f32 %v1060_v23, %v1045_v11  ;;  %v10677_v3 = vld [vmem:[#allocation11_spill] sm:$0xff]  ;;  %v10678_v23 = vld [vmem:[#allocation6_spill] sm:$0xff] }
 0x314   :  { %v1252_v46 = vadd.f32 %v1251_v9, %v1234_v54  ;;  %v7786_v6 = vmul.f32 0.0625, %v1061_v24 }
 0x316   :  { %v7740_v16 = vpop.eup %6781  ;;  %v1253_v60 = vadd.f32 %v1252_v46, %v1236_v19  ;;  %v1272_v8 = vmul.f32 %v7786_v6, %v7786_v6  ;;  %v1282_v54 = vsub.f32 %v10677_v3, %v7786_v6  ;;  %v1276_v9 = vsub.f32 %v10678_v23, %v7786_v6  ;;  %v10679_v19 = vld [vmem:[#allocation13_spill] sm:$0xff] }
 0x317   :  { %v7755_v35 = vmul.f32 %v7740_v16, %v1301_v62  ;;  %v7758_v22 = vmul.f32 %v7740_v16, %v1303_v15  ;;  %v7761_v36 = vmul.f32 %v7740_v16, %v1305_v14  ;;  %v7764_v52 = vmul.f32 %v7740_v16, %v1307_v21  ;;  %v10681_v46 = vld [vmem:[#allocation9_spill] sm:$0xff] }
 0x318   :  { %v1327_v42 = vmul.f32 %v7740_v16, %v1291_v33  ;;  %v1313_v32 = vmul.f32 %v7740_v16, %v1277_v41  ;;  %v1329_v62 = vmul.f32 %v7740_v16, %v1293_v44  ;;  %v1315_v25 = vmul.f32 %v7740_v16, %v1279_v0  ;;  %v10689_v3 = vld [vmem:[#allocation21_spill] sm:$0xff] }
 0x319   :  { %v1331_v58 = vmul.f32 %v7740_v16, %v1295_v20  ;;  %v1317_v50 = vmul.f32 %v7740_v16, %v1281_v45  ;;  %v1319_v30 = vmul.f32 %v7740_v16, %v1283_v31  ;;  %v1321_v10 = vmul.f32 %v7740_v16, %v1285_v12  ;;  %v10687_v31 = vld [vmem:[#allocation19_spill] sm:$0xff] }
 0x31a   :  { %v1369_v14 = vmul.f32 %v7782_v29, %v1327_v42  ;;  %v1355_v21 = vmul.f32 %v7782_v29, %v1313_v32  ;;  %v1371_v59 = vmul.f32 %v7782_v29, %v1329_v62  ;;  %v1357_v38 = vmul.f32 %v7782_v29, %v1315_v25 }
 0x31b   :  { %v1373_v63 = vmul.f32 %v7782_v29, %v1331_v58  ;;  %v1359_v57 = vmul.f32 %v7782_v29, %v1317_v50  ;;  %v1361_v26 = vmul.f32 %v7782_v29, %v1319_v30  ;;  %v1363_v11 = vmul.f32 %v7782_v29, %v1321_v10  ;;  %v10688_v10 = vld [vmem:[#allocation18_spill] sm:$0xff] }
 0x31c   :  { %v1284_v24 = vsub.f32 %v10679_v19, %v7786_v6  ;;  %v1278_v33 = vsub.f32 %v10680_v7, %v7786_v6  ;;  %v1280_v42 = vsub.f32 %v10681_v46, %v7786_v6  ;;  %v1288_v45 = vsub.f32 %v10684_v56, %v7786_v6  ;;  %v10690_v19 = vld [vmem:[#allocation26_spill] sm:$0xff] }
 0x32e   :  { %v1204_v34 = vpop.xlane.xlu1 %1203 }
 0x32f   :  { %v1238_v39 = vmul.f32 0.03125, %v1204_v34 }
 0x331   :  { %v1254_v15 = vadd.f32 %v1253_v60, %v1238_v39  ;;  %v10682_v60 = vld [vmem:[#allocation15_spill] sm:$0xff] }
 0x332   :  { %v7794_v5 = vpop.permute.xlu1 %1393  ;;  %v1286_v39 = vsub.f32 %v10682_v60, %v7786_v6  ;;  %v10692_v60 = vld [vmem:[#allocation28_spill] sm:$0xff] }
 0x333   :  { %v1270_v55 = vmul.f32 0.0625, %v1254_v15  ;;  %v7803_v37 = vadd.f32 %v7794_v5, %v1369_v14  ;;  %v1397_v51 = vadd.f32 %v7794_v5, %v1355_v21  ;;  %v7814_v17 = vadd.f32 %v7794_v5, %v1371_v59 }
 0x334   :  { %v1399_v28 = vadd.f32 %v7794_v5, %v1357_v38  ;;  %v7826_v18 = vadd.f32 %v7794_v5, %v1373_v63  ;;  %v1401_v13 = vadd.f32 %v7794_v5, %v1359_v57  ;;  %v7837_v49 = vadd.f32 %v7794_v5, %v1361_v26  ;;  %v10685_v38 = vld [vmem:[#allocation16_spill] sm:$0xff] }
 0x335   :  { %v1274_v47 = vsub.f32 %v1270_v55, %v1272_v8  ;;  %1715 = vrot.lane.b32.xlu0 %v7803_v37, %s6881_s10  ;;  %1687 = vrot.lane.b32.xlu1 %v1397_v51, %s6881_s10  ;;  %v7853_v41 = vadd.f32 %v7794_v5, %v1363_v11  ;;  %v1290_v63 = vsub.f32 %v10687_v31, %v7786_v6 }
 0x336   :  { %v1289_v11 = vsub.f32 %v10688_v10, %v7720_v48 }
 0x337   :  { %v1308_v61 = vadd.f32 1e-05, %v1274_v47 }
 0x339   :  { %6783 = vrsqrt.f32 %v1308_v61  ;;  %1719 = vrot.lane.b32.xlu0 %v7814_v17, %s6881_s10  ;;  %1691 = vrot.lane.b32.xlu1 %v1399_v28, %s6881_s10  ;;  %v1287_v61 = vsub.f32 %v10685_v38, %v7720_v48 }
 0x33b   :  { %v1323_v30 = vmul.f32 %v7740_v16, %v1287_v61 }
 0x33d   :  { %1723 = vrot.lane.b32.xlu0 %v7826_v18, %s6881_s10  ;;  %1695 = vrot.lane.b32.xlu1 %v1401_v13, %s6881_s10  ;;  %v1365_v23 = vmul.f32 %v7782_v29, %v1323_v30 }
 0x341   :  { %1699 = vrot.lane.b32.xlu1 %v7837_v49, %s6881_s10 }
 0x343   :  { %v7850_v4 = vpop.eup %6783 }
 0x344   :  { %v1318_v32 = vmul.f32 %v7850_v4, %v1282_v54  ;;  %v1312_v34 = vmul.f32 %v7850_v4, %v1276_v9  ;;  %v1320_v2 = vmul.f32 %v7850_v4, %v1284_v24  ;;  %v1314_v44 = vmul.f32 %v7850_v4, %v1278_v33 }
 0x345   :  { %1703 = vrot.lane.b32.xlu1 %v7853_v41, %s6881_s10  ;;  %v1316_v14 = vmul.f32 %v7850_v4, %v1280_v42  ;;  %v1322_v20 = vmul.f32 %v7850_v4, %v1286_v39  ;;  %v1324_v59 = vmul.f32 %v7850_v4, %v1288_v45  ;;  %v1326_v26 = vmul.f32 %v7850_v4, %v1290_v63 }
 0x346   :  { %v1360_v0 = vmul.f32 %v10683_v53, %v1318_v32  ;;  %v1354_v62 = vmul.f32 %v10683_v53, %v1312_v34  ;;  %v1356_v15 = vmul.f32 %v10683_v53, %v1314_v44  ;;  %v1362_v27 = vmul.f32 %v10683_v53, %v1320_v2  ;;  %v10691_v2 = vld [vmem:[#allocation23_spill] sm:$0xff] }
 0x347   :  { %v1358_v58 = vmul.f32 %v10683_v53, %v1316_v14  ;;  %v1364_v47 = vmul.f32 %v10683_v53, %v1322_v20  ;;  %v1366_v12 = vmul.f32 %v10683_v53, %v1324_v59  ;;  %v1292_v54 = vsub.f32 %v10689_v3, %v7786_v6  ;;  %v10694_v20 = vld [vmem:[#allocation25_spill] sm:$0xff] }
 0x348   :  { %v1402_v21 = vadd.f32 %v7774_v40, %v1360_v0  ;;  %v1396_v25 = vadd.f32 %v7774_v40, %v1354_v62  ;;  %v1398_v55 = vadd.f32 %v7774_v40, %v1356_v15  ;;  %v1404_v50 = vadd.f32 %v7774_v40, %v1362_v27 }
 0x349   :  { %v1400_v57 = vadd.f32 %v7774_v40, %v1358_v58  ;;  %v1406_v1 = vadd.f32 %v7774_v40, %v1364_v47  ;;  %v1325_v9 = vmul.f32 %v7740_v16, %v1289_v11  ;;  %v1297_v24 = vsub.f32 %v10690_v19, %v7720_v48  ;;  %v10698_v11 = vld [vmem:[#allocation29_spill] sm:$0xff] }
 0x34a   :  { %1697 = vrot.lane.b32.xlu0 %v1402_v21, %s6881_s10  ;;  %1685 = vrot.lane.b32.xlu1 %v1396_v25, %s6881_s10  ;;  %v6115_v8 = vpack.c.bf16 %v1397_v51, %v1396_v25  ;;  %v6118_v51 = vpack.c.bf16 %v1399_v28, %v1398_v55  ;;  %v1408_v7 = vadd.f32 %v7774_v40, %v1366_v12 }
 0x34b   :  { %v6121_v28 = vpack.c.bf16 %v1401_v13, %v1400_v57  ;;  %v1407_v33 = vadd.f32 %v7794_v5, %v1365_v23  ;;  %v1368_v46 = vmul.f32 %v10683_v53, %v1326_v26  ;;  %v1328_v42 = vmul.f32 %v7850_v4, %v1292_v54  ;;  %v10697_v26 = vld [vmem:[#allocation32_spill] sm:$0xff] }
 0x34c   :  { %6116 = vmatpush1.bf16.msra.mxu1 %v6115_v8  ;;  %v1333_v13 = vmul.f32 %v7740_v16, %v1297_v24  ;;  %v6124_v32 = vpack.c.bf16 %v7837_v49, %v1402_v21  ;;  %v1367_v34 = vmul.f32 %v7782_v29, %v1325_v9  ;;  %v1294_v44 = vsub.f32 %v10691_v2, %v7786_v6  ;;  %v10693_v21 = vld [vmem:[#allocation30_spill] sm:$0xff] }
 0x34d   :  { %6117 = vmatprep.subr.bf16.mxu1 %v10686_v43  ;;  %v1299_v39 = vsub.f32 %v10692_v60, %v7720_v48  ;;  %v1410_v0 = vadd.f32 %v7774_v40, %v1368_v46  ;;  %v1370_v15 = vmul.f32 %v10683_v53, %v1328_v42  ;;  %v1302_v25 = vsub.f32 %v10693_v21, %v7786_v6  ;;  %v129_v21 = vld [vmem:[%s10573_s2 + $0x60] sm:$0xff] }
 0x34e   :  { %1701 = vrot.lane.b32.xlu0 %v1404_v50, %s6881_s10  ;;  %1689 = vrot.lane.b32.xlu1 %v1398_v55, %s6881_s10  ;;  %v1409_v62 = vadd.f32 %v7794_v5, %v1367_v34  ;;  %v1330_v14 = vmul.f32 %v7850_v4, %v1294_v44  ;;  %v1375_v49 = vmul.f32 %v7782_v29, %v1333_v13  ;;  %v126_v13 = vld [vmem:[%s10573_s2 + $0x48] sm:$0xff] }
 0x34f   :  { %v6127_v48 = vpack.c.bf16 %v7853_v41, %v1404_v50  ;;  %v1335_v27 = vmul.f32 %v7740_v16, %v1299_v39  ;;  %v1296_v56 = vsub.f32 %v10694_v20, %v7786_v6  ;;  %v1412_v8 = vadd.f32 %v7774_v40, %v1370_v15  ;;  %v10695_v41 = vld [vmem:[#allocation31_spill] sm:$0xff]  ;;  %v132_v20 = vld [vmem:[%s10573_s2 + $0x78] sm:$0xff] }
 0x350   :  { %6119 = vmatpush1.bf16.msra.mxu1 %v6118_v51  ;;  %v7934_v45 = vadd.f32 %v7794_v5, %v1375_v49  ;;  %v1372_v55 = vmul.f32 %v10683_v53, %v1330_v14  ;;  %v1338_v58 = vmul.f32 %v7850_v4, %v1302_v25  ;;  %v1304_v16 = vsub.f32 %v10695_v41, %v7786_v6  ;;  %v10696_v50 = vld [vmem:[#allocation27_spill] sm:$0xff]  ;;  %v6798_v41 = vld [vmem:[%s10572_s1 + $0x38] sm:$0xff] }
 0x351   :  { %6120 = vmatprep.subr.bf16.mxu1 %v10686_v43  ;;  %v1332_v47 = vmul.f32 %v7850_v4, %v1296_v56  ;;  %v1298_v59 = vsub.f32 %v10696_v50, %v7786_v6  ;;  %v6130_v38 = vpack.c.bf16 %v1407_v33, %v1406_v1  ;;  %v1377_v61 = vmul.f32 %v7782_v29, %v1335_v27  ;;  %v131_v27 = vld [vmem:[%s10573_s2 + $0x70] sm:$0xff]  ;;  %v6793_v56 = vld [vmem:[%s10572_s1] sm:$0xff]  ;;  %v6800_v50 = vld [vmem:[%s10572_s1 + $0x48] sm:$0xff] }
 0x352   :  { %1705 = vrot.lane.b32.xlu0 %v1406_v1, %s6881_s10  ;;  %1693 = vrot.lane.b32.xlu1 %v1400_v57, %s6881_s10  ;;  %v1340_v31 = vmul.f32 %v7850_v4, %v1304_v16  ;;  %v1414_v51 = vadd.f32 %v7774_v40, %v1372_v55  ;;  %v1380_v30 = vmul.f32 %v10683_v53, %v1338_v58  ;;  %v6795_v55 = vld [vmem:[%s10572_s1 + $0x10] sm:$0xff]  ;;  %v6796_v58 = vld [vmem:[%s10572_s1 + $0x28] sm:$0xff] }
 0x353   :  { %v1334_v63 = vmul.f32 %v7850_v4, %v1298_v59  ;;  %v1419_v57 = vadd.f32 %v7794_v5, %v1377_v61  ;;  %v1374_v12 = vmul.f32 %v10683_v53, %v1332_v47  ;;  %v6133_v1 = vpack.c.bf16 %v1409_v62, %v1408_v7  ;;  %v6797_v47 = vld [vmem:[%s10572_s1 + $0x20] sm:$0xff]  ;;  %v6799_v16 = vld [vmem:[%s10572_s1 + $0x30] sm:$0xff] }
 0x354   :  { %6122 = vmatpush1.bf16.msra.mxu1 %v6121_v28  ;;  %v1306_v10 = vsub.f32 %v10697_v26, %v7786_v6  ;;  %v1300_v3 = vsub.f32 %v10698_v11, %v7786_v6  ;;  %v1382_v54 = vmul.f32 %v10683_v53, %v1340_v31  ;;  %v1422_v23 = vadd.f32 %v7774_v40, %v1380_v30  ;;  %v6801_v59 = vld [vmem:[%s10572_s1 + $0x40] sm:$0xff]  ;;  %v6803_v61 = vld [vmem:[%s10572_s1 + $0x50] sm:$0xff]  ;;  %v6804_v31 = vld [vmem:[%s10572_s1 + $0x68] sm:$0xff] }
 0x355   :  { %6123 = vmatprep.subr.bf16.mxu1 %v10686_v43  ;;  %v1376_v28 = vmul.f32 %v10683_v53, %v1334_v63  ;;  %v1416_v9 = vadd.f32 %v7774_v40, %v1374_v12  ;;  %v6136_v6 = vpack.c.bf16 %v7803_v37, %v1410_v0  ;;  %v6142_v2 = vpack.c.bf16 %v7826_v18, %v1414_v51  ;;  %v6805_v63 = vld [vmem:[%s10572_s1 + $0x60] sm:$0xff]  ;;  %v6808_v30 = vld [vmem:[%s10572_s1 + $0x88] sm:$0xff]  ;;  %v6811_v26 = vld [vmem:[%s10572_s1 + $0x90] sm:$0xff] }
 0x356   :  { %1709 = vrot.lane.b32.xlu0 %v1408_v7, %s6881_s10  ;;  %1707 = vrot.lane.b32.xlu1 %v1407_v33, %s6881_s10  ;;  %v1342_v19 = vmul.f32 %v7850_v4, %v1306_v10  ;;  %v1336_v24 = vmul.f32 %v7850_v4, %v1300_v3  ;;  %v1424_v7 = vadd.f32 %v7774_v40, %v1382_v54  ;;  %v125_v4 = vld [vmem:[%s10573_s2 + $0x40] sm:$0xff]  ;;  %v6812_v10 = vld [vmem:[%s10572_s1 + $0xa8] sm:$0xff] }
 0x357   :  { %v1418_v33 = vadd.f32 %v7774_v40, %v1376_v28  ;;  %v7983_v37 = vpack.c.bf16 %v126_v13, %v125_v4  ;;  %v1381_v60 = vmul.f32 %v7782_v29, %v7758_v22  ;;  %v1383_v18 = vmul.f32 %v7782_v29, %v7761_v36  ;;  %v5344_v36 = vld [vmem:[%s10574_s3 + $0x20] sm:$0xff]  ;;  %v6814_v3 = vld [vmem:[%s10572_s1 + $0xb8] sm:$0xff]  ;;  %v6815_v54 = vld [vmem:[%s10572_s1 + $0xb0] sm:$0xff] }
 0x358   :  { %6125 = vmatpush1.bf16.msra.mxu1 %v6124_v32  ;;  %v1384_v46 = vmul.f32 %v10683_v53, %v1342_v19  ;;  %v1378_v42 = vmul.f32 %v10683_v53, %v1336_v24  ;;  %v6139_v32 = vpack.c.bf16 %v7814_v17, %v1412_v8  ;;  %v1379_v17 = vmul.f32 %v7782_v29, %v7755_v35  ;;  %v6809_v12 = vld [vmem:[%s10572_s1 + $0x80] sm:$0xff]  ;;  %v6816_v28 = vld [vmem:[%s10572_s1 + $0xc8] sm:$0xff]  ;;  %v6819_v19 = vld [vmem:[%s10572_s1 + $0xd0] sm:$0xff] }
 0x359   :  { %6126 = vmatprep.subr.bf16.mxu1 %v10686_v43  ;;  %6163 = vmatprep.subr.bf16.mxu0 %v7983_v37  ;;  %v1423_v39 = vadd.f32 %v7794_v5, %v1381_v60  ;;  %v6148_v35 = vpack.c.bf16 %v1419_v57, %v1418_v33  ;;  %v1385_v22 = vmul.f32 %v7782_v29, %v7764_v52  ;;  %v127_v29 = vld [vmem:[%s10573_s2 + $0x50] sm:$0xff]  ;;  %v6813_v11 = vld [vmem:[%s10572_s1 + $0xa0] sm:$0xff]  ;;  %v6820_v24 = vld [vmem:[%s10572_s1 + $0xe8] sm:$0xff] }
 0x35a   :  { %1713 = vrot.lane.b32.xlu0 %v1410_v0, %s6881_s10  ;;  %1711 = vrot.lane.b32.xlu1 %v1409_v62, %s6881_s10  ;;  %v1426_v53 = vadd.f32 %v7774_v40, %v1384_v46  ;;  %v1420_v34 = vadd.f32 %v7774_v40, %v1378_v42  ;;  %v1421_v44 = vadd.f32 %v7794_v5, %v1379_v17  ;;  %v6824_v46 = vld [vmem:[%s10572_s1 + $0x108] sm:$0xff]  ;;  %v6825_v42 = vld [vmem:[%s10572_s1 + $0x100] sm:$0xff] }
 0x35b   :  { %6165 = vmatpush3.bf16.msra.mxu0 %v7983_v37  ;;  %v6145_v40 = vpack.c.bf16 %v7934_v45, %v1416_v9  ;;  %v1425_v0 = vadd.f32 %v7794_v5, %v1383_v18  ;;  %v1427_v15 = vadd.f32 %v7794_v5, %v1385_v22  ;;  %v6154_v14 = vpack.c.bf16 %v1423_v39, %v1422_v23  ;;  %v128_v5 = vld [vmem:[%s10573_s2 + $0x58] sm:$0xff]  ;;  %v6827_v13 = vld [vmem:[%s10572_s1 + $0x110] sm:$0xff]  ;;  %v6833_v17 = vld [vmem:[%s10572_s1 + $0x140] sm:$0xff] }
 0x35c   :  { %6128 = vmatpush1.bf16.msra.mxu1 %v6127_v48  ;;  %v6151_v62 = vpack.c.bf16 %v1421_v44, %v1420_v34  ;;  %v6166_v25 = vpack.c.bf16 %v128_v5, %v127_v29  ;;  %v130_v48 = vld [vmem:[%s10573_s2 + $0x68] sm:$0xff]  ;;  %v6826_v4 = vld [vmem:[%s10572_s1 + $0x118] sm:$0xff]  ;;  %v6839_v18 = vld [vmem:[%s10572_s1 + $0x170] sm:$0xff] }
 0x35d   :  { %6129 = vmatprep.subr.bf16.mxu1 %v10686_v43  ;;  %v6157_v49 = vpack.c.bf16 %v1425_v0, %v1424_v7  ;;  %v6160_v52 = vpack.c.bf16 %v1427_v15, %v1426_v53  ;;  %v6836_v60 = vld [vmem:[%s10572_s1 + $0x168] sm:$0xff]  ;;  %v6842_v22 = vld [vmem:[%s10572_s1 + $0x198] sm:$0xff]  ;;  %v6849_v5 = vld [vmem:[%s10572_s1 + $0x1c0] sm:$0xff] }
 0x35e   :  { %1717 = vrot.lane.b32.xlu0 %v1412_v8, %s6881_s10  ;;  %1727 = vrot.lane.b32.xlu1 %v7934_v45, %s6881_s10  ;;  %v6794_v45 = vld [vmem:[%s10572_s1 + $0x18] sm:$0xff]  ;;  %v6174_v8 = vpack.c.bf16 %v132_v20, %v131_v27  ;;  %v6848_v29 = vld [vmem:[%s10572_s1 + $0x1c8] sm:$0xff] }
 0x35f   :  { %6167 = vmatprep.subr.bf16.mxu0 %v6166_v25  ;;  %v6854_v27 = vld [vmem:[%s10572_s1 + $0x1f8] sm:$0xff]  ;;  %v6855_v20 = vld [vmem:[%s10572_s1 + $0x1f0] sm:$0xff] }
 0x360   :  { %6131 = vmatpush1.bf16.msra.mxu1 %v6130_v38  ;;  %6169 = vmatpush3.bf16.msra.mxu0 %v6166_v25  ;;  %v6802_v38 = vld [vmem:[%s10572_s1 + $0x58] sm:$0xff] }
 0x361   :  { %6132 = vmatprep.subr.bf16.mxu1 %v10686_v43 }
 0x362   :  { %1721 = vrot.lane.b32.xlu0 %v1414_v51, %s6881_s10  ;;  %1731 = vrot.lane.b32.xlu1 %v1419_v57, %s6881_s10  ;;  %v6806_v51 = vld [vmem:[%s10572_s1 + $0x78] sm:$0xff]  ;;  %v6807_v57 = vld [vmem:[%s10572_s1 + $0x70] sm:$0xff] }
 0x364   :  { %6134 = vmatpush1.bf16.msra.mxu1 %v6133_v1  ;;  %v6810_v1 = vld [vmem:[%s10572_s1 + $0x98] sm:$0xff] }
 0x365   :  { %6135 = vmatprep.subr.bf16.mxu1 %v10686_v43 }
 0x366   :  { %1737 = vrot.lane.b32.xlu0 %v1422_v23, %s6881_s10  ;;  %1725 = vrot.lane.b32.xlu1 %v1416_v9, %s6881_s10  ;;  %v6817_v23 = vld [vmem:[%s10572_s1 + $0xc0] sm:$0xff]  ;;  %v6818_v9 = vld [vmem:[%s10572_s1 + $0xd8] sm:$0xff] }
 0x368   :  { %6137 = vmatpush1.bf16.msra.mxu1 %v6136_v6  ;;  %v6821_v6 = vld [vmem:[%s10572_s1 + $0xe0] sm:$0xff] }
 0x369   :  { %6138 = vmatprep.subr.bf16.mxu1 %v10686_v43 }
 0x36a   :  { %1741 = vrot.lane.b32.xlu0 %v1424_v7, %s6881_s10  ;;  %1729 = vrot.lane.b32.xlu1 %v1418_v33, %s6881_s10  ;;  %v6822_v7 = vld [vmem:[%s10572_s1 + $0xf8] sm:$0xff]  ;;  %v6823_v33 = vld [vmem:[%s10572_s1 + $0xf0] sm:$0xff] }
 0x36c   :  { %6140 = vmatpush1.bf16.msra.mxu1 %v6139_v32  ;;  %v6829_v32 = vld [vmem:[%s10572_s1 + $0x120] sm:$0xff] }
 0x36d   :  { %6141 = vmatprep.subr.bf16.mxu1 %v10686_v43 }
 0x36e   :  { %1745 = vrot.lane.b32.xlu0 %v1426_v53, %s6881_s10  ;;  %1733 = vrot.lane.b32.xlu1 %v1420_v34, %s6881_s10  ;;  %v6830_v53 = vld [vmem:[%s10572_s1 + $0x138] sm:$0xff]  ;;  %v6831_v34 = vld [vmem:[%s10572_s1 + $0x130] sm:$0xff] }
 0x370   :  { %6143 = vmatpush1.bf16.msra.mxu1 %v6142_v2  ;;  %v6832_v2 = vld [vmem:[%s10572_s1 + $0x148] sm:$0xff] }
 0x371   :  { %6144 = vmatprep.subr.bf16.mxu1 %v10686_v43 }
 0x372   :  { %1735 = vrot.lane.b32.xlu1 %v1421_v44, %s6881_s10  ;;  %v6834_v44 = vld [vmem:[%s10572_s1 + $0x158] sm:$0xff] }
 0x374   :  { %6146 = vmatpush1.bf16.msra.mxu1 %v6145_v40  ;;  %v6835_v40 = vld [vmem:[%s10572_s1 + $0x150] sm:$0xff] }
 0x375   :  { %6147 = vmatprep.subr.bf16.mxu1 %v10686_v43 }
 0x376   :  { %1739 = vrot.lane.b32.xlu1 %v1423_v39, %s6881_s10  ;;  %v6837_v39 = vld [vmem:[%s10572_s1 + $0x160] sm:$0xff] }
 0x378   :  { %6149 = vmatpush1.bf16.msra.mxu1 %v6148_v35  ;;  %v6838_v35 = vld [vmem:[%s10572_s1 + $0x178] sm:$0xff] }
 0x379   :  { %6150 = vmatprep.subr.bf16.mxu1 %v10686_v43 }
 0x37a   :  { %1743 = vrot.lane.b32.xlu1 %v1425_v0, %s6881_s10  ;;  %v6840_v0 = vld [vmem:[%s10572_s1 + $0x188] sm:$0xff] }
 0x37c   :  { %6152 = vmatpush1.bf16.msra.mxu1 %v6151_v62  ;;  %v6841_v62 = vld [vmem:[%s10572_s1 + $0x180] sm:$0xff] }
 0x37d   :  { %6153 = vmatprep.subr.bf16.mxu1 %v10686_v43 }
 0x37e   :  { %1747 = vrot.lane.b32.xlu1 %v1427_v15, %s6881_s10  ;;  %v6843_v15 = vld [vmem:[%s10572_s1 + $0x190] sm:$0xff] }
 0x380   :  { %6155 = vmatpush1.bf16.msra.mxu1 %v6154_v14  ;;  %v6844_v14 = vld [vmem:[%s10572_s1 + $0x1a8] sm:$0xff] }
 0x381   :  { %6156 = vmatprep.subr.bf16.mxu1 %v10686_v43 }
 0x382   :  { %2598 = vperm.xlu1 %6339, %v5344_v36   ;;  %v6845_v36 = vld [vmem:[%s10572_s1 + $0x1a0] sm:$0xff] }
 0x384   :  { %6158 = vmatpush1.bf16.msra.mxu1 %v6157_v49  ;;  %v6846_v49 = vld [vmem:[%s10572_s1 + $0x1b8] sm:$0xff] }
 0x385   :  { %6159 = vmatprep.subr.bf16.mxu1 %v10686_v43  ;;  %v6170_v43 = vpack.c.bf16 %v130_v48, %v129_v21  ;;  %v6850_v21 = vld [vmem:[%s10572_s1 + $0x1d8] sm:$0xff]  ;;  %v6852_v48 = vld [vmem:[%s10572_s1 + $0x1e8] sm:$0xff] }
 0x387   :  { %6171 = vmatprep.subr.bf16.mxu0 %v6170_v43 }
 0x388   :  { %6161 = vmatpush1.bf16.msra.mxu1 %v6160_v52  ;;  %6173 = vmatpush3.bf16.msra.mxu0 %v6170_v43  ;;  %v6847_v52 = vld [vmem:[%s10572_s1 + $0x1b0] sm:$0xff] }
 0x389   :  { %6258 = vmatprep.subr.bf16.mxu1 %v7983_v37  ;;  %6175 = vmatprep.subr.bf16.mxu0 %v6174_v8 }
 0x38b   :  { %1493 = vmatmul.mubr.f32.vlgmr.msra.gmra.mrb[32].mxu1 %v6793_v56 }
 0x38c   :  { %1497 = vmatprep.mubr.f32.mxu1 %v6794_v45  ;;  %6262 = vmatpush3.bf16.msra.mxu1 %v7983_v37  ;;  %v6828_v37 = vld [vmem:[%s10572_s1 + $0x128] sm:$0xff] }
 0x38d   :  { %6259 = vmatprep.subr.bf16.mxu1 %v6166_v25  ;;  %6177 = vmatpush3.bf16.msra.mxu0 %v6174_v8 }
 0x38f   :  { %1498 = vmatmul.mubr.f32.gmra.mrb[34].mxu1 %v6795_v55 }
 0x390   :  { %1502 = vmatprep.mubr.f32.mxu1 %v6796_v58  ;;  %6263 = vmatpush3.bf16.msra.mxu1 %v6166_v25  ;;  %v6851_v25 = vld [vmem:[%s10572_s1 + $0x1d0] sm:$0xff] }
 0x391   :  { %6260 = vmatprep.subr.bf16.mxu1 %v6170_v43 }
 0x393   :  { %1503 = vmatmul.mubr.f32.gmra.mrb[36].mxu1 %v6797_v47 }
 0x394   :  { %1507 = vmatprep.mubr.f32.mxu1 %v6798_v41  ;;  %6264 = vmatpush3.bf16.msra.mxu1 %v6170_v43  ;;  %v6853_v43 = vld [vmem:[%s10572_s1 + $0x1e0] sm:$0xff] }
 0x395   :  { %6261 = vmatprep.subr.bf16.mxu1 %v6174_v8 }
 0x397   :  { %1508 = vmatmul.mubr.f32.gmra.mrb[38].mxu1 %v6799_v16 }
 0x398   :  { %1512 = vmatprep.mubr.f32.mxu1 %v6800_v50  ;;  %6265 = vmatpush3.bf16.msra.mxu1 %v6174_v8 }
 0x39b   :  { %1513 = vmatmul.mubr.f32.gmra.mrb[40].mxu1 %v6801_v59 }
 0x39c   :  { %1517 = vmatprep.mubr.f32.mxu1 %v6802_v38 }
 0x39f   :  { %1518 = vmatmul.mubr.f32.gmra.mrb[42].mxu1 %v6803_v61 }
 0x3a0   :  { %1522 = vmatprep.mubr.f32.mxu1 %v6804_v31 }
 0x3a3   :  { %1523 = vmatmul.mubr.f32.gmra.mrb[44].mxu1 %v6805_v63 }
 0x3a4   :  { %1527 = vmatprep.mubr.f32.mxu1 %v6806_v51 }
 0x3a7   :  { %1528 = vmatmul.mubr.f32.gmra.mrb[46].mxu1 %v6807_v57  ;;  %v1688_v56 = vpop.permute.xlu1 %1687  ;;  %v8235_v31 = vpop.permute.xlu0 %1715 }
 0x3a8   :  { %1532 = vmatprep.mubr.f32.mxu1 %v6808_v30 }
 0x3ab   :  { %1533 = vmatmul.mubr.f32.gmra.mrb[48].mxu1 %v6809_v12  ;;  %v1692_v45 = vpop.permute.xlu1 %1691 }
 0x3ac   :  { %1537 = vmatprep.mubr.f32.mxu1 %v6810_v1 }
 0x3af   :  { %1538 = vmatmul.mubr.f32.gmra.mrb[50].mxu1 %v6811_v26  ;;  %v1696_v8 = vpop.permute.xlu1 %1695 }
 0x3b0   :  { %1542 = vmatprep.mubr.f32.mxu1 %v6812_v10  ;;  %v8240_v10 = vpop.permute.xlu0 %1719 }
 0x3b3   :  { %1543 = vmatmul.mubr.f32.gmra.mrb[52].mxu1 %v6813_v11  ;;  %v1700_v55 = vpop.permute.xlu1 %1699 }
 0x3b4   :  { %1547 = vmatprep.mubr.f32.mxu1 %v6814_v3 }
 0x3b7   :  { %1548 = vmatmul.mubr.f32.gmra.mrb[54].mxu1 %v6815_v54  ;;  %v1704_v58 = vpop.permute.xlu1 %1703 }
 0x3b8   :  { %1552 = vmatprep.mubr.f32.mxu1 %v6816_v28 }
 0x3bb   :  { %1553 = vmatmul.mubr.f32.gmra.mrb[56].mxu1 %v6817_v23  ;;  %v8245_v23 = vpop.permute.xlu0 %1723 }
 0x3bc   :  { %1557 = vmatprep.mubr.f32.mxu1 %v6818_v9  ;;  %v1686_v47 = vpop.permute.xlu1 %1685 }
 0x3bf   :  { %1558 = vmatmul.mubr.f32.gmra.mrb[58].mxu1 %v6819_v19 }
 0x3c0   :  { %1562 = vmatprep.mubr.f32.mxu1 %v6820_v24  ;;  %v1690_v63 = vpop.permute.xlu1 %1689 }
 0x3c3   :  { %1563 = vmatmul.mubr.f32.gmra.mrb[60].mxu1 %v6821_v6  ;;  %v1698_v6 = vpop.permute.xlu0 %1697 }
 0x3c4   :  { %1567 = vmatprep.mubr.f32.mxu1 %v6822_v7  ;;  %v1694_v11 = vpop.permute.xlu1 %1693 }
 0x3c7   :  { %1568 = vmatmul.mubr.f32.gmra.mrb[62].mxu1 %v6823_v33 }
 0x3c8   :  { %1572 = vmatprep.mubr.f32.mxu1 %v6824_v46 }
 0x3cb   :  { %1573 = vmatmul.mubr.f32.gmra.mrb[64].mxu1 %v6825_v42 }
 0x3cc   :  { %1577 = vmatprep.mubr.f32.mxu1 %v6826_v4 }
 0x3cf   :  { %1578 = vmatmul.mubr.f32.gmra.mrb[66].mxu1 %v6827_v13 }
 0x3d0   :  { %1582 = vmatprep.mubr.f32.mxu1 %v6828_v37  ;;  %v1702_v37 = vpop.permute.xlu0 %1701 }
 0x3d3   :  { %1583 = vmatmul.mubr.f32.gmra.mrb[68].mxu1 %v6829_v32 }
 0x3d4   :  { %1587 = vmatprep.mubr.f32.mxu1 %v6830_v53 }
 0x3d7   :  { %1588 = vmatmul.mubr.f32.gmra.mrb[70].mxu1 %v6831_v34 }
 0x3d8   :  { %1592 = vmatprep.mubr.f32.mxu1 %v6832_v2 }
 0x3db   :  { %1593 = vmatmul.mubr.f32.gmra.mrb[72].mxu1 %v6833_v17 }
 0x3dc   :  { %1597 = vmatprep.mubr.f32.mxu1 %v6834_v44 }
 0x3df   :  { %1598 = vmatmul.mubr.f32.gmra.mrb[74].mxu1 %v6835_v40  ;;  %v1706_v40 = vpop.permute.xlu0 %1705 }
 0x3e0   :  { %1602 = vmatprep.mubr.f32.mxu1 %v6836_v60 }
 0x3e3   :  { %1603 = vmatmul.mubr.f32.gmra.mrb[76].mxu1 %v6837_v39 }
 0x3e4   :  { %1607 = vmatprep.mubr.f32.mxu1 %v6838_v35 }
 0x3e7   :  { %1608 = vmatmul.mubr.f32.gmra.mrb[78].mxu1 %v6839_v18  ;;  %v1708_v18 = vpop.permute.xlu1 %1707 }
 0x3e8   :  { %1612 = vmatprep.mubr.f32.mxu1 %v6840_v0 }
 0x3eb   :  { %1613 = vmatmul.mubr.f32.gmra.mrb[80].mxu1 %v6841_v62 }
 0x3ec   :  { %1617 = vmatprep.mubr.f32.mxu1 %v6842_v22 }
 0x3ef   :  { %1618 = vmatmul.mubr.f32.gmra.mrb[82].mxu1 %v6843_v15  ;;  %v1710_v15 = vpop.permute.xlu0 %1709 }
 0x3f0   :  { %1622 = vmatprep.mubr.f32.mxu1 %v6844_v14 }
 0x3f3   :  { %1623 = vmatmul.mubr.f32.gmra.mrb[84].mxu1 %v6845_v36 }
 0x3f4   :  { %1627 = vmatprep.mubr.f32.mxu1 %v6846_v49 }
 0x3f7   :  { %1628 = vmatmul.mubr.f32.gmra.mrb[86].mxu1 %v6847_v52  ;;  %v1712_v52 = vpop.permute.xlu1 %1711 }
 0x3f8   :  { %1632 = vmatprep.mubr.f32.mxu1 %v6848_v29 }
 0x3fb   :  { %1633 = vmatmul.mubr.f32.gmra.mrb[88].mxu1 %v6849_v5 }
 0x3fc   :  { %1637 = vmatprep.mubr.f32.mxu1 %v6850_v21 }
 0x3ff   :  { %1638 = vmatmul.mubr.f32.gmra.mrb[90].mxu1 %v6851_v25  ;;  %v1714_v25 = vpop.permute.xlu0 %1713 }
 0x400   :  { %1642 = vmatprep.mubr.f32.mxu1 %v6852_v48 }
 0x403   :  { %1643 = vmatmul.mubr.f32.gmra.mrb[92].mxu1 %v6853_v43 }
 0x404   :  { %1647 = vmatprep.mubr.f32.mxu1 %v6854_v27 }
 0x407   :  { %1648 = vmatmul.mubr.f32.gmra.mrb[94].mxu1 %v6855_v20 }
 0x45e   :  { %v1494_v41 = vpop.f32.mrb[32].mxu1 }
 0x45f   :  { %v1781_v16 = vsel %vm526_vm0, %v1494_v41, %v1686_v47  ;;  %v1496_v50 = vpop.f32.mrb[33].mxu1  ;;  %v1728_v41 = vpop.permute.xlu1 %1727 }
 0x460   :  { %5730 = vmatprep.mubr.msk.f32.mxu0 %vm559_vm1, %v1781_v16 }
 0x462   :  { %v1499_v59 = vpop.f32.mrb[34].mxu1 }
 0x463   :  { %v1782_v38 = vsel %vm526_vm0, %v1499_v59, %v1688_v56  ;;  %v1501_v61 = vpop.f32.mrb[35].mxu1 }
 0x464   :  { %5731 = vmatmul.mubr.msk.f32.vlgmr.msra.gmra.mrb[64].mxu0 %vm559_vm1, %v1782_v38 }
 0x466   :  { %v1504_v51 = vpop.f32.mrb[36].mxu1 }
 0x467   :  { %v1783_v57 = vsel %vm526_vm0, %v1504_v51, %v1690_v63  ;;  %v1506_v30 = vpop.f32.mrb[37].mxu1  ;;  %v1732_v51 = vpop.permute.xlu1 %1731 }
 0x468   :  { %5733 = vmatprep.mubr.msk.f32.mxu0 %vm559_vm1, %v1783_v57 }
 0x46a   :  { %v1509_v12 = vpop.f32.mrb[38].mxu1 }
 0x46b   :  { %v1784_v1 = vsel %vm526_vm0, %v1509_v12, %v1692_v45  ;;  %v1511_v26 = vpop.f32.mrb[39].mxu1 }
 0x46c   :  { %5734 = vmatmul.mubr.msk.f32.gmra.mrb[66].mxu0 %vm559_vm1, %v1784_v1  ;;  %v1726_v1 = vpop.permute.xlu1 %1725 }
 0x46e   :  { %v1514_v3 = vpop.f32.mrb[40].mxu1 }
 0x46f   :  { %v1785_v54 = vsel %vm526_vm0, %v1514_v3, %v1694_v11  ;;  %v1516_v28 = vpop.f32.mrb[41].mxu1 }
 0x470   :  { %5736 = vmatprep.mubr.msk.f32.mxu0 %vm559_vm1, %v1785_v54 }
 0x472   :  { %v1519_v9 = vpop.f32.mrb[42].mxu1 }
 0x473   :  { %v1786_v19 = vsel %vm526_vm0, %v1519_v9, %v1696_v8  ;;  %v1521_v24 = vpop.f32.mrb[43].mxu1  ;;  %v1718_v8 = vpop.permute.xlu0 %1717 }
 0x474   :  { %5737 = vmatmul.mubr.msk.f32.gmra.mrb[68].mxu0 %vm559_vm1, %v1786_v19  ;;  %v1730_v9 = vpop.permute.xlu1 %1729 }
 0x476   :  { %v1524_v7 = vpop.f32.mrb[44].mxu1 }
 0x477   :  { %v1787_v33 = vsel %vm526_vm0, %v1524_v7, %v1698_v6  ;;  %v1526_v46 = vpop.f32.mrb[45].mxu1  ;;  %v1722_v38 = vpop.permute.xlu0 %1721 }
 0x478   :  { %5739 = vmatprep.mubr.msk.f32.mxu0 %vm559_vm1, %v1787_v33  ;;  %v1734_v46 = vpop.permute.xlu1 %1733 }
 0x47a   :  { %v1529_v42 = vpop.f32.mrb[46].mxu1 }
 0x47b   :  { %v1788_v4 = vsel %vm526_vm0, %v1529_v42, %v1700_v55  ;;  %v1531_v13 = vpop.f32.mrb[47].mxu1 }
 0x47c   :  { %5740 = vmatmul.mubr.msk.f32.gmra.mrb[70].mxu0 %vm559_vm1, %v1788_v4 }
 0x47e   :  { %v1534_v32 = vpop.f32.mrb[48].mxu1 }
 0x47f   :  { %v1789_v53 = vsel %vm526_vm0, %v1534_v32, %v1702_v37  ;;  %v1536_v34 = vpop.f32.mrb[49].mxu1  ;;  %v1736_v37 = vpop.permute.xlu1 %1735 }
 0x480   :  { %5742 = vmatprep.mubr.msk.f32.mxu0 %vm559_vm1, %v1789_v53 }
 0x482   :  { %v1539_v2 = vpop.f32.mrb[50].mxu1 }
 0x483   :  { %v1790_v17 = vsel %vm526_vm0, %v1539_v2, %v1704_v58  ;;  %v1541_v44 = vpop.f32.mrb[51].mxu1  ;;  %v1738_v2 = vpop.permute.xlu0 %1737 }
 0x484   :  { %5743 = vmatmul.mubr.msk.f32.gmra.mrb[72].mxu0 %vm559_vm1, %v1790_v17 }
 0x486   :  { %v1544_v60 = vpop.f32.mrb[52].mxu1 }
 0x487   :  { %v1791_v39 = vsel %vm526_vm0, %v1544_v60, %v1706_v40  ;;  %v1546_v35 = vpop.f32.mrb[53].mxu1  ;;  %v1740_v60 = vpop.permute.xlu1 %1739 }
 0x488   :  { %5745 = vmatprep.mubr.msk.f32.mxu0 %vm559_vm1, %v1791_v39 }
 0x48a   :  { %v1549_v0 = vpop.f32.mrb[54].mxu1 }
 0x48b   :  { %v1792_v62 = vsel %vm526_vm0, %v1549_v0, %v1708_v18  ;;  %v1551_v22 = vpop.f32.mrb[55].mxu1  ;;  %v1742_v0 = vpop.permute.xlu0 %1741 }
 0x48c   :  { %5746 = vmatmul.mubr.msk.f32.gmra.mrb[74].mxu0 %vm559_vm1, %v1792_v62 }
 0x48e   :  { %v1554_v14 = vpop.f32.mrb[56].mxu1 }
 0x48f   :  { %v1793_v36 = vsel %vm526_vm0, %v1554_v14, %v1710_v15  ;;  %v1556_v49 = vpop.f32.mrb[57].mxu1  ;;  %v1744_v14 = vpop.permute.xlu1 %1743 }
 0x490   :  { %5748 = vmatprep.mubr.msk.f32.mxu0 %vm559_vm1, %v1793_v36 }
 0x492   :  { %v1559_v29 = vpop.f32.mrb[58].mxu1 }
 0x493   :  { %v1794_v5 = vsel %vm526_vm0, %v1559_v29, %v1712_v52  ;;  %v1561_v21 = vpop.f32.mrb[59].mxu1  ;;  %v1746_v29 = vpop.permute.xlu0 %1745 }
 0x494   :  { %5749 = vmatmul.mubr.msk.f32.gmra.mrb[76].mxu0 %vm559_vm1, %v1794_v5 }
 0x496   :  { %v1564_v48 = vpop.f32.mrb[60].mxu1 }
 0x497   :  { %v1795_v43 = vsel %vm526_vm0, %v1564_v48, %v1714_v25  ;;  %v1566_v27 = vpop.f32.mrb[61].mxu1  ;;  %v1748_v48 = vpop.permute.xlu1 %1747 }
 0x498   :  { %5751 = vmatprep.mubr.msk.f32.mxu0 %vm559_vm1, %v1795_v43 }
 0x49a   :  { %v1569_v20 = vpop.f32.mrb[62].mxu1 }
 0x49b   :  { %v1796_v56 = vsel %vm526_vm0, %v1569_v20, %v8235_v31  ;;  %v1571_v45 = vpop.f32.mrb[63].mxu1 }
 0x49c   :  { %5752 = vmatmul.mubr.msk.f32.gmra.mrb[78].mxu0 %vm559_vm1, %v1796_v56 }
 0x49e   :  { %v1574_v55 = vpop.f32.mrb[64].mxu1 }
 0x49f   :  { %v1797_v58 = vsel %vm526_vm0, %v1574_v55, %v1718_v8  ;;  %v1576_v47 = vpop.f32.mrb[65].mxu1 }
 0x4a0   :  { %5754 = vmatprep.mubr.msk.f32.mxu0 %vm559_vm1, %v1797_v58 }
 0x4a2   :  { %v1579_v16 = vpop.f32.mrb[66].mxu1 }
 0x4a3   :  { %v1798_v50 = vsel %vm526_vm0, %v1579_v16, %v8240_v10  ;;  %v1581_v59 = vpop.f32.mrb[67].mxu1 }
 0x4a4   :  { %5755 = vmatmul.mubr.msk.f32.gmra.mrb[80].mxu0 %vm559_vm1, %v1798_v50 }
 0x4a6   :  { %v1584_v61 = vpop.f32.mrb[68].mxu1 }
 0x4a7   :  { %v1799_v31 = vsel %vm526_vm0, %v1584_v61, %v1722_v38  ;;  %v1586_v63 = vpop.f32.mrb[69].mxu1 }
 0x4a8   :  { %5757 = vmatprep.mubr.msk.f32.mxu0 %vm559_vm1, %v1799_v31 }
 0x4aa   :  { %v1589_v57 = vpop.f32.mrb[70].mxu1 }
 0x4ab   :  { %v1800_v30 = vsel %vm526_vm0, %v1589_v57, %v8245_v23  ;;  %v1591_v12 = vpop.f32.mrb[71].mxu1 }
 0x4ac   :  { %5758 = vmatmul.mubr.msk.f32.gmra.mrb[82].mxu0 %vm559_vm1, %v1800_v30 }
 0x4ae   :  { %v1594_v26 = vpop.f32.mrb[72].mxu1 }
 0x4af   :  { %v1801_v10 = vsel %vm526_vm0, %v1594_v26, %v1726_v1  ;;  %v1596_v11 = vpop.f32.mrb[73].mxu1 }
 0x4b0   :  { %5760 = vmatprep.mubr.msk.f32.mxu1 %vm559_vm1, %v1801_v10 }
 0x4b2   :  { %v1599_v3 = vpop.f32.mrb[74].mxu1 }
 0x4b3   :  { %v1802_v54 = vsel %vm526_vm0, %v1599_v3, %v1728_v41  ;;  %v1601_v28 = vpop.f32.mrb[75].mxu1 }
 0x4b4   :  { %5761 = vmatmul.mubr.msk.f32.vlgmr.msra.gmra.mrb[96].mxu1 %vm559_vm1, %v1802_v54 }
 0x4b6   :  { %v1604_v19 = vpop.f32.mrb[76].mxu1 }
 0x4b7   :  { %v1803_v23 = vsel %vm526_vm0, %v1604_v19, %v1730_v9  ;;  %v1606_v24 = vpop.f32.mrb[77].mxu1 }
 0x4b8   :  { %5763 = vmatprep.mubr.msk.f32.mxu1 %vm559_vm1, %v1803_v23 }
 0x4ba   :  { %v1609_v6 = vpop.f32.mrb[78].mxu1 }
 0x4bb   :  { %v1804_v7 = vsel %vm526_vm0, %v1609_v6, %v1732_v51  ;;  %v1611_v33 = vpop.f32.mrb[79].mxu1 }
 0x4bc   :  { %5764 = vmatmul.mubr.msk.f32.gmra.mrb[98].mxu1 %vm559_vm1, %v1804_v7 }
 0x4be   :  { %v1614_v42 = vpop.f32.mrb[80].mxu1 }
 0x4bf   :  { %v1805_v4 = vsel %vm526_vm0, %v1614_v42, %v1734_v46  ;;  %v1616_v13 = vpop.f32.mrb[81].mxu1 }
 0x4c0   :  { %5766 = vmatprep.mubr.msk.f32.mxu1 %vm559_vm1, %v1805_v4 }
 0x4c2   :  { %v1619_v32 = vpop.f32.mrb[82].mxu1 }
 0x4c3   :  { %v1806_v53 = vsel %vm526_vm0, %v1619_v32, %v1736_v37  ;;  %v1621_v34 = vpop.f32.mrb[83].mxu1 }
 0x4c4   :  { %5767 = vmatmul.mubr.msk.f32.gmra.mrb[100].mxu1 %vm559_vm1, %v1806_v53 }
 0x4c6   :  { %v1624_v17 = vpop.f32.mrb[84].mxu1 }
 0x4c7   :  { %v1807_v44 = vsel %vm526_vm0, %v1624_v17, %v1738_v2  ;;  %v1626_v40 = vpop.f32.mrb[85].mxu1 }
 0x4c8   :  { %5769 = vmatprep.mubr.msk.f32.mxu1 %vm559_vm1, %v1807_v44 }
 0x4ca   :  { %v1629_v39 = vpop.f32.mrb[86].mxu1 }
 0x4cb   :  { %v1808_v35 = vsel %vm526_vm0, %v1629_v39, %v1740_v60  ;;  %v1631_v18 = vpop.f32.mrb[87].mxu1 }
 0x4cc   :  { %5770 = vmatmul.mubr.msk.f32.gmra.mrb[102].mxu1 %vm559_vm1, %v1808_v35 }
 0x4ce   :  { %v1634_v62 = vpop.f32.mrb[88].mxu1 }
 0x4cf   :  { %v1809_v22 = vsel %vm526_vm0, %v1634_v62, %v1742_v0  ;;  %v1636_v15 = vpop.f32.mrb[89].mxu1 }
 0x4d0   :  { %5772 = vmatprep.mubr.msk.f32.mxu1 %vm559_vm1, %v1809_v22 }
 0x4d2   :  { %v1639_v36 = vpop.f32.mrb[90].mxu1 }
 0x4d3   :  { %v1810_v49 = vsel %vm526_vm0, %v1639_v36, %v1744_v14  ;;  %v1641_v52 = vpop.f32.mrb[91].mxu1 }
 0x4d4   :  { %5773 = vmatmul.mubr.msk.f32.gmra.mrb[104].mxu1 %vm559_vm1, %v1810_v49 }
 0x4d6   :  { %v1644_v5 = vpop.f32.mrb[92].mxu1 }
 0x4d7   :  { %v1811_v21 = vsel %vm526_vm0, %v1644_v5, %v1746_v29  ;;  %v1646_v25 = vpop.f32.mrb[93].mxu1 }
 0x4d8   :  { %5775 = vmatprep.mubr.msk.f32.mxu1 %vm559_vm1, %v1811_v21 }
 0x4da   :  { %v1649_v43 = vpop.f32.mrb[94].mxu1 }
 0x4db   :  { %v1812_v27 = vsel %vm526_vm0, %v1649_v43, %v1748_v48  ;;  %v1651_v20 = vpop.f32.mrb[95].mxu1 }
 0x4dc   :  { %5776 = vmatmul.mubr.msk.f32.gmra.mrb[106].mxu1 %vm559_vm1, %v1812_v27 }
 0x537   :  { %v5732_v56 = vpop.f32.mrb[64].mxu0 }
 0x538   :  { %v8304_v45 = vmax.f32 %v5732_v56, 0.0  ;;  %v1975_v8 = vpop.f32.mrb[65].mxu0 }
 0x539   :  { %v8306_v55 = vmax.f32 %v1975_v8, 0.0 }
 0x53a   :  { %10699 = vst [vmem:[#allocation35_spill] sm:$0xff] %v8304_v45  ;;  %v2175_v58 = vsel %vm526_vm0, %v8304_v45, 0.0  ;;  %v2333_v47 = vmul.f32 %v8304_v45, %v8304_v45 }
 0x53b   :  { %10700 = vst [vmem:[#allocation34_spill] sm:$0xff] %v8306_v55  ;;  %2176 = vadd.xlane.f32.xlu0 %v2175_v58  ;;  %v2172_v16 = vsel %vm526_vm0, %v8306_v55, 0.0  ;;  %v2332_v50 = vmul.f32 %v8306_v55, %v8306_v55 }
 0x53c   :  { %v2367_v41 = vsel %vm526_vm0, %v2333_v47, 0.0 }
 0x53d   :  { %2368 = vadd.xlane.f32.xlu1 %v2367_v41  ;;  %v2364_v63 = vsel %vm526_vm0, %v2332_v50, 0.0 }
 0x53f   :  { %2173 = vadd.xlane.f32.xlu0 %v2172_v16  ;;  %v5735_v59 = vpop.f32.mrb[66].mxu0 }
 0x540   :  { %v1985_v38 = vpop.f32.mrb[67].mxu0  ;;  %v8319_v31 = vmax.f32 %v5735_v59, 0.0 }
 0x541   :  { %v8317_v61 = vmax.f32 %v1985_v38, 0.0 }
 0x542   :  { %10702 = vst [vmem:[#allocation20_spill] sm:$0xff] %v8319_v31  ;;  %v2181_v30 = vsel %vm526_vm0, %v8319_v31, 0.0  ;;  %v2335_v12 = vmul.f32 %v8319_v31, %v8319_v31 }
 0x543   :  { %10701 = vst [vmem:[#allocation36_spill] sm:$0xff] %v8317_v61  ;;  %2365 = vadd.xlane.f32.xlu0 %v2364_v63  ;;  %v2178_v51 = vsel %vm526_vm0, %v8317_v61, 0.0  ;;  %v2334_v57 = vmul.f32 %v8317_v61, %v8317_v61 }
 0x544   :  { %2179 = vadd.xlane.f32.xlu1 %v2178_v51  ;;  %v2373_v54 = vsel %vm526_vm0, %v2335_v12, 0.0 }
 0x545   :  { %v2370_v26 = vsel %vm526_vm0, %v2334_v57, 0.0 }
 0x547   :  { %2182 = vadd.xlane.f32.xlu0 %v2181_v30  ;;  %v5738_v1 = vpop.f32.mrb[68].mxu0 }
 0x548   :  { %2371 = vadd.xlane.f32.xlu1 %v2370_v26  ;;  %v1995_v10 = vpop.f32.mrb[69].mxu0  ;;  %v8333_v3 = vmax.f32 %v5738_v1, 0.0 }
 0x549   :  { %v8331_v11 = vmax.f32 %v1995_v10, 0.0 }
 0x54a   :  { %10704 = vst [vmem:[#allocation22_spill] sm:$0xff] %v8333_v3  ;;  %v2187_v9 = vsel %vm526_vm0, %v8333_v3, 0.0  ;;  %v2337_v19 = vmul.f32 %v8333_v3, %v8333_v3 }
 0x54b   :  { %10703 = vst [vmem:[#allocation5_spill] sm:$0xff] %v8331_v11  ;;  %2374 = vadd.xlane.f32.xlu0 %v2373_v54  ;;  %v2184_v28 = vsel %vm526_vm0, %v8331_v11, 0.0  ;;  %v2336_v42 = vmul.f32 %v8331_v11, %v8331_v11 }
 0x54c   :  { %2185 = vadd.xlane.f32.xlu1 %v2184_v28  ;;  %v2379_v33 = vsel %vm526_vm0, %v2337_v19, 0.0 }
 0x54d   :  { %v2376_v4 = vsel %vm526_vm0, %v2336_v42, 0.0 }
 0x54f   :  { %2188 = vadd.xlane.f32.xlu0 %v2187_v9  ;;  %v5741_v23 = vpop.f32.mrb[70].mxu0 }
 0x550   :  { %v8342_v24 = vmax.f32 %v5741_v23, 0.0  ;;  %v2005_v6 = vpop.f32.mrb[71].mxu0 }
 0x551   :  { %v8344_v7 = vmax.f32 %v2005_v6, 0.0 }
 0x552   :  { %10705 = vst [vmem:[#allocation7_spill] sm:$0xff] %v8342_v24  ;;  %v2193_v46 = vsel %vm526_vm0, %v8342_v24, 0.0  ;;  %v2339_v37 = vmul.f32 %v8342_v24, %v8342_v24 }
 0x553   :  { %10706 = vst [vmem:[#allocation24_spill] sm:$0xff] %v8344_v7  ;;  %2380 = vadd.xlane.f32.xlu0 %v2379_v33  ;;  %2194 = vadd.xlane.f32.xlu1 %v2193_v46  ;;  %v2190_v13 = vsel %vm526_vm0, %v8344_v7, 0.0  ;;  %v2338_v40 = vmul.f32 %v8344_v7, %v8344_v7 }
 0x554   :  { %v2385_v17 = vsel %vm526_vm0, %v2339_v37, 0.0 }
 0x555   :  { %v2382_v60 = vsel %vm526_vm0, %v2338_v40, 0.0 }
 0x557   :  { %2377 = vadd.xlane.f32.xlu0 %v2376_v4  ;;  %2191 = vadd.xlane.f32.xlu1 %v2190_v13  ;;  %v5744_v32 = vpop.f32.mrb[72].mxu0 }
 0x558   :  { %v8356_v53 = vmax.f32 %v5744_v32, 0.0  ;;  %v2015_v34 = vpop.f32.mrb[73].mxu0 }
 0x559   :  { %v8358_v2 = vmax.f32 %v2015_v34, 0.0 }
 0x55a   :  { %10707 = vst [vmem:[#allocation10_spill] sm:$0xff] %v8356_v53  ;;  %v2199_v44 = vsel %vm526_vm0, %v8356_v53, 0.0  ;;  %v2341_v35 = vmul.f32 %v8356_v53, %v8356_v53 }
 0x55b   :  { %10708 = vst [vmem:[#allocation12_spill] sm:$0xff] %v8358_v2  ;;  %2386 = vadd.xlane.f32.xlu0 %v2385_v17  ;;  %2200 = vadd.xlane.f32.xlu1 %v2199_v44  ;;  %v2196_v39 = vsel %vm526_vm0, %v8358_v2, 0.0  ;;  %v2340_v36 = vmul.f32 %v8358_v2, %v8358_v2 }
 0x55c   :  { %v2391_v15 = vsel %vm526_vm0, %v2341_v35, 0.0 }
 0x55d   :  { %v2388_v49 = vsel %vm526_vm0, %v2340_v36, 0.0 }
 0x55f   :  { %2383 = vadd.xlane.f32.xlu0 %v2382_v60  ;;  %2197 = vadd.xlane.f32.xlu1 %v2196_v39  ;;  %v5747_v18 = vpop.f32.mrb[74].mxu0 }
 0x560   :  { %v8370_v0 = vmax.f32 %v5747_v18, 0.0  ;;  %v2025_v62 = vpop.f32.mrb[75].mxu0 }
 0x561   :  { %v8372_v22 = vmax.f32 %v2025_v62, 0.0 }
 0x562   :  { %10709 = vst [vmem:[#allocation14_spill] sm:$0xff] %v8370_v0  ;;  %v2205_v14 = vsel %vm526_vm0, %v8370_v0, 0.0  ;;  %v2343_v29 = vmul.f32 %v8370_v0, %v8370_v0 }
 0x563   :  { %10710 = vst [vmem:[#allocation11_spill] sm:$0xff] %v8372_v22  ;;  %2392 = vadd.xlane.f32.xlu0 %v2391_v15  ;;  %2206 = vadd.xlane.f32.xlu1 %v2205_v14  ;;  %v2202_v52 = vsel %vm526_vm0, %v8372_v22, 0.0  ;;  %v2342_v20 = vmul.f32 %v8372_v22, %v8372_v22 }
 0x564   :  { %v2397_v43 = vsel %vm526_vm0, %v2343_v29, 0.0 }
 0x565   :  { %v2394_v56 = vsel %vm526_vm0, %v2342_v20, 0.0 }
 0x567   :  { %2389 = vadd.xlane.f32.xlu0 %v2388_v49  ;;  %2203 = vadd.xlane.f32.xlu1 %v2202_v52  ;;  %v5750_v5 = vpop.f32.mrb[76].mxu0 }
 0x568   :  { %v8384_v21 = vmax.f32 %v5750_v5, 0.0  ;;  %v2035_v25 = vpop.f32.mrb[77].mxu0 }
 0x569   :  { %v8386_v48 = vmax.f32 %v2035_v25, 0.0 }
 0x56a   :  { %10711 = vst [vmem:[#allocation6_spill] sm:$0xff] %v8384_v21  ;;  %v2211_v27 = vsel %vm526_vm0, %v8384_v21, 0.0  ;;  %v2345_v58 = vmul.f32 %v8384_v21, %v8384_v21 }
 0x56b   :  { %10712 = vst [vmem:[#allocation13_spill] sm:$0xff] %v8386_v48  ;;  %2398 = vadd.xlane.f32.xlu0 %v2397_v43  ;;  %2212 = vadd.xlane.f32.xlu1 %v2211_v27  ;;  %v2208_v8 = vsel %vm526_vm0, %v8386_v48, 0.0  ;;  %v2344_v63 = vmul.f32 %v8386_v48, %v8386_v48 }
 0x56c   :  { %v2403_v59 = vsel %vm526_vm0, %v2345_v58, 0.0 }
 0x56d   :  { %v2400_v51 = vsel %vm526_vm0, %v2344_v63, 0.0 }
 0x56f   :  { %2395 = vadd.xlane.f32.xlu0 %v2394_v56  ;;  %2209 = vadd.xlane.f32.xlu1 %v2208_v8  ;;  %v5753_v47 = vpop.f32.mrb[78].mxu0 }
 0x570   :  { %v8398_v41 = vmax.f32 %v5753_v47, 0.0  ;;  %v2045_v16 = vpop.f32.mrb[79].mxu0 }
 0x571   :  { %v8400_v50 = vmax.f32 %v2045_v16, 0.0 }
 0x572   :  { %10713 = vst [vmem:[#allocation8_spill] sm:$0xff] %v8398_v41  ;;  %v2217_v38 = vsel %vm526_vm0, %v8398_v41, 0.0  ;;  %v2347_v30 = vmul.f32 %v8398_v41, %v8398_v41 }
 0x573   :  { %10714 = vst [vmem:[#allocation9_spill] sm:$0xff] %v8400_v50  ;;  %2404 = vadd.xlane.f32.xlu0 %v2403_v59  ;;  %2218 = vadd.xlane.f32.xlu1 %v2217_v38  ;;  %v2214_v57 = vsel %vm526_vm0, %v8400_v50, 0.0  ;;  %v2346_v9 = vmul.f32 %v8400_v50, %v8400_v50 }
 0x574   :  { %v2409_v54 = vsel %vm526_vm0, %v2347_v30, 0.0 }
 0x575   :  { %v2406_v19 = vsel %vm526_vm0, %v2346_v9, 0.0 }
 0x577   :  { %2401 = vadd.xlane.f32.xlu0 %v2400_v51  ;;  %2215 = vadd.xlane.f32.xlu1 %v2214_v57  ;;  %v5756_v12 = vpop.f32.mrb[80].mxu0 }
 0x578   :  { %v8412_v1 = vmax.f32 %v5756_v12, 0.0  ;;  %v2055_v26 = vpop.f32.mrb[81].mxu0 }
 0x579   :  { %v8414_v10 = vmax.f32 %v2055_v26, 0.0 }
 0x57a   :  { %v2223_v28 = vsel %vm526_vm0, %v8412_v1, 0.0  ;;  %v2349_v6 = vmul.f32 %v8412_v1, %v8412_v1 }
 0x57b   :  { %10715 = vst [vmem:[#allocation15_spill] sm:$0xff] %v8414_v10  ;;  %2410 = vadd.xlane.f32.xlu0 %v2409_v54  ;;  %2224 = vadd.xlane.f32.xlu1 %v2223_v28  ;;  %v2220_v23 = vsel %vm526_vm0, %v8414_v10, 0.0  ;;  %v2348_v32 = vmul.f32 %v8414_v10, %v8414_v10  ;;  %v151_v10 = vld [vmem:[%s10573_s2 + $0x110] sm:$0xff] }
 0x57c   :  { %v2415_v13 = vsel %vm526_vm0, %v2349_v6, 0.0 }
 0x57d   :  { %v2412_v34 = vsel %vm526_vm0, %v2348_v32, 0.0 }
 0x57f   :  { %2407 = vadd.xlane.f32.xlu0 %v2406_v19  ;;  %2221 = vadd.xlane.f32.xlu1 %v2220_v23  ;;  %v5759_v33 = vpop.f32.mrb[82].mxu0 }
 0x580   :  { %v8426_v46 = vmax.f32 %v5759_v33, 0.0  ;;  %v2065_v42 = vpop.f32.mrb[83].mxu0 }
 0x581   :  { %v8428_v4 = vmax.f32 %v2065_v42, 0.0 }
 0x582   :  { %v2229_v37 = vsel %vm526_vm0, %v8426_v46, 0.0  ;;  %v2351_v44 = vmul.f32 %v8426_v46, %v8426_v46 }
 0x583   :  { %10716 = vst [vmem:[#allocation33_spill] sm:$0xff] %v8428_v4  ;;  %2416 = vadd.xlane.f32.xlu0 %v2415_v13  ;;  %2230 = vadd.xlane.f32.xlu1 %v2229_v37  ;;  %v2226_v17 = vsel %vm526_vm0, %v8428_v4, 0.0  ;;  %v2350_v15 = vmul.f32 %v8428_v4, %v8428_v4  ;;  %v149_v4 = vld [vmem:[%s10573_s2 + $0x100] sm:$0xff] }
 0x584   :  { %v2421_v18 = vsel %vm526_vm0, %v2351_v44, 0.0 }
 0x585   :  { %v2418_v14 = vsel %vm526_vm0, %v2350_v15, 0.0 }
 0x587   :  { %v5762_v40 = vpop.f32.mrb[96].mxu1  ;;  %2413 = vadd.xlane.f32.xlu0 %v2412_v34  ;;  %2227 = vadd.xlane.f32.xlu1 %v2226_v17 }
 0x588   :  { %v8440_v60 = vmax.f32 %v5762_v40, 0.0  ;;  %v2075_v39 = vpop.f32.mrb[97].mxu1 }
 0x589   :  { %v8442_v35 = vmax.f32 %v2075_v39, 0.0 }
 0x58a   :  { %v2235_v62 = vsel %vm526_vm0, %v8440_v60, 0.0  ;;  %v2353_v49 = vmul.f32 %v8440_v60, %v8440_v60 }
 0x58b   :  { %10717 = vst [vmem:[#allocation17_spill] sm:$0xff] %v8442_v35  ;;  %2422 = vadd.xlane.f32.xlu0 %v2421_v18  ;;  %2236 = vadd.xlane.f32.xlu1 %v2235_v62  ;;  %v2232_v36 = vsel %vm526_vm0, %v8442_v35, 0.0  ;;  %v2352_v20 = vmul.f32 %v8442_v35, %v8442_v35 }
 0x58c   :  { %v2427_v43 = vsel %vm526_vm0, %v2353_v49, 0.0 }
 0x58d   :  { %v2424_v56 = vsel %vm526_vm0, %v2352_v20, 0.0 }
 0x58f   :  { %v5765_v52 = vpop.f32.mrb[98].mxu1  ;;  %2419 = vadd.xlane.f32.xlu0 %v2418_v14  ;;  %2233 = vadd.xlane.f32.xlu1 %v2232_v36 }
 0x590   :  { %v8454_v29 = vmax.f32 %v5765_v52, 0.0  ;;  %v2085_v5 = vpop.f32.mrb[99].mxu1 }
 0x591   :  { %v8456_v25 = vmax.f32 %v2085_v5, 0.0 }
 0x592   :  { %v2241_v27 = vsel %vm526_vm0, %v8454_v29, 0.0  ;;  %v2355_v58 = vmul.f32 %v8454_v29, %v8454_v29 }
 0x593   :  { %10718 = vst [vmem:[#allocation16_spill] sm:$0xff] %v8456_v25  ;;  %2428 = vadd.xlane.f32.xlu0 %v2427_v43  ;;  %2242 = vadd.xlane.f32.xlu1 %v2241_v27  ;;  %v2238_v8 = vsel %vm526_vm0, %v8456_v25, 0.0  ;;  %v2354_v57 = vmul.f32 %v8456_v25, %v8456_v25 }
 0x594   :  { %v2433_v63 = vsel %vm526_vm0, %v2355_v58, 0.0 }
 0x595   :  { %v2430_v30 = vsel %vm526_vm0, %v2354_v57, 0.0 }
 0x597   :  { %v5768_v47 = vpop.f32.mrb[100].mxu1  ;;  %2425 = vadd.xlane.f32.xlu0 %v2424_v56  ;;  %2239 = vadd.xlane.f32.xlu1 %v2238_v8 }
 0x598   :  { %v8468_v16 = vmax.f32 %v5768_v47, 0.0  ;;  %v2095_v59 = vpop.f32.mrb[101].mxu1 }
 0x599   :  { %v8470_v38 = vmax.f32 %v2095_v59, 0.0  ;;  %v5346_v59 = vld [vmem:[%s10574_s3 + $0x30] sm:$0xff] }
 0x59a   :  { %v2247_v51 = vsel %vm526_vm0, %v8468_v16, 0.0  ;;  %v2357_v26 = vmul.f32 %v8468_v16, %v8468_v16 }
 0x59b   :  { %10719 = vst [vmem:[#allocation19_spill] sm:$0xff] %v8470_v38  ;;  %2434 = vadd.xlane.f32.xlu0 %v2433_v63  ;;  %2248 = vadd.xlane.f32.xlu1 %v2247_v51  ;;  %v2244_v12 = vsel %vm526_vm0, %v8470_v38, 0.0  ;;  %v2356_v33 = vmul.f32 %v8470_v38, %v8470_v38  ;;  %v8530_v51 = vpop.permute.xlu1 %2598  ;;  %v152_v38 = vld [vmem:[%s10573_s2 + $0x118] sm:$0xff] }
 0x59c   :  { %v2439_v23 = vsel %vm526_vm0, %v2357_v26, 0.0  ;;  %10724 = vst [vmem:[#allocation28_spill] sm:$0xff] %v8530_v51  ;;  %v6182_v25 = vpack.c.bf16 %v152_v38, %v151_v10 }
 0x59d   :  { %v2436_v42 = vsel %vm526_vm0, %v2356_v33, 0.0 }
 0x59f   :  { %v5771_v54 = vpop.f32.mrb[102].mxu1  ;;  %2431 = vadd.xlane.f32.xlu0 %v2430_v30  ;;  %2245 = vadd.xlane.f32.xlu1 %v2244_v12  ;;  %v5345_v12 = vld [vmem:[%s10574_s3 + $0x28] sm:$0xff] }
 0x5a0   :  { %v8482_v28 = vmax.f32 %v5771_v54, 0.0  ;;  %v2105_v9 = vpop.f32.mrb[103].mxu1 }
 0x5a1   :  { %v8484_v19 = vmax.f32 %v2105_v9, 0.0 }
 0x5a2   :  { %v2253_v6 = vsel %vm526_vm0, %v8482_v28, 0.0  ;;  %v2359_v37 = vmul.f32 %v8482_v28, %v8482_v28 }
 0x5a3   :  { %10720 = vst [vmem:[#allocation18_spill] sm:$0xff] %v8484_v19  ;;  %2440 = vadd.xlane.f32.xlu0 %v2439_v23  ;;  %2254 = vadd.xlane.f32.xlu1 %v2253_v6  ;;  %v2250_v13 = vsel %vm526_vm0, %v8484_v19, 0.0  ;;  %v2358_v18 = vmul.f32 %v8484_v19, %v8484_v19  ;;  %v150_v19 = vld [vmem:[%s10573_s2 + $0x108] sm:$0xff] }
 0x5a4   :  { %v2445_v40 = vsel %vm526_vm0, %v2359_v37, 0.0 }
 0x5a5   :  { %v2442_v62 = vsel %vm526_vm0, %v2358_v18, 0.0 }
 0x5a7   :  { %v5774_v32 = vpop.f32.mrb[104].mxu1  ;;  %2437 = vadd.xlane.f32.xlu0 %v2436_v42  ;;  %2251 = vadd.xlane.f32.xlu1 %v2250_v13 }
 0x5a8   :  { %v8496_v34 = vmax.f32 %v5774_v32, 0.0  ;;  %v2115_v17 = vpop.f32.mrb[105].mxu1 }
 0x5a9   :  { %v8498_v44 = vmax.f32 %v2115_v17, 0.0 }
 0x5aa   :  { %v2259_v39 = vsel %vm526_vm0, %v8496_v34, 0.0  ;;  %v2361_v14 = vmul.f32 %v8496_v34, %v8496_v34 }
 0x5ab   :  { %10721 = vst [vmem:[#allocation21_spill] sm:$0xff] %v8498_v44  ;;  %2446 = vadd.xlane.f32.xlu0 %v2445_v40  ;;  %2260 = vadd.xlane.f32.xlu1 %v2259_v39  ;;  %v2256_v15 = vsel %vm526_vm0, %v8498_v44, 0.0  ;;  %v2360_v20 = vmul.f32 %v8498_v44, %v8498_v44 }
 0x5ac   :  { %v2451_v43 = vsel %vm526_vm0, %v2361_v14, 0.0 }
 0x5ad   :  { %v2448_v56 = vsel %vm526_vm0, %v2360_v20, 0.0 }
 0x5af   :  { %v5777_v36 = vpop.f32.mrb[106].mxu1  ;;  %2443 = vadd.xlane.f32.xlu0 %v2442_v62  ;;  %2257 = vadd.xlane.f32.xlu1 %v2256_v15 }
 0x5b0   :  { %v8510_v49 = vmax.f32 %v5777_v36, 0.0  ;;  %v2125_v52 = vpop.f32.mrb[107].mxu1 }
 0x5b1   :  { %v8512_v5 = vmax.f32 %v2125_v52, 0.0 }
 0x5b2   :  { %10722 = vst [vmem:[#allocation26_spill] sm:$0xff] %v8510_v49  ;;  %v2265_v27 = vsel %vm526_vm0, %v8510_v49, 0.0  ;;  %v2363_v58 = vmul.f32 %v8510_v49, %v8510_v49 }
 0x5b3   :  { %10723 = vst [vmem:[#allocation23_spill] sm:$0xff] %v8512_v5  ;;  %2452 = vadd.xlane.f32.xlu0 %v2451_v43  ;;  %2266 = vadd.xlane.f32.xlu1 %v2265_v27  ;;  %v2262_v8 = vsel %vm526_vm0, %v8512_v5, 0.0  ;;  %v2362_v40 = vmul.f32 %v8512_v5, %v8512_v5 }
 0x5b4   :  { %v2457_v47 = vsel %vm526_vm0, %v2363_v58, 0.0 }
 0x5b5   :  { %v2454_v62 = vsel %vm526_vm0, %v2362_v40, 0.0 }
 0x5b7   :  { %2449 = vadd.xlane.f32.xlu0 %v2448_v56  ;;  %2263 = vadd.xlane.f32.xlu1 %v2262_v8  ;;  %v5347_v8 = vld [vmem:[%s10574_s3 + $0x38] sm:$0xff] }
 0x5bb   :  { %2458 = vadd.xlane.f32.xlu0 %v2457_v47 }
 0x5c8   :  { %v8528_v63 = vpop.xlane.xlu0 %2176  ;;  %2640 = vperm.xlu1 %6339, %v5346_v59  }
 0x5ca   :  { %v8534_v30 = vpop.xlane.xlu1 %2368 }
 0x5cc   :  { %v8532_v57 = vpop.xlane.xlu0 %2173 }
 0x5d0   :  { %v8539_v26 = vpop.xlane.xlu0 %2365 }
 0x5d1   :  { %v8541_v54 = vpop.xlane.xlu1 %2179  ;;  %2603 = vperm.xlu0 %6340, %v5345_v12  }
 0x5d4   :  { %v2183_v9 = vpop.xlane.xlu0 %2182 }
 0x5d5   :  { %v8543_v23 = vpop.xlane.xlu1 %2371  ;;  %v2271_v24 = vmul.f32 0.03125, %v2183_v9 }
 0x5d8   :  { %v2375_v6 = vpop.xlane.xlu0 %2374 }
 0x5d9   :  { %v8545_v33 = vpop.xlane.xlu1 %2185  ;;  %v2463_v11 = vmul.f32 0.03125, %v2375_v6 }
 0x5dc   :  { %v2189_v42 = vpop.xlane.xlu0 %2188 }
 0x5dd   :  { %v2273_v31 = vmul.f32 0.03125, %v2189_v42 }
 0x5e0   :  { %v8547_v13 = vpop.xlane.xlu0 %2380  ;;  %v2195_v37 = vpop.xlane.xlu1 %2194 }
 0x5e1   :  { %v2275_v55 = vmul.f32 0.03125, %v2195_v37 }
 0x5e4   :  { %v8549_v32 = vpop.xlane.xlu0 %2377  ;;  %v8551_v17 = vpop.xlane.xlu1 %2191 }
 0x5e8   :  { %v8555_v39 = vpop.xlane.xlu0 %2386  ;;  %v2201_v18 = vpop.xlane.xlu1 %2200 }
 0x5e9   :  { %v2277_v45 = vmul.f32 0.03125, %v2201_v18 }
 0x5ec   :  { %v8558_v15 = vpop.xlane.xlu0 %2383  ;;  %v8560_v14 = vpop.xlane.xlu1 %2197  ;;  %2455 = vadd.xlane.f32.xlu1 %v2454_v62 }
 0x5f0   :  { %v8562_v36 = vpop.xlane.xlu0 %2392  ;;  %v2207_v52 = vpop.xlane.xlu1 %2206 }
 0x5f1   :  { %v2279_v9 = vmul.f32 0.03125, %v2207_v52 }
 0x5f4   :  { %v8564_v43 = vpop.xlane.xlu0 %2389  ;;  %v8566_v27 = vpop.xlane.xlu1 %2203 }
 0x5f8   :  { %v8568_v20 = vpop.xlane.xlu0 %2398  ;;  %v2213_v56 = vpop.xlane.xlu1 %2212 }
 0x5fc   :  { %v8573_v58 = vpop.xlane.xlu0 %2395  ;;  %v8575_v47 = vpop.xlane.xlu1 %2209 }
 0x5fd   :  { %2645 = vperm.xlu1 %6339, %v5347_v8   ;;  %v6178_v8 = vpack.c.bf16 %v150_v19, %v149_v4 }
 0x5ff   :  { %6179 = vmatprep.subr.bf16.mxu1 %v6178_v8 }
 0x600   :  { %v8577_v59 = vpop.xlane.xlu0 %2404  ;;  %v2219_v12 = vpop.xlane.xlu1 %2218  ;;  %6181 = vmatpush3.bf16.msra.mxu1 %v6178_v8 }
 0x601   :  { %6183 = vmatprep.subr.bf16.mxu1 %v6182_v25  ;;  %v2283_v18 = vmul.f32 0.03125, %v2219_v12 }
 0x604   :  { %v8579_v40 = vpop.xlane.xlu0 %2401  ;;  %v8581_v62 = vpop.xlane.xlu1 %2215  ;;  %6185 = vmatpush3.bf16.msra.mxu1 %v6182_v25  ;;  %v2269_v25 = vmul.f32 0.03125, %v8528_v63  ;;  %v2467_v63 = vmul.f32 0.03125, %v8555_v39 }
 0x606   :  { %v2315_v7 = vadd.f32 %v2271_v24, %v2269_v25 }
 0x608   :  { %v2411_v35 = vpop.xlane.xlu0 %2410  ;;  %v2225_v41 = vpop.xlane.xlu1 %2224  ;;  %v2316_v3 = vadd.f32 %v2315_v7, %v2273_v31  ;;  %v2469_v31 = vmul.f32 0.03125, %v8562_v36 }
 0x60c   :  { %v8595_v5 = vpop.xlane.xlu0 %2407  ;;  %v8597_v44 = vpop.xlane.xlu1 %2221 }
 0x60d   :  { %10725 = vst [vmem:[#allocation30_spill] sm:$0xff] %v8595_v5  ;;  %v2281_v5 = vmul.f32 0.03125, %v2213_v56 }
 0x610   :  { %v2417_v50 = vpop.xlane.xlu0 %2416  ;;  %v2231_v21 = vpop.xlane.xlu1 %2230 }
 0x614   :  { %v8599_v0 = vpop.xlane.xlu0 %2413  ;;  %v8601_v4 = vpop.xlane.xlu1 %2227 }
 0x615   :  { %10726 = vst [vmem:[#allocation25_spill] sm:$0xff] %v8599_v0  ;;  %v2461_v0 = vmul.f32 0.03125, %v8534_v30 }
 0x618   :  { %v2423_v19 = vpop.xlane.xlu0 %2422  ;;  %v2237_v48 = vpop.xlane.xlu1 %2236 }
 0x619   :  { %v2289_v36 = vmul.f32 0.03125, %v2237_v48 }
 0x61c   :  { %v8603_v53 = vpop.xlane.xlu0 %2419  ;;  %v8605_v10 = vpop.xlane.xlu1 %2233 }
 0x61d   :  { %10727 = vst [vmem:[#allocation31_spill] sm:$0xff] %v8603_v53  ;;  %10728 = vst [vmem:[#allocation27_spill] sm:$0xff] %v8605_v10  ;;  %v2507_v10 = vadd.f32 %v2463_v11, %v2461_v0  ;;  %v2287_v0 = vmul.f32 0.03125, %v2231_v21 }
 0x620   :  { %v2429_v38 = vpop.xlane.xlu0 %2428  ;;  %v2243_v8 = vpop.xlane.xlu1 %2242 }
 0x621   :  { %v2481_v21 = vmul.f32 0.03125, %v2429_v38 }
 0x624   :  { %v8607_v22 = vpop.xlane.xlu0 %2425  ;;  %v8609_v51 = vpop.xlane.xlu1 %2239 }
 0x625   :  { %10729 = vst [vmem:[#allocation32_spill] sm:$0xff] %v8607_v22  ;;  %10730 = vst [vmem:[#allocation29_spill] sm:$0xff] %v8609_v51  ;;  %v2465_v22 = vmul.f32 0.03125, %v8547_v13  ;;  %v2317_v51 = vadd.f32 %v2316_v3, %v2275_v55 }
 0x627   :  { %v2318_v42 = vadd.f32 %v2317_v51, %v2277_v45  ;;  %v2508_v6 = vadd.f32 %v2507_v10, %v2465_v22  ;;  %v2473_v45 = vmul.f32 0.03125, %v8577_v59  ;;  %v2475_v22 = vmul.f32 0.03125, %v2411_v35 }
 0x628   :  { %v2435_v61 = vpop.xlane.xlu0 %2434  ;;  %v2249_v2 = vpop.xlane.xlu1 %2248  ;;  %v2477_v10 = vmul.f32 0.03125, %v2417_v50 }
 0x629   :  { %v2319_v7 = vadd.f32 %v2318_v42, %v2279_v9  ;;  %v2509_v25 = vadd.f32 %v2508_v6, %v2467_v63  ;;  %v2479_v9 = vmul.f32 0.03125, %v2423_v19  ;;  %v2293_v42 = vmul.f32 0.03125, %v2249_v2 }
 0x62a   :  { %v2483_v48 = vmul.f32 0.03125, %v2435_v61 }
 0x62b   :  { %v2320_v30 = vadd.f32 %v2319_v7, %v2281_v5  ;;  %v2510_v11 = vadd.f32 %v2509_v25, %v2469_v31  ;;  %v2291_v5 = vmul.f32 0.03125, %v2243_v8 }
 0x62c   :  { %v8612_v49 = vpop.xlane.xlu0 %2431  ;;  %v8614_v53 = vpop.xlane.xlu1 %2245 }
 0x62d   :  { %10731 = vst [vmem:[#allocation37_spill] sm:$0xff] %v8612_v49  ;;  %10732 = vst [vmem:[#allocation38_spill] sm:$0xff] %v8614_v53  ;;  %v2471_v49 = vmul.f32 0.03125, %v8568_v20  ;;  %v2285_v53 = vmul.f32 0.03125, %v2225_v41  ;;  %v2321_v3 = vadd.f32 %v2320_v30, %v2283_v18 }
 0x62f   :  { %v2511_v51 = vadd.f32 %v2510_v11, %v2471_v49  ;;  %v2322_v39 = vadd.f32 %v2321_v3, %v2285_v53 }
 0x630   :  { %v2441_v24 = vpop.xlane.xlu0 %2440  ;;  %v2255_v37 = vpop.xlane.xlu1 %2254 }
 0x631   :  { %v2512_v12 = vadd.f32 %v2511_v51, %v2473_v45  ;;  %v2323_v20 = vadd.f32 %v2322_v39, %v2287_v0  ;;  %v2295_v35 = vmul.f32 0.03125, %v2255_v37  ;;  %v2485_v8 = vmul.f32 0.03125, %v2441_v24 }
 0x633   :  { %v2513_v41 = vadd.f32 %v2512_v12, %v2475_v22  ;;  %v2324_v63 = vadd.f32 %v2323_v20, %v2289_v36 }
 0x634   :  { %v8621_v13 = vpop.xlane.xlu0 %2437  ;;  %v8623_v55 = vpop.xlane.xlu1 %2251 }
 0x635   :  { %v2514_v59 = vadd.f32 %v2513_v41, %v2477_v10  ;;  %v2325_v49 = vadd.f32 %v2324_v63, %v2291_v5  ;;  %v2268_v41 = vmul.f32 0.03125, %v8532_v57 }
 0x637   :  { %v2515_v53 = vadd.f32 %v2514_v59, %v2479_v9  ;;  %v2326_v7 = vadd.f32 %v2325_v49, %v2293_v42  ;;  %v2272_v9 = vmul.f32 0.03125, %v8545_v33  ;;  %v2274_v42 = vmul.f32 0.03125, %v8551_v17 }
 0x638   :  { %v2447_v52 = vpop.xlane.xlu0 %2446  ;;  %v2261_v56 = vpop.xlane.xlu1 %2260  ;;  %v2462_v59 = vmul.f32 0.03125, %v8543_v23  ;;  %v2276_v49 = vmul.f32 0.03125, %v8560_v14  ;;  %v2468_v17 = vmul.f32 0.03125, %v8564_v43 }
 0x639   :  { %v2297_v18 = vmul.f32 0.03125, %v2261_v56  ;;  %v2516_v30 = vadd.f32 %v2515_v53, %v2481_v21  ;;  %v2327_v11 = vadd.f32 %v2326_v7, %v2295_v35  ;;  %v2487_v2 = vmul.f32 0.03125, %v2447_v52 }
 0x63a   :  { %v2270_v52 = vmul.f32 0.03125, %v8541_v54  ;;  %v2460_v35 = vmul.f32 0.03125, %v8539_v26  ;;  %v2464_v53 = vmul.f32 0.03125, %v8549_v32  ;;  %v2278_v54 = vmul.f32 0.03125, %v8566_v27 }
 0x63b   :  { %v2517_v45 = vadd.f32 %v2516_v30, %v2483_v48  ;;  %v2328_v3 = vadd.f32 %v2327_v11, %v2297_v18 }
 0x63c   :  { %v8626_v6 = vpop.xlane.xlu0 %2443  ;;  %v8628_v31 = vpop.xlane.xlu1 %2257  ;;  %v2300_v63 = vadd.f32 %v2270_v52, %v2268_v41  ;;  %v2492_v7 = vadd.f32 %v2462_v59, %v2460_v35  ;;  %v10737_v41 = vld [vmem:[#allocation31_spill] sm:$0xff] }
 0x63d   :  { %v2518_v51 = vadd.f32 %v2517_v45, %v2485_v8  ;;  %v2470_v8 = vmul.f32 0.03125, %v8573_v58 }
 0x63e   :  { %v2301_v21 = vadd.f32 %v2300_v63, %v2272_v9  ;;  %v2493_v33 = vadd.f32 %v2492_v7, %v2464_v53  ;;  %v2478_v9 = vmul.f32 0.03125, %v10737_v41 }
 0x63f   :  { %v2519_v39 = vadd.f32 %v2518_v51, %v2487_v2  ;;  %v2472_v2 = vmul.f32 0.03125, %v8579_v40  ;;  %v2286_v51 = vmul.f32 0.03125, %v8601_v4 }
 0x640   :  { %v2453_v25 = vpop.xlane.xlu0 %2452  ;;  %v2267_v50 = vpop.xlane.xlu1 %2266  ;;  %v2302_v48 = vadd.f32 %v2301_v21, %v2274_v42  ;;  %v10738_v42 = vld [vmem:[#allocation38_spill] sm:$0xff] }
 0x641   :  { %v2299_v19 = vmul.f32 0.03125, %v2267_v50  ;;  %v2489_v22 = vmul.f32 0.03125, %v2453_v25  ;;  %v2466_v25 = vmul.f32 0.03125, %v8558_v15  ;;  %v2280_v50 = vmul.f32 0.03125, %v8575_v47 }
 0x642   :  { %v2303_v57 = vadd.f32 %v2302_v48, %v2276_v49  ;;  %v2292_v59 = vmul.f32 0.03125, %v10738_v42  ;;  %v10739_v49 = vld [vmem:[#allocation32_spill] sm:$0xff]  ;;  %v2294_v48 = vmul.f32 0.03125, %v8623_v55 }
 0x643   :  { %v2329_v38 = vadd.f32 %v2328_v3, %v2299_v19  ;;  %v2520_v36 = vadd.f32 %v2519_v39, %v2489_v22  ;;  %v2284_v19 = vmul.f32 0.03125, %v8597_v44  ;;  %v134_v44 = vld [vmem:[%s10573_s2 + $0x88] sm:$0xff]  ;;  %v2480_v35 = vmul.f32 0.03125, %v10739_v49  ;;  %v10747_v42 = vld [vmem:[#allocation12_spill] sm:$0xff] }
 0x644   :  { %v8630_v0 = vpop.xlane.xlu0 %2449  ;;  %v2304_v23 = vadd.f32 %v2303_v57, %v2278_v54  ;;  %v2264_v54 = vpop.xlane.xlu1 %2263  ;;  %v10740_v57 = vld [vmem:[#allocation37_spill] sm:$0xff] }
 0x645   :  { %v8632_v61 = vmul.f32 0.0625, %v2329_v38  ;;  %v10733_v38 = vld [vmem:[#allocation30_spill] sm:$0xff]  ;;  %v2488_v55 = vmul.f32 0.03125, %v8630_v0 }
 0x646   :  { %v2305_v11 = vadd.f32 %v2304_v23, %v2280_v50  ;;  %v2474_v39 = vmul.f32 0.03125, %v10733_v38  ;;  %v2484_v50 = vmul.f32 0.03125, %v8621_v13 }
 0x647   :  { %v2525_v24 = vmul.f32 %v8632_v61, %v8632_v61  ;;  %v2549_v26 = vsub.f32 %v8440_v60, %v8632_v61  ;;  %v2551_v32 = vsub.f32 %v8454_v29, %v8632_v61  ;;  %v2553_v14 = vsub.f32 %v8468_v16, %v8632_v61 }
 0x648   :  { %v2459_v37 = vpop.xlane.xlu0 %2458  ;;  %v2555_v27 = vsub.f32 %v8482_v28, %v8632_v61  ;;  %v2557_v15 = vsub.f32 %v8496_v34, %v8632_v61  ;;  %v2545_v43 = vsub.f32 %v8412_v1, %v8632_v61  ;;  %v2547_v47 = vsub.f32 %v8426_v46, %v8632_v61 }
 0x649   :  { %v2491_v56 = vmul.f32 0.03125, %v2459_v37  ;;  %v2282_v60 = vmul.f32 0.03125, %v8581_v62  ;;  %v2494_v62 = vadd.f32 %v2493_v33, %v2466_v25  ;;  %v2482_v33 = vmul.f32 0.03125, %v10740_v57  ;;  %v10750_v57 = vld [vmem:[#allocation7_spill] sm:$0xff] }
 0x64b   :  { %v2521_v12 = vadd.f32 %v2520_v36, %v2491_v56  ;;  %v2495_v45 = vadd.f32 %v2494_v62, %v2468_v17  ;;  %v2306_v3 = vadd.f32 %v2305_v11, %v2282_v60  ;;  %v10734_v36 = vld [vmem:[#allocation27_spill] sm:$0xff]  ;;  %v2296_v17 = vmul.f32 0.03125, %v8628_v31  ;;  %v10741_v62 = vld [vmem:[#allocation26_spill] sm:$0xff] }
 0x64c   :  { %v2288_v56 = vmul.f32 0.03125, %v10734_v36 }
 0x64d   :  { %v2523_v10 = vmul.f32 0.0625, %v2521_v12  ;;  %v2496_v22 = vadd.f32 %v2495_v45, %v2470_v8  ;;  %v2307_v37 = vadd.f32 %v2306_v3, %v2284_v19  ;;  %v133_v12 = vld [vmem:[%s10573_s2 + $0x80] sm:$0xff]  ;;  %v2559_v8 = vsub.f32 %v10741_v62, %v8632_v61 }
 0x64e   :  { %v8698_v58 = vpack.c.bf16 %v134_v44, %v133_v12  ;;  %v10743_v44 = vld [vmem:[#allocation22_spill] sm:$0xff] }
 0x64f   :  { %v2527_v20 = vsub.f32 %v2523_v10, %v2525_v24  ;;  %v2497_v40 = vadd.f32 %v2496_v22, %v2472_v2  ;;  %v10735_v10 = vld [vmem:[#allocation25_spill] sm:$0xff]  ;;  %v2308_v4 = vadd.f32 %v2307_v37, %v2286_v51 }
 0x650   :  { %v2476_v24 = vmul.f32 0.03125, %v10735_v10  ;;  %6187 = vmatprep.subr.bf16.mxu1 %v8698_v58  ;;  %v8719_v3 = vpop.permute.xlu0 %2603  ;;  %v10744_v10 = vld [vmem:[#allocation5_spill] sm:$0xff] }
 0x651   :  { %v2561_v5 = vadd.f32 1e-05, %v2527_v20  ;;  %v10736_v20 = vld [vmem:[#allocation29_spill] sm:$0xff]  ;;  %v2498_v52 = vadd.f32 %v2497_v40, %v2474_v39  ;;  %v2309_v63 = vadd.f32 %v2308_v4, %v2288_v56  ;;  %v10742_v56 = vld [vmem:[#allocation35_spill] sm:$0xff]  ;;  %v2533_v40 = vsub.f32 %v10743_v44, %v8632_v61  ;;  %v10745_v4 = vld [vmem:[#allocation34_spill] sm:$0xff] }
 0x652   :  { %v2529_v12 = vsub.f32 %v10742_v56, %v8632_v61  ;;  %v135_v44 = vld [vmem:[%s10573_s2 + $0x90] sm:$0xff] }
 0x653   :  { %6785 = vrsqrt.f32 %v2561_v5  ;;  %v2290_v5 = vmul.f32 0.03125, %v10736_v20  ;;  %v2499_v21 = vadd.f32 %v2498_v52, %v2476_v24 }
 0x655   :  { %v2310_v53 = vadd.f32 %v2309_v63, %v2290_v5  ;;  %v2500_v7 = vadd.f32 %v2499_v21, %v2478_v9  ;;  %v10746_v5 = vld [vmem:[#allocation24_spill] sm:$0xff] }
 0x656   :  { %v10748_v21 = vld [vmem:[#allocation36_spill] sm:$0xff] }
 0x657   :  { %v2311_v25 = vadd.f32 %v2310_v53, %v2292_v59  ;;  %v2501_v23 = vadd.f32 %v2500_v7, %v2480_v35  ;;  %v10749_v35 = vld [vmem:[#allocation20_spill] sm:$0xff] }
 0x658   :  { %v2531_v53 = vsub.f32 %v10749_v35, %v8632_v61 }
 0x65d   :  { %v8645_v18 = vpop.eup %6785 }
 0x65e   :  { %v8666_v30 = vmul.f32 %v8645_v18, %v2549_v26  ;;  %v8669_v29 = vmul.f32 %v8645_v18, %v2551_v32  ;;  %v8672_v16 = vmul.f32 %v8645_v18, %v2553_v14  ;;  %v8675_v28 = vmul.f32 %v8645_v18, %v2555_v27 }
 0x65f   :  { %v8678_v34 = vmul.f32 %v8645_v18, %v2557_v15  ;;  %v8681_v1 = vmul.f32 %v8645_v18, %v2545_v43  ;;  %v8684_v46 = vmul.f32 %v8645_v18, %v2547_v47  ;;  %v2312_v26 = vadd.f32 %v2311_v25, %v2294_v48  ;;  %v8711_v43 = vpop.permute.xlu1 %2640 }
 0x660   :  { %v2298_v32 = vmul.f32 0.03125, %v2264_v54  ;;  %v2502_v14 = vadd.f32 %v2501_v23, %v2482_v33  ;;  %v2486_v27 = vmul.f32 0.03125, %v8626_v6  ;;  %v2595_v31 = vmul.f32 %v8645_v18, %v2559_v8 }
 0x661   :  { %v2313_v15 = vadd.f32 %v2312_v26, %v2296_v17  ;;  %v2565_v41 = vmul.f32 %v8645_v18, %v2529_v12  ;;  %v2569_v63 = vmul.f32 %v8645_v18, %v2533_v40  ;;  %v2535_v33 = vsub.f32 %v10750_v57, %v8632_v61  ;;  %v136_v40 = vld [vmem:[%s10573_s2 + $0x98] sm:$0xff] }
 0x662   :  { %v2503_v47 = vadd.f32 %v2502_v14, %v2484_v50  ;;  %v2637_v51 = vmul.f32 %v8719_v3, %v2595_v31  ;;  %v2567_v23 = vmul.f32 %v8645_v18, %v2531_v53  ;;  %v10751_v50 = vld [vmem:[#allocation28_spill] sm:$0xff] }
 0x663   :  { %v2314_v60 = vadd.f32 %v2313_v15, %v2298_v32  ;;  %v2611_v15 = vmul.f32 %v8719_v3, %v2569_v63 }
 0x664   :  { %v2504_v11 = vadd.f32 %v2503_v47, %v2486_v27  ;;  %v2607_v27 = vmul.f32 %v8719_v3, %v2565_v41  ;;  %v2571_v47 = vmul.f32 %v8645_v18, %v2535_v33  ;;  %v10755_v41 = vld [vmem:[#allocation14_spill] sm:$0xff]  ;;  %v10757_v33 = vld [vmem:[#allocation9_spill] sm:$0xff] }
 0x665   :  { %v8717_v45 = vmul.f32 0.0625, %v2314_v60  ;;  %v10752_v60 = vld [vmem:[#allocation11_spill] sm:$0xff]  ;;  %v2539_v63 = vsub.f32 %v10755_v41, %v8632_v61 }
 0x666   :  { %v2505_v13 = vadd.f32 %v2504_v11, %v2488_v55 }
 0x667   :  { %v2524_v0 = vmul.f32 %v8717_v45, %v8717_v45  ;;  %v2532_v24 = vsub.f32 %v10744_v10, %v8717_v45  ;;  %v2528_v20 = vsub.f32 %v10745_v4, %v8717_v45  ;;  %v2534_v52 = vsub.f32 %v10746_v5, %v8717_v45 }
 0x668   :  { %v2536_v59 = vsub.f32 %v10747_v42, %v8717_v45  ;;  %v2530_v49 = vsub.f32 %v10748_v21, %v8717_v45  ;;  %v2538_v62 = vsub.f32 %v10752_v60, %v8717_v45  ;;  %v2613_v10 = vmul.f32 %v8719_v3, %v2571_v47  ;;  %v10756_v42 = vld [vmem:[#allocation6_spill] sm:$0xff] }
 0x669   :  { %v6190_v21 = vpack.c.bf16 %v136_v40, %v135_v44  ;;  %v2575_v57 = vmul.f32 %v8645_v18, %v2539_v63 }
 0x679   :  { %v2456_v19 = vpop.xlane.xlu1 %2455 }
 0x67a   :  { %v2490_v2 = vmul.f32 0.03125, %v2456_v19  ;;  %v10753_v19 = vld [vmem:[#allocation10_spill] sm:$0xff] }
 0x67c   :  { %v2506_v6 = vadd.f32 %v2505_v13, %v2490_v2  ;;  %v2537_v13 = vsub.f32 %v10753_v19, %v8632_v61  ;;  %v10760_v19 = vld [vmem:[#allocation8_spill] sm:$0xff] }
 0x67d   :  { %v8722_v22 = vpop.permute.xlu1 %2645 }
 0x67e   :  { %v2522_v38 = vmul.f32 0.0625, %v2506_v6  ;;  %v8727_v39 = vadd.f32 %v8722_v22, %v2637_v51  ;;  %v8775_v31 = vadd.f32 %v8722_v22, %v2607_v27  ;;  %v8780_v2 = vadd.f32 %v8722_v22, %v2611_v15 }
 0x67f   :  { %v2609_v51 = vmul.f32 %v8719_v3, %v2567_v23 }
 0x680   :  { %v2526_v37 = vsub.f32 %v2522_v38, %v2524_v0  ;;  %2953 = vrot.lane.b32.xlu1 %v8727_v39, %s6883_s20  ;;  %v6884_v38 = vmov 0.0  }
 0x681   :  { %v8811_v4 = vadd.f32 %v8722_v22, %v2609_v51  ;;  %v137_v51 = vld [vmem:[%s10573_s2 + $0xa0] sm:$0xff] }
 0x682   :  { %v2560_v36 = vadd.f32 1e-05, %v2526_v37 }
 0x684   :  { %6787 = vrsqrt.f32 %v2560_v36 }
 0x68e   :  { %v8742_v9 = vpop.eup %6787 }
 0x68f   :  { %v2568_v48 = vmul.f32 %v8742_v9, %v2532_v24  ;;  %v2564_v54 = vmul.f32 %v8742_v9, %v2528_v20  ;;  %v2570_v7 = vmul.f32 %v8742_v9, %v2534_v52  ;;  %v2572_v25 = vmul.f32 %v8742_v9, %v2536_v59  ;;  %v10754_v20 = vld [vmem:[#allocation13_spill] sm:$0xff] }
 0x690   :  { %v2566_v17 = vmul.f32 %v8742_v9, %v2530_v49  ;;  %v2574_v0 = vmul.f32 %v8742_v9, %v2538_v62  ;;  %v2573_v24 = vmul.f32 %v8645_v18, %v2537_v13  ;;  %v2540_v5 = vsub.f32 %v10754_v20, %v8717_v45 }
 0x691   :  { %v2610_v26 = vmul.f32 %v10751_v50, %v2568_v48  ;;  %v2606_v32 = vmul.f32 %v10751_v50, %v2564_v54  ;;  %v2612_v14 = vmul.f32 %v10751_v50, %v2570_v7  ;;  %v2614_v6 = vmul.f32 %v10751_v50, %v2572_v25 }
 0x692   :  { %v2608_v55 = vmul.f32 %v10751_v50, %v2566_v17  ;;  %v8817_v52 = vadd.f32 %v8722_v22, %v2613_v10  ;;  %v2541_v59 = vsub.f32 %v10756_v42, %v8632_v61  ;;  %v2616_v53 = vmul.f32 %v10751_v50, %v2574_v0  ;;  %v138_v0 = vld [vmem:[%s10573_s2 + $0xa8] sm:$0xff]  ;;  %v139_v42 = vld [vmem:[%s10573_s2 + $0xb0] sm:$0xff] }
 0x693   :  { %v8769_v8 = vadd.f32 %v8711_v43, %v2610_v26  ;;  %v8772_v11 = vadd.f32 %v8711_v43, %v2606_v32  ;;  %v8790_v36 = vadd.f32 %v8711_v43, %v2612_v14  ;;  %v8824_v49 = vadd.f32 %v8711_v43, %v2614_v6  ;;  %v10759_v14 = vld [vmem:[#allocation23_spill] sm:$0xff] }
 0x694   :  { %v8795_v12 = vadd.f32 %v8711_v43, %v2608_v55  ;;  %v2576_v48 = vmul.f32 %v8742_v9, %v2540_v5  ;;  %v2615_v7 = vmul.f32 %v8719_v3, %v2573_v24  ;;  %v2542_v25 = vsub.f32 %v10757_v33, %v8717_v45 }
 0x695   :  { %5786 = vmatprep.mubr.msk.f32.mxu1 %vm526_vm0, %v8769_v8  ;;  %v6341_v37 = vpack.i.bf16 %v8772_v11, %v6884_v38  ;;  %v6346_v56 = vpack.i.bf16 %v8775_v31, %v8772_v11  ;;  %v2577_v26 = vmul.f32 %v8645_v18, %v2541_v59  ;;  %v2558_v27 = vsub.f32 %v10759_v14, %v8717_v45  ;;  %v140_v59 = vld [vmem:[%s10573_s2 + $0xb8] sm:$0xff] }
 0x696   :  { %5787 = vmatmul.mubr.msk.f32.vlgmr.msra.gmra.mrb[108].mxu1 %vm526_vm0, %v8780_v2  ;;  %v6351_v35 = vpack.i.bf16 %v8811_v4, %v8795_v12  ;;  %v6356_v54 = vpack.i.bf16 %v8795_v12, %v8775_v31  ;;  %v8846_v23 = vadd.f32 %v8722_v22, %v2615_v7  ;;  %v2578_v32 = vmul.f32 %v8742_v9, %v2542_v25  ;;  %v141_v25 = vld [vmem:[%s10573_s2 + $0xc0] sm:$0xff] }
 0x697   :  { %6342 = vrot.lane.b32.xlu0 %v6341_v37, %s6881_s10  ;;  %5789 = vmatprep.mubr.msk.f32.mxu1 %vm526_vm0, %v8790_v36  ;;  %v8853_v15 = vadd.f32 %v8711_v43, %v2616_v53  ;;  %v2618_v47 = vmul.f32 %v10751_v50, %v2576_v48  ;;  %v6366_v60 = vpack.i.bf16 %v8780_v2, %v8769_v8 }
 0x698   :  { %6347 = vrot.lane.b32.xlu1 %v6346_v56, %s6885_s25  ;;  %6189 = vmatpush3.bf16.msra.mxu1 %v8698_v58  ;;  %v10758_v58 = vld [vmem:[#allocation21_spill] sm:$0xff]  ;;  %v2617_v62 = vmul.f32 %v8719_v3, %v2575_v57  ;;  %v2543_v13 = vsub.f32 %v10760_v19, %v8632_v61  ;;  %v2594_v6 = vmul.f32 %v8742_v9, %v2558_v27 }
 0x699   :  { %v2556_v17 = vsub.f32 %v10758_v58, %v8717_v45  ;;  %6191 = vmatprep.subr.bf16.mxu1 %v6190_v21  ;;  %v2619_v56 = vmul.f32 %v8719_v3, %v2577_v26  ;;  %v8883_v10 = vadd.f32 %v8711_v43, %v2618_v47  ;;  %v6371_v24 = vpack.i.bf16 %v8769_v8, %v8811_v4  ;;  %v142_v58 = vld [vmem:[%s10573_s2 + $0xc8] sm:$0xff] }
 0x69a   :  { %5790 = vmatmul.mubr.msk.f32.gmra.mrb[110].mxu1 %vm526_vm0, %v8817_v52  ;;  %v8877_v61 = vadd.f32 %v8722_v22, %v2617_v62  ;;  %v2579_v44 = vmul.f32 %v8645_v18, %v2543_v13  ;;  %v2636_v40 = vmul.f32 %v10751_v50, %v2594_v6  ;;  %v2620_v20 = vmul.f32 %v10751_v50, %v2578_v32  ;;  %v10762_v62 = vld [vmem:[#allocation16_spill] sm:$0xff] }
 0x69b   :  { %5792 = vmatprep.mubr.msk.f32.mxu1 %vm526_vm0, %v8824_v49  ;;  %6352 = vrot.lane.b32.xlu0 %v6351_v35, %s6883_s20  ;;  %v2592_v55 = vmul.f32 %v8742_v9, %v2556_v17  ;;  %v6194_v5 = vpack.c.bf16 %v138_v0, %v137_v51  ;;  %v2635_v18 = vmul.f32 %v8719_v3, %v8678_v34  ;;  %v10761_v17 = vld [vmem:[#allocation17_spill] sm:$0xff] }
 0x69c   :  { %6357 = vrot.lane.b32.xlu1 %v6356_v54, %s6881_s10  ;;  %6193 = vmatpush3.bf16.msra.mxu1 %v6190_v21  ;;  %v8896_v63 = vadd.f32 %v8711_v43, %v2636_v40  ;;  %v8909_v34 = vadd.f32 %v8722_v22, %v2619_v56  ;;  %v6381_v53 = vpack.i.bf16 %v8817_v52, %v8790_v36  ;;  %v146_v56 = vld [vmem:[%s10573_s2 + $0xe8] sm:$0xff] }
 0x69d   :  { %v2634_v37 = vmul.f32 %v10751_v50, %v2592_v55  ;;  %v8912_v21 = vadd.f32 %v8722_v22, %v2635_v18  ;;  %6195 = vmatprep.subr.bf16.mxu1 %v6194_v5  ;;  %v6198_v48 = vpack.c.bf16 %v140_v59, %v139_v42  ;;  %v6386_v54 = vpack.i.bf16 %v8790_v36, %v8780_v2  ;;  %v143_v55 = vld [vmem:[%s10573_s2 + $0xd0] sm:$0xff] }
 0x69e   :  { %5793 = vmatmul.mubr.msk.f32.gmra.mrb[112].mxu1 %vm526_vm0, %v8846_v23  ;;  %v2621_v7 = vmul.f32 %v8719_v3, %v2579_v44  ;;  %v2548_v26 = vsub.f32 %v10761_v17, %v8717_v45  ;;  %v6202_v27 = vpack.c.bf16 %v142_v58, %v141_v25  ;;  %v6396_v47 = vpack.i.bf16 %v8846_v23, %v8824_v49  ;;  %v10763_v44 = vld [vmem:[#allocation19_spill] sm:$0xff]  ;;  %v148_v58 = vld [vmem:[%s10573_s2 + $0xf8] sm:$0xff]  ;;  %v10765_v17 = vld [vmem:[#allocation18_spill] sm:$0xff] }
 0x69f   :  { %5795 = vmatprep.mubr.msk.f32.mxu1 %vm526_vm0, %v8853_v15  ;;  %6362 = vrot.lane.b32.xlu0 %v6351_v35, %s6885_s25  ;;  %v8891_v41 = vadd.f32 %v8711_v43, %v2634_v37  ;;  %v8915_v35 = vadd.f32 %v8711_v43, %v2620_v20  ;;  %v6541_v57 = vpack.i.bf16 %v8896_v63, %v8912_v21  ;;  %v145_v37 = vld [vmem:[%s10573_s2 + $0xe0] sm:$0xff]  ;;  %v147_v25 = vld [vmem:[%s10573_s2 + $0xf0] sm:$0xff] }
 0x6a0   :  { %6367 = vrot.lane.b32.xlu1 %v6366_v60, %s6883_s20  ;;  %v8941_v32 = vadd.f32 %v8722_v22, %v2621_v7  ;;  %6197 = vmatpush3.bf16.msra.mxu1 %v6194_v5  ;;  %v2584_v14 = vmul.f32 %v8742_v9, %v2548_v26  ;;  %v2550_v19 = vsub.f32 %v10762_v62, %v8717_v45 }
 0x6a1   :  { %v6551_v33 = vpack.i.bf16 %v8912_v21, %v8891_v41  ;;  %6199 = vmatprep.subr.bf16.mxu1 %v6198_v48  ;;  %v6401_v13 = vpack.i.bf16 %v8824_v49, %v8817_v52  ;;  %v2552_v40 = vsub.f32 %v10763_v44, %v8717_v45  ;;  %v6210_v5 = vpack.c.bf16 %v146_v56, %v145_v37 }
 0x6a2   :  { %5796 = vmatmul.mubr.msk.f32.gmra.mrb[114].mxu1 %vm526_vm0, %v8877_v61  ;;  %v2626_v6 = vmul.f32 %v10751_v50, %v2584_v14  ;;  %v2586_v51 = vmul.f32 %v8742_v9, %v2550_v19  ;;  %v6411_v42 = vpack.i.bf16 %v8877_v61, %v8853_v15  ;;  %v2554_v26 = vsub.f32 %v10765_v17, %v8717_v45  ;;  %v10766_v14 = vld [vmem:[#allocation33_spill] sm:$0xff] }
 0x6a3   :  { %5798 = vmatprep.mubr.msk.f32.mxu1 %vm526_vm0, %v8883_v10  ;;  %6372 = vrot.lane.b32.xlu0 %v6371_v24, %s6881_s10  ;;  %v10764_v24 = vld [vmem:[#allocation15_spill] sm:$0xff]  ;;  %v6214_v62 = vpack.c.bf16 %v148_v58, %v147_v25  ;;  %v6426_v19 = vpack.i.bf16 %v8909_v34, %v8883_v10  ;;  %v6556_v17 = vpack.i.bf16 %v8727_v39, %v8896_v63 }
 0x6a4   :  { %6377 = vrot.lane.b32.xlu1 %v6366_v60, %s6885_s25  ;;  %v144_v60 = vld [vmem:[%s10573_s2 + $0xd8] sm:$0xff]  ;;  %6201 = vmatpush3.bf16.msra.mxu1 %v6198_v48  ;;  %v2544_v20 = vsub.f32 %v10764_v24, %v8717_v45  ;;  %v8978_v18 = vadd.f32 %v8711_v43, %v2626_v6  ;;  %v2628_v59 = vmul.f32 %v10751_v50, %v2586_v51 }
 0x6a5   :  { %6203 = vmatprep.subr.bf16.mxu1 %v6202_v27  ;;  %v6206_v0 = vpack.c.bf16 %v144_v60, %v143_v55  ;;  %v6416_v48 = vpack.i.bf16 %v8853_v15, %v8846_v23  ;;  %v2590_v60 = vmul.f32 %v8742_v9, %v2554_v26  ;;  %v2633_v24 = vmul.f32 %v8719_v3, %v8675_v28 }
 0x6a6   :  { %5799 = vmatmul.mubr.msk.f32.gmra.mrb[116].mxu1 %vm526_vm0, %v8909_v34  ;;  %v2580_v7 = vmul.f32 %v8742_v9, %v2544_v20 }
 0x6a7   :  { %5801 = vmatprep.mubr.msk.f32.mxu1 %vm526_vm0, %v8915_v35  ;;  %6382 = vrot.lane.b32.xlu0 %v6381_v53, %s6883_s20  ;;  %v2632_v37 = vmul.f32 %v10751_v50, %v2590_v60 }
 0x6a8   :  { %6387 = vrot.lane.b32.xlu1 %v6386_v54, %s6881_s10  ;;  %6205 = vmatpush3.bf16.msra.mxu1 %v6202_v27  ;;  %v2627_v54 = vmul.f32 %v8719_v3, %v8666_v30  ;;  %v2546_v27 = vsub.f32 %v10766_v14, %v8717_v45  ;;  %v2622_v45 = vmul.f32 %v10751_v50, %v2580_v7 }
 0x6a9   :  { %6207 = vmatprep.subr.bf16.mxu1 %v6206_v0 }
 0x6aa   :  { %5802 = vmatmul.mubr.msk.f32.gmra.mrb[118].mxu1 %vm526_vm0, %v8941_v32  ;;  %v9003_v30 = vadd.f32 %v8722_v22, %v2627_v54  ;;  %v2582_v6 = vmul.f32 %v8742_v9, %v2546_v27  ;;  %v9038_v56 = vadd.f32 %v8711_v43, %v2622_v45 }
 0x6ab   :  { %6392 = vrot.lane.b32.xlu0 %v6381_v53, %s6885_s25  ;;  %5804 = vmatprep.mubr.f32.mxu1 %v6884_v38  ;;  %v2588_v53 = vmul.f32 %v8742_v9, %v2552_v40  ;;  %v2631_v9 = vmul.f32 %v8719_v3, %v8672_v16  ;;  %v9049_v40 = vadd.f32 %v8711_v43, %v2632_v37 }
 0x6ac   :  { %6397 = vrot.lane.b32.xlu1 %v6396_v47, %s6883_s20  ;;  %6209 = vmatpush3.bf16.msra.mxu1 %v6206_v0  ;;  %v2624_v44 = vmul.f32 %v10751_v50, %v2582_v6  ;;  %v6441_v16 = vpack.i.bf16 %v8941_v32, %v8915_v35  ;;  %v9067_v35 = vadd.f32 %v8722_v22, %v2633_v24 }
 0x6ad   :  { %v2630_v55 = vmul.f32 %v10751_v50, %v2588_v53  ;;  %6211 = vmatprep.subr.bf16.mxu1 %v6210_v5  ;;  %v6446_v50 = vpack.i.bf16 %v9038_v56, %v8909_v34  ;;  %v2623_v32 = vmul.f32 %v8719_v3, %v8681_v1 }
 0x6ae   :  { %5805 = vmatmul.mubr.f32.gmra.mrb[120].mxu1 %v6884_v38  ;;  %v9060_v20 = vadd.f32 %v8711_v43, %v2624_v44  ;;  %v6526_v25 = vpack.i.bf16 %v8891_v41, %v9067_v35  ;;  %v6536_v58 = vpack.i.bf16 %v9067_v35, %v9049_v40 }
 0x6af   :  { %6402 = vrot.lane.b32.xlu0 %v6401_v13, %s6881_s10  ;;  %5807 = vmatprep.mubr.f32.mxu1 %v6884_v38  ;;  %v2629_v13 = vmul.f32 %v8719_v3, %v8669_v29  ;;  %v9028_v0 = vadd.f32 %v8711_v43, %v2630_v55  ;;  %v6431_v29 = vpack.i.bf16 %v8883_v10, %v8877_v61 }
 0x6b0   :  { %6407 = vrot.lane.b32.xlu1 %v6396_v47, %s6885_s25  ;;  %v9008_v47 = vadd.f32 %v8711_v43, %v2628_v59  ;;  %6213 = vmatpush3.bf16.msra.mxu1 %v6210_v5  ;;  %v9046_v10 = vadd.f32 %v8722_v22, %v2631_v9  ;;  %v6456_v28 = vpack.i.bf16 %v9060_v20, %v6884_v38 }
 0x6b1   :  { %v9025_v51 = vadd.f32 %v8722_v22, %v2629_v13  ;;  %6215 = vmatprep.subr.bf16.mxu1 %v6214_v62  ;;  %v2625_v43 = vmul.f32 %v8719_v3, %v8684_v46  ;;  %v9081_v34 = vadd.f32 %v8722_v22, %v2623_v32  ;;  %v6491_v59 = vpack.i.bf16 %v9003_v30, %v8978_v18 }
 0x6b2   :  { %5808 = vmatmul.mubr.f32.gmra.mrb[122].mxu1 %v6884_v38  ;;  %v6511_v54 = vpack.i.bf16 %v9049_v40, %v9046_v10  ;;  %v6521_v7 = vpack.i.bf16 %v9046_v10, %v9028_v0 }
 0x6b3   :  { %5810 = vmatprep.mubr.msk.f32.mxu1 %vm526_vm0, %v8978_v18  ;;  %6412 = vrot.lane.b32.xlu0 %v6411_v42, %s6883_s20  ;;  %v9085_v1 = vadd.f32 %v8722_v22, %v2625_v43  ;;  %v6461_v5 = vpack.i.bf16 %v9081_v34, %v9038_v56  ;;  %v6471_v3 = vpack.i.bf16 %v9060_v20, %v9081_v34 }
 0x6b4   :  { %6417 = vrot.lane.b32.xlu1 %v6416_v48, %s6881_s10  ;;  %6217 = vmatpush3.bf16.msra.mxu1 %v6214_v62  ;;  %v6496_v53 = vpack.i.bf16 %v9028_v0, %v9025_v51  ;;  %v6506_v48 = vpack.i.bf16 %v9025_v51, %v9008_v47 }
 0x6b5   :  { %v6466_v46 = vpack.i.bf16 %v8978_v18, %v9085_v1  ;;  %v6476_v22 = vpack.i.bf16 %v9085_v1, %v9060_v20 }
 0x6b6   :  { %5811 = vmatmul.mubr.msk.f32.gmra.mrb[124].mxu1 %vm526_vm0, %v9003_v30 }
 0x6b7   :  { %5813 = vmatprep.mubr.msk.f32.mxu1 %vm526_vm0, %v9008_v47  ;;  %6422 = vrot.lane.b32.xlu0 %v6411_v42, %s6885_s25  ;;  %v6481_v42 = vpack.i.bf16 %v9008_v47, %v9003_v30 }
 0x6b8   :  { %6427 = vrot.lane.b32.xlu1 %v6426_v19, %s6883_s20 }
 0x6ba   :  { %5814 = vmatmul.mubr.msk.f32.gmra.mrb[126].mxu1 %vm526_vm0, %v9025_v51 }
 0x6bb   :  { %5816 = vmatprep.mubr.msk.f32.mxu1 %vm526_vm0, %v9028_v0  ;;  %6432 = vrot.lane.b32.xlu0 %v6431_v29, %s6881_s10 }
 0x6bc   :  { %6437 = vrot.lane.b32.xlu1 %v6426_v19, %s6885_s25 }
 0x6be   :  { %5817 = vmatmul.mubr.msk.f32.gmra.mrb[128].mxu1 %vm526_vm0, %v9046_v10 }
 0x6bf   :  { %5819 = vmatprep.mubr.msk.f32.mxu1 %vm526_vm0, %v9049_v40  ;;  %6442 = vrot.lane.b32.xlu0 %v6441_v16, %s6883_s20 }
 0x6c0   :  { %6447 = vrot.lane.b32.xlu1 %v6446_v50, %s6881_s10 }
 0x6c2   :  { %5820 = vmatmul.mubr.msk.f32.gmra.mrb[130].mxu1 %vm526_vm0, %v9067_v35 }
 0x6c3   :  { %5822 = vmatprep.mubr.msk.f32.mxu1 %vm526_vm0, %v8891_v41  ;;  %6452 = vrot.lane.b32.xlu0 %v6441_v16, %s6885_s25 }
 0x6c4   :  { %6457 = vrot.lane.b32.xlu1 %v6456_v28, %s6883_s20 }
 0x6c6   :  { %5823 = vmatmul.mubr.msk.f32.gmra.mrb[132].mxu1 %vm526_vm0, %v8912_v21 }
 0x6c7   :  { %5825 = vmatprep.mubr.msk.f32.mxu1 %vm526_vm0, %v8896_v63  ;;  %6462 = vrot.lane.b32.xlu0 %v6461_v5, %s6885_s25 }
 0x6c8   :  { %6467 = vrot.lane.b32.xlu1 %v6466_v46, %s6883_s20 }
 0x6ca   :  { %5826 = vmatmul.mubr.msk.f32.gmra.mrb[134].mxu1 %vm526_vm0, %v8727_v39 }
 0x6cb   :  { %6472 = vrot.lane.b32.xlu0 %v6471_v3, %s6881_s10  ;;  %5828 = vmatprep.mubr.f32.mxu1 %v6884_v38 }
 0x6cc   :  { %6477 = vrot.lane.b32.xlu1 %v6476_v22, %s6885_s25 }
 0x6ce   :  { %5829 = vmatmul.mubr.f32.gmra.mrb[136].mxu1 %v6884_v38 }
 0x6cf   :  { %6482 = vrot.lane.b32.xlu0 %v6481_v42, %s6883_s20  ;;  %5831 = vmatprep.mubr.f32.mxu1 %v6884_v38 }
 0x6d0   :  { %6487 = vrot.lane.b32.xlu1 %v6466_v46, %s6881_s10 }
 0x6d2   :  { %5832 = vmatmul.mubr.f32.gmra.mrb[138].mxu1 %v6884_v38 }
 0x6d3   :  { %6492 = vrot.lane.b32.xlu0 %v6491_v59, %s6885_s25 }
 0x6d4   :  { %6497 = vrot.lane.b32.xlu1 %v6496_v53, %s6883_s20 }
 0x6d7   :  { %6502 = vrot.lane.b32.xlu0 %v6481_v42, %s6881_s10 }
 0x6d8   :  { %6507 = vrot.lane.b32.xlu1 %v6506_v48, %s6885_s25 }
 0x6db   :  { %6512 = vrot.lane.b32.xlu0 %v6511_v54, %s6883_s20 }
 0x6dc   :  { %6517 = vrot.lane.b32.xlu1 %v6496_v53, %s6881_s10 }
 0x6df   :  { %6522 = vrot.lane.b32.xlu0 %v6521_v7, %s6885_s25 }
 0x6e0   :  { %6527 = vrot.lane.b32.xlu1 %v6526_v25, %s6883_s20 }
 0x6e3   :  { %6532 = vrot.lane.b32.xlu0 %v6511_v54, %s6881_s10 }
 0x6e4   :  { %6537 = vrot.lane.b32.xlu1 %v6536_v58, %s6885_s25 }
 0x6e7   :  { %6542 = vrot.lane.b32.xlu0 %v6541_v57, %s6883_s20 }
 0x6e8   :  { %6547 = vrot.lane.b32.xlu1 %v6526_v25, %s6881_s10 }
 0x6eb   :  { %6552 = vrot.lane.b32.xlu0 %v6551_v33, %s6885_s25 }
 0x6ec   :  { %6557 = vrot.lane.b32.xlu1 %v6556_v17, %s6885_s25 }
 0x6ef   :  { %2766 = vrot.lane.b32.xlu0 %v8912_v21, %s6881_s10 }
 0x6f2   :  { %v9151_v26 = vpop.permute.xlu1 %2953 }
 0x709   :  { %v6343_v14 = vpop.permute.xlu0 %6342 }
 0x70a   :  { %v6344_v27 = vunpack.i.l.bf16 %v6343_v14  ;;  %v6348_v57 = vpop.permute.xlu1 %6347  ;;  %v6345_v19 = vunpack.i.h.bf16 %v6343_v14 }
 0x70b   :  { %v6350_v55 = vunpack.i.h.bf16 %v6348_v57  ;;  %v6349_v60 = vunpack.i.l.bf16 %v6348_v57 }
 0x70c   :  { %v9154_v62 = vsel %vm526_vm0, 0.0, %v6344_v27  ;;  %v2985_v50 = vsel %vm526_vm0, 0.0, %v6345_v19 }
 0x70d   :  { %v6353_v39 = vpop.permute.xlu0 %6352  ;;  %v3014_v13 = vsel %vm559_vm1, %v9154_v62, %v6350_v55  ;;  %v3013_v45 = vsel %vm559_vm1, %v9154_v62, %v6349_v60 }
 0x70e   :  { %v6355_v63 = vunpack.i.h.bf16 %v6353_v39  ;;  %v6354_v41 = vunpack.i.l.bf16 %v6353_v39  ;;  %v6358_v33 = vpop.permute.xlu1 %6357 }
 0x70f   :  { %v6359_v21 = vunpack.i.l.bf16 %v6358_v33  ;;  %v6360_v42 = vunpack.i.h.bf16 %v6358_v33 }
 0x710   :  { %v3046_v6 = vsel %vm3045_vm2, %v3013_v45, %v6354_v41  ;;  %v3047_v29 = vsel %vm3045_vm2, %v3014_v13, %v6355_v63 }
 0x711   :  { %v6363_v37 = vpop.permute.xlu0 %6362  ;;  %5866 = vmatprep.mubr.f32.mxu1 %v3046_v6  ;;  %v2986_v24 = vsel %vm526_vm0, 0.0, %v6359_v21  ;;  %v2987_v27 = vsel %vm526_vm0, %v8772_v11, %v6360_v42 }
 0x712   :  { %v6365_v9 = vunpack.i.h.bf16 %v6363_v37  ;;  %v6364_v44 = vunpack.i.l.bf16 %v6363_v37  ;;  %v6368_v16 = vpop.permute.xlu1 %6367  ;;  %5867 = vmatmul.mubr.f32.vlgmr.msra.gmra.mrb[108].mxu1 %v3047_v29 }
 0x713   :  { %v6370_v32 = vunpack.i.h.bf16 %v6368_v16  ;;  %v6369_v28 = vunpack.i.l.bf16 %v6368_v16 }
 0x714   :  { %v3015_v43 = vsel %vm559_vm1, %v2985_v50, %v6364_v44  ;;  %v3016_v5 = vsel %vm559_vm1, %v2986_v24, %v6365_v9 }
 0x715   :  { %v6373_v46 = vpop.permute.xlu0 %6372  ;;  %v3048_v3 = vsel %vm3045_vm2, %v3015_v43, %v6369_v28  ;;  %v3049_v22 = vsel %vm3045_vm2, %v3016_v5, %v6370_v32 }
 0x716   :  { %v6374_v59 = vunpack.i.l.bf16 %v6373_v46  ;;  %v6378_v53 = vpop.permute.xlu1 %6377  ;;  %5869 = vmatprep.mubr.f32.mxu1 %v3048_v3  ;;  %v6375_v57 = vunpack.i.h.bf16 %v6373_v46 }
 0x717   :  { %v6380_v48 = vunpack.i.h.bf16 %v6378_v53  ;;  %v6379_v54 = vunpack.i.l.bf16 %v6378_v53  ;;  %5870 = vmatmul.mubr.f32.gmra.mrb[110].mxu1 %v3049_v22 }
 0x718   :  { %v2988_v7 = vsel %vm526_vm0, %v8775_v31, %v6374_v59  ;;  %v2989_v11 = vsel %vm526_vm0, %v8795_v12, %v6375_v57 }
 0x719   :  { %v6383_v25 = vpop.permute.xlu0 %6382  ;;  %v3017_v60 = vsel %vm559_vm1, %v2987_v27, %v6379_v54  ;;  %v3018_v39 = vsel %vm559_vm1, %v2988_v7, %v6380_v48 }
 0x71a   :  { %v6385_v58 = vunpack.i.h.bf16 %v6383_v25  ;;  %v6384_v17 = vunpack.i.l.bf16 %v6383_v25  ;;  %v6388_v14 = vpop.permute.xlu1 %6387 }
 0x71b   :  { %v6389_v55 = vunpack.i.l.bf16 %v6388_v14  ;;  %v6390_v50 = vunpack.i.h.bf16 %v6388_v14 }
 0x71c   :  { %v3050_v63 = vsel %vm3045_vm2, %v3017_v60, %v6384_v17  ;;  %v3051_v41 = vsel %vm3045_vm2, %v3018_v39, %v6385_v58 }
 0x71d   :  { %v6393_v33 = vpop.permute.xlu0 %6392  ;;  %5872 = vmatprep.mubr.f32.mxu1 %v3050_v63  ;;  %v2990_v6 = vsel %vm526_vm0, %v8811_v4, %v6389_v55  ;;  %v2991_v22 = vsel %vm526_vm0, %v8769_v8, %v6390_v50 }
 0x71e   :  { %v6395_v31 = vunpack.i.h.bf16 %v6393_v33  ;;  %v6394_v19 = vunpack.i.l.bf16 %v6393_v33  ;;  %v6398_v13 = vpop.permute.xlu1 %6397  ;;  %5873 = vmatmul.mubr.f32.gmra.mrb[112].mxu1 %v3051_v41 }
 0x71f   :  { %v6400_v21 = vunpack.i.h.bf16 %v6398_v13  ;;  %v6399_v45 = vunpack.i.l.bf16 %v6398_v13 }
 0x720   :  { %v3019_v29 = vsel %vm559_vm1, %v2989_v11, %v6394_v19  ;;  %v3020_v37 = vsel %vm559_vm1, %v2990_v6, %v6395_v31 }
 0x721   :  { %v6403_v9 = vpop.permute.xlu0 %6402  ;;  %v3052_v44 = vsel %vm3045_vm2, %v3019_v29, %v6399_v45  ;;  %v3053_v16 = vsel %vm3045_vm2, %v3020_v37, %v6400_v21 }
 0x722   :  { %v6404_v24 = vunpack.i.l.bf16 %v6403_v9  ;;  %v6408_v32 = vpop.permute.xlu1 %6407  ;;  %5875 = vmatprep.mubr.f32.mxu1 %v3052_v44  ;;  %v6405_v42 = vunpack.i.h.bf16 %v6403_v9 }
 0x723   :  { %v6410_v28 = vunpack.i.h.bf16 %v6408_v32  ;;  %v6409_v43 = vunpack.i.l.bf16 %v6408_v32  ;;  %5876 = vmatmul.mubr.f32.gmra.mrb[114].mxu1 %v3053_v16 }
 0x724   :  { %v2992_v12 = vsel %vm526_vm0, %v8780_v2, %v6404_v24  ;;  %v2993_v8 = vsel %vm526_vm0, %v8790_v36, %v6405_v42 }
 0x725   :  { %v6413_v4 = vpop.permute.xlu0 %6412  ;;  %v3021_v53 = vsel %vm559_vm1, %v2991_v22, %v6409_v43  ;;  %v3022_v48 = vsel %vm559_vm1, %v2992_v12, %v6410_v28 }
 0x726   :  { %v6415_v5 = vunpack.i.h.bf16 %v6413_v4  ;;  %v6414_v46 = vunpack.i.l.bf16 %v6413_v4  ;;  %v6418_v3 = vpop.permute.xlu1 %6417 }
 0x727   :  { %v6419_v59 = vunpack.i.l.bf16 %v6418_v3  ;;  %v6420_v33 = vunpack.i.h.bf16 %v6418_v3 }
 0x728   :  { %v3054_v54 = vsel %vm3045_vm2, %v3021_v53, %v6414_v46  ;;  %v3055_v7 = vsel %vm3045_vm2, %v3022_v48, %v6415_v5 }
 0x729   :  { %v6423_v25 = vpop.permute.xlu0 %6422  ;;  %5878 = vmatprep.mubr.f32.mxu1 %v3054_v54  ;;  %v2994_v57 = vsel %vm526_vm0, %v8817_v52, %v6419_v59  ;;  %v2995_v29 = vsel %vm526_vm0, %v8824_v49, %v6420_v33 }
 0x72a   :  { %v6425_v2 = vunpack.i.h.bf16 %v6423_v25  ;;  %v6424_v58 = vunpack.i.l.bf16 %v6423_v25  ;;  %v6428_v17 = vpop.permute.xlu1 %6427  ;;  %5879 = vmatmul.mubr.f32.gmra.mrb[116].mxu1 %v3055_v7 }
 0x72b   :  { %v6430_v14 = vunpack.i.h.bf16 %v6428_v17  ;;  %v6429_v27 = vunpack.i.l.bf16 %v6428_v17 }
 0x72c   :  { %v3023_v55 = vsel %vm559_vm1, %v2993_v8, %v6424_v58  ;;  %v3024_v60 = vsel %vm559_vm1, %v2994_v57, %v6425_v2 }
 0x72d   :  { %v6433_v39 = vpop.permute.xlu0 %6432  ;;  %v3056_v63 = vsel %vm3045_vm2, %v3023_v55, %v6429_v27  ;;  %v3057_v41 = vsel %vm3045_vm2, %v3024_v60, %v6430_v14 }
 0x72e   :  { %v6434_v31 = vunpack.i.l.bf16 %v6433_v39  ;;  %v6438_v19 = vpop.permute.xlu1 %6437  ;;  %5881 = vmatprep.mubr.f32.mxu1 %v3056_v63  ;;  %v6435_v37 = vunpack.i.h.bf16 %v6433_v39 }
 0x72f   :  { %v6440_v13 = vunpack.i.h.bf16 %v6438_v19  ;;  %v6439_v21 = vunpack.i.l.bf16 %v6438_v19  ;;  %5882 = vmatmul.mubr.f32.gmra.mrb[118].mxu1 %v3057_v41 }
 0x730   :  { %v2996_v36 = vsel %vm526_vm0, %v8846_v23, %v6434_v31  ;;  %v2997_v49 = vsel %vm526_vm0, %v8853_v15, %v6435_v37 }
 0x731   :  { %v6443_v52 = vpop.permute.xlu0 %6442  ;;  %v3025_v44 = vsel %vm559_vm1, %v2995_v29, %v6439_v21  ;;  %v3026_v16 = vsel %vm559_vm1, %v2996_v36, %v6440_v13 }
 0x732   :  { %v6445_v45 = vunpack.i.h.bf16 %v6443_v52  ;;  %v6444_v11 = vunpack.i.l.bf16 %v6443_v52  ;;  %v6448_v6 = vpop.permute.xlu1 %6447 }
 0x733   :  { %v6449_v9 = vunpack.i.l.bf16 %v6448_v6  ;;  %v6450_v7 = vunpack.i.h.bf16 %v6448_v6 }
 0x734   :  { %v3058_v50 = vsel %vm3045_vm2, %v3025_v44, %v6444_v11  ;;  %v3059_v24 = vsel %vm3045_vm2, %v3026_v16, %v6445_v45 }
 0x735   :  { %v6453_v32 = vpop.permute.xlu0 %6452  ;;  %5884 = vmatprep.mubr.f32.mxu1 %v3058_v50  ;;  %v2998_v4 = vsel %vm526_vm0, %v8877_v61, %v6449_v9  ;;  %v2999_v55 = vsel %vm526_vm0, 0.0, %v6450_v7 }
 0x736   :  { %v6455_v23 = vunpack.i.h.bf16 %v6453_v32  ;;  %v6454_v28 = vunpack.i.l.bf16 %v6453_v32  ;;  %v6458_v43 = vpop.permute.xlu1 %6457  ;;  %5885 = vmatmul.mubr.f32.gmra.mrb[120].mxu1 %v3059_v24 }
 0x737   :  { %v9208_v12 = vunpack.i.l.bf16 %v6458_v43  ;;  %v6460_v54 = vunpack.i.h.bf16 %v6458_v43 }
 0x738   :  { %v3027_v5 = vsel %vm559_vm1, %v2997_v49, %v6454_v28  ;;  %v3028_v46 = vsel %vm559_vm1, %v2998_v4, %v6455_v23 }
 0x739   :  { %v6463_v3 = vpop.permute.xlu0 %6462  ;;  %v3060_v22 = vsel %vm3045_vm2, %v3027_v5, %v9208_v12  ;;  %v3061_v42 = vsel %vm3045_vm2, %v3028_v46, %v9208_v12 }
 0x73a   :  { %v6465_v59 = vunpack.i.h.bf16 %v6463_v3  ;;  %v6464_v53 = vunpack.i.l.bf16 %v6463_v3  ;;  %v6468_v48 = vpop.permute.xlu1 %6467  ;;  %5887 = vmatprep.mubr.f32.mxu1 %v3060_v22 }
 0x73b   :  { %v6469_v15 = vunpack.i.l.bf16 %v6468_v48  ;;  %5888 = vmatmul.mubr.f32.gmra.mrb[122].mxu1 %v3061_v42  ;;  %v6470_v60 = vunpack.i.h.bf16 %v6468_v48 }
 0x73c   :  { %v3029_v61 = vsel %vm559_vm1, %v9154_v62, %v6464_v53  ;;  %v3030_v25 = vsel %vm559_vm1, %v9154_v62, %v6465_v59 }
 0x73d   :  { %v6473_v2 = vpop.permute.xlu0 %6472  ;;  %v3062_v58 = vsel %vm3045_vm2, %v3029_v61, %v6460_v54  ;;  %v3063_v17 = vsel %vm3045_vm2, %v3030_v25, %v6469_v15 }
 0x73e   :  { %v6474_v14 = vunpack.i.l.bf16 %v6473_v2  ;;  %v6478_v27 = vpop.permute.xlu1 %6477  ;;  %5890 = vmatprep.mubr.f32.mxu1 %v3062_v58  ;;  %v6475_v13 = vunpack.i.h.bf16 %v6473_v2 }
 0x73f   :  { %v6480_v8 = vunpack.i.h.bf16 %v6478_v27  ;;  %v6479_v57 = vunpack.i.l.bf16 %v6478_v27  ;;  %5891 = vmatmul.mubr.f32.gmra.mrb[124].mxu1 %v3063_v17 }
 0x740   :  { %v3000_v39 = vsel %vm526_vm0, 0.0, %v6474_v14  ;;  %v3001_v44 = vsel %vm526_vm0, %v9038_v56, %v6475_v13 }
 0x741   :  { %v6483_v63 = vpop.permute.xlu0 %6482  ;;  %v3031_v41 = vsel %vm559_vm1, %v2999_v55, %v6479_v57  ;;  %v3032_v36 = vsel %vm559_vm1, %v3000_v39, %v6480_v8 }
 0x742   :  { %v6484_v33 = vunpack.i.l.bf16 %v6483_v63  ;;  %v6488_v31 = vpop.permute.xlu1 %6487  ;;  %v3064_v19 = vsel %vm3045_vm2, %v3031_v41, %v6470_v60  ;;  %v6485_v37 = vunpack.i.h.bf16 %v6483_v63 }
 0x743   :  { %v6489_v21 = vunpack.i.l.bf16 %v6488_v31  ;;  %5893 = vmatprep.mubr.f32.mxu1 %v3064_v19  ;;  %v6490_v50 = vunpack.i.h.bf16 %v6488_v31 }
 0x744   :  { %v3065_v52 = vsel %vm3045_vm2, %v3032_v36, %v6484_v33 }
 0x745   :  { %v6493_v45 = vpop.permute.xlu0 %6492  ;;  %5894 = vmatmul.mubr.f32.gmra.mrb[126].mxu1 %v3065_v52  ;;  %v3002_v16 = vsel %vm526_vm0, %v9081_v34, %v6489_v21  ;;  %v3003_v34 = vsel %vm526_vm0, %v9060_v20, %v6490_v50 }
 0x746   :  { %v6495_v11 = vunpack.i.h.bf16 %v6493_v45  ;;  %v6494_v6 = vunpack.i.l.bf16 %v6493_v45  ;;  %v6498_v29 = vpop.permute.xlu1 %6497 }
 0x747   :  { %v6499_v9 = vunpack.i.l.bf16 %v6498_v29  ;;  %v6500_v56 = vunpack.i.h.bf16 %v6498_v29 }
 0x748   :  { %v3033_v24 = vsel %vm559_vm1, %v3001_v44, %v6494_v6  ;;  %v3034_v32 = vsel %vm559_vm1, %v3002_v16, %v6495_v11 }
 0x749   :  { %v6503_v23 = vpop.permute.xlu0 %6502  ;;  %v3066_v28 = vsel %vm3045_vm2, %v3033_v24, %v6485_v37  ;;  %v3067_v43 = vsel %vm3045_vm2, %v3034_v32, %v6499_v9 }
 0x74a   :  { %v6504_v49 = vunpack.i.l.bf16 %v6503_v23  ;;  %v6508_v4 = vpop.permute.xlu1 %6507  ;;  %5896 = vmatprep.mubr.f32.mxu1 %v3066_v28  ;;  %v6505_v54 = vunpack.i.h.bf16 %v6503_v23 }
 0x74b   :  { %v6510_v5 = vunpack.i.h.bf16 %v6508_v4  ;;  %v6509_v46 = vunpack.i.l.bf16 %v6508_v4  ;;  %5897 = vmatmul.mubr.f32.gmra.mrb[128].mxu1 %v3067_v43 }
 0x74c   :  { %v3004_v3 = vsel %vm526_vm0, %v9085_v1, %v6504_v49  ;;  %v3005_v14 = vsel %vm526_vm0, %v8978_v18, %v6505_v54 }
 0x74d   :  { %v6513_v22 = vpop.permute.xlu0 %6512  ;;  %v3035_v42 = vsel %vm559_vm1, %v3003_v34, %v6509_v46  ;;  %v3036_v7 = vsel %vm559_vm1, %v3004_v3, %v6510_v5 }
 0x74e   :  { %v6514_v59 = vunpack.i.l.bf16 %v6513_v22  ;;  %v6518_v53 = vpop.permute.xlu1 %6517  ;;  %v3068_v48 = vsel %vm3045_vm2, %v3035_v42, %v6500_v56  ;;  %v6515_v1 = vunpack.i.h.bf16 %v6513_v22 }
 0x74f   :  { %v6519_v15 = vunpack.i.l.bf16 %v6518_v53  ;;  %5899 = vmatprep.mubr.f32.mxu1 %v3068_v48  ;;  %v6520_v8 = vunpack.i.h.bf16 %v6518_v53 }
 0x750   :  { %v3069_v61 = vsel %vm3045_vm2, %v3036_v7, %v6514_v59 }
 0x751   :  { %v6523_v25 = vpop.permute.xlu0 %6522  ;;  %5900 = vmatmul.mubr.f32.gmra.mrb[130].mxu1 %v3069_v61  ;;  %v3006_v27 = vsel %vm526_vm0, %v9003_v30, %v6519_v15  ;;  %v3007_v30 = vsel %vm526_vm0, %v9008_v47, %v6520_v8 }
 0x752   :  { %v6525_v20 = vunpack.i.h.bf16 %v6523_v25  ;;  %v6524_v2 = vunpack.i.l.bf16 %v6523_v25  ;;  %v6528_v58 = vpop.permute.xlu1 %6527 }
 0x753   :  { %v6529_v17 = vunpack.i.l.bf16 %v6528_v58  ;;  %v6530_v18 = vunpack.i.h.bf16 %v6528_v58 }
 0x754   :  { %v3037_v57 = vsel %vm559_vm1, %v3005_v14, %v6524_v2  ;;  %v3038_v55 = vsel %vm559_vm1, %v3006_v27, %v6525_v20 }
 0x755   :  { %v6533_v60 = vpop.permute.xlu0 %6532  ;;  %v3070_v39 = vsel %vm3045_vm2, %v3037_v57, %v6515_v1  ;;  %v3071_v63 = vsel %vm3045_vm2, %v3038_v55, %v6529_v17  ;;  %v169_v57 = vld [vmem:[%s10573_s2 + $0x1a0] sm:$0xff]  ;;  %v170_v55 = vld [vmem:[%s10573_s2 + $0x1a8] sm:$0xff] }
 0x756   :  { %v6534_v41 = vunpack.i.l.bf16 %v6533_v60  ;;  %v6538_v33 = vpop.permute.xlu1 %6537  ;;  %5902 = vmatprep.mubr.f32.mxu1 %v3070_v39  ;;  %v6535_v6 = vunpack.i.h.bf16 %v6533_v60 }
 0x757   :  { %v6540_v31 = vunpack.i.h.bf16 %v6538_v33  ;;  %v6539_v19 = vunpack.i.l.bf16 %v6538_v33  ;;  %5903 = vmatmul.mubr.f32.gmra.mrb[132].mxu1 %v3071_v63 }
 0x758   :  { %v3008_v13 = vsel %vm526_vm0, %v9025_v51, %v6534_v41  ;;  %v3009_v23 = vsel %vm526_vm0, %v9028_v0, %v6535_v6 }
 0x759   :  { %v6543_v21 = vpop.permute.xlu0 %6542  ;;  %v3039_v36 = vsel %vm559_vm1, %v3007_v30, %v6539_v19  ;;  %v3040_v37 = vsel %vm559_vm1, %v3008_v13, %v6540_v31 }
 0x75a   :  { %v6544_v52 = vunpack.i.l.bf16 %v6543_v21  ;;  %v6548_v45 = vpop.permute.xlu1 %6547  ;;  %v3072_v11 = vsel %vm3045_vm2, %v3039_v36, %v6530_v18  ;;  %v6545_v24 = vunpack.i.h.bf16 %v6543_v21  ;;  %v6218_v21 = vpack.c.bf16 %v170_v55, %v169_v57 }
 0x75b   :  { %v6549_v29 = vunpack.i.l.bf16 %v6548_v45  ;;  %5905 = vmatprep.mubr.f32.mxu1 %v3072_v11  ;;  %v6550_v9 = vunpack.i.h.bf16 %v6548_v45 }
 0x75c   :  { %v3073_v44 = vsel %vm3045_vm2, %v3040_v37, %v6544_v52  ;;  %6219 = vmatprep.subr.bf16.mxu0 %v6218_v21  ;;  %v172_v37 = vld [vmem:[%s10573_s2 + $0x1b8] sm:$0xff] }
 0x75d   :  { %v6553_v16 = vpop.permute.xlu0 %6552  ;;  %5906 = vmatmul.mubr.f32.gmra.mrb[134].mxu1 %v3073_v44  ;;  %v3010_v28 = vsel %vm526_vm0, %v9046_v10, %v6549_v29  ;;  %v3011_v4 = vsel %vm526_vm0, %v9049_v40, %v6550_v9  ;;  %6221 = vmatpush3.bf16.msra.mxu0 %v6218_v21  ;;  %v171_v29 = vld [vmem:[%s10573_s2 + $0x1b0] sm:$0xff] }
 0x75e   :  { %v6555_v47 = vunpack.i.h.bf16 %v6553_v16  ;;  %v6554_v50 = vunpack.i.l.bf16 %v6553_v16  ;;  %v6558_v51 = vpop.permute.xlu1 %6557 }
 0x75f   :  { %v6559_v32 = vunpack.i.l.bf16 %v6558_v51  ;;  %v6560_v5 = vunpack.i.h.bf16 %v6558_v51 }
 0x760   :  { %v3041_v43 = vsel %vm559_vm1, %v3009_v23, %v6554_v50  ;;  %v3042_v49 = vsel %vm559_vm1, %v3010_v28, %v6555_v47  ;;  %v6222_v47 = vpack.c.bf16 %v172_v37, %v171_v29 }
 0x761   :  { %v2767_v46 = vpop.permute.xlu0 %2766  ;;  %v3074_v56 = vsel %vm3045_vm2, %v3041_v43, %v6545_v24  ;;  %v3075_v34 = vsel %vm3045_vm2, %v3042_v49, %v9151_v26  ;;  %v3043_v3 = vsel %vm559_vm1, %v3011_v4, %v6559_v32  ;;  %v9286_v26 = vld [vmem:[%s10575_s4] ss:$0 sm:$0xff] }
 0x762   :  { %v3012_v0 = vsel %vm526_vm0, %v9067_v35, %v2767_v46  ;;  %5908 = vmatprep.mubr.f32.mxu1 %v3074_v56  ;;  %v3076_v10 = vsel %vm3045_vm2, %v3043_v3, %v9208_v12  ;;  %6223 = vmatprep.subr.bf16.mxu0 %v6222_v47 }
 0x763   :  { %5909 = vmatmul.mubr.f32.gmra.mrb[136].mxu1 %v3075_v34  ;;  %v3044_v22 = vsel %vm559_vm1, %v3012_v0, %v6560_v5  ;;  %6225 = vmatpush3.bf16.msra.mxu0 %v6222_v47 }
 0x764   :  { %5911 = vmatprep.mubr.f32.mxu1 %v3076_v10  ;;  %v3077_v40 = vsel %vm3045_vm2, %v3044_v22, %v9208_v12 }
 0x767   :  { %5912 = vmatmul.mubr.f32.gmra.mrb[138].mxu1 %v3077_v40 }
 0x7e5   :  { %v5868_v42 = vpop.f32.mrb[108].mxu1 }
 0x7e6   :  { %v3583_v35 = vadd.f32 %v5868_v42, %v9286_v26  ;;  %v3419_v59 = vpop.f32.mrb[109].mxu1 }
 0x7e7   :  { %v3582_v53 = vadd.f32 %v9286_v26, %v3419_v59 }
 0x7e8   :  { %v9290_v48 = vmax.f32 %v3583_v35, 0.0 }
 0x7e9   :  { %v9292_v54 = vmax.f32 %v3582_v53, 0.0 }
 0x7ea   :  { %v3720_v15 = vmul.f32 %v9290_v48, %v9290_v48  ;;  %v5871_v7 = vpop.f32.mrb[110].mxu1  ;;  %v3649_v58 = vsel %vm526_vm0, %v9290_v48, 0.0 }
 0x7eb   :  { %v3719_v61 = vmul.f32 %v9292_v54, %v9292_v54  ;;  %v3585_v25 = vadd.f32 %v5871_v7, %v9286_v26  ;;  %v3429_v20 = vpop.f32.mrb[111].mxu1  ;;  %v3648_v1 = vsel %vm526_vm0, %v9292_v54, 0.0 }
 0x7ec   :  { %v3584_v2 = vadd.f32 %v9286_v26, %v3429_v20  ;;  %v3752_v14 = vsel %vm526_vm0, %v3720_v15, 0.0  ;;  %v3650_v60 = vadd.f32 %v3649_v58, %v3648_v1 }
 0x7ed   :  { %v9304_v17 = vmax.f32 %v3585_v25, 0.0  ;;  %v3751_v27 = vsel %vm526_vm0, %v3719_v61, 0.0 }
 0x7ee   :  { %v9308_v8 = vmax.f32 %v3584_v2, 0.0  ;;  %v3753_v41 = vadd.f32 %v3752_v14, %v3751_v27 }
 0x7ef   :  { %v3722_v33 = vmul.f32 %v9304_v17, %v9304_v17  ;;  %v3653_v11 = vsel %vm526_vm0, %v9304_v17, 0.0 }
 0x7f0   :  { %v3651_v39 = vsel %vm526_vm0, %v9308_v8, 0.0  ;;  %v3721_v63 = vmul.f32 %v9308_v8, %v9308_v8 }
 0x7f1   :  { %v5874_v31 = vpop.f32.mrb[112].mxu1  ;;  %v3652_v19 = vadd.f32 %v3651_v39, %v3650_v60  ;;  %v3756_v9 = vsel %vm526_vm0, %v3722_v33, 0.0 }
 0x7f2   :  { %v3754_v18 = vsel %vm526_vm0, %v3721_v63, 0.0  ;;  %v3587_v30 = vadd.f32 %v5874_v31, %v9286_v26  ;;  %v3439_v13 = vpop.f32.mrb[113].mxu1 }
 0x7f3   :  { %v3586_v36 = vadd.f32 %v9286_v26, %v3439_v13  ;;  %v3755_v52 = vadd.f32 %v3754_v18, %v3753_v41  ;;  %v3654_v44 = vadd.f32 %v3653_v11, %v3652_v19 }
 0x7f4   :  { %v9325_v45 = vmax.f32 %v3587_v30, 0.0 }
 0x7f5   :  { %v9329_v6 = vmax.f32 %v3586_v36, 0.0  ;;  %v3757_v43 = vadd.f32 %v3756_v9, %v3755_v52 }
 0x7f6   :  { %v5877_v16 = vpop.f32.mrb[114].mxu1  ;;  %v3724_v50 = vmul.f32 %v9325_v45, %v9325_v45  ;;  %v3657_v4 = vsel %vm526_vm0, %v9325_v45, 0.0 }
 0x7f7   :  { %v3655_v51 = vsel %vm526_vm0, %v9329_v6, 0.0  ;;  %v3723_v24 = vmul.f32 %v9329_v6, %v9329_v6  ;;  %v3589_v32 = vadd.f32 %v5877_v16, %v9286_v26  ;;  %v3449_v23 = vpop.f32.mrb[115].mxu1 }
 0x7f8   :  { %v3656_v28 = vadd.f32 %v3655_v51, %v3654_v44  ;;  %v3588_v49 = vadd.f32 %v9286_v26, %v3449_v23  ;;  %v3760_v0 = vsel %vm526_vm0, %v3724_v50, 0.0 }
 0x7f9   :  { %v3758_v5 = vsel %vm526_vm0, %v3723_v24, 0.0  ;;  %v9349_v56 = vmax.f32 %v3589_v32, 0.0 }
 0x7fa   :  { %v3759_v46 = vadd.f32 %v3758_v5, %v3757_v43  ;;  %v9351_v34 = vmax.f32 %v3588_v49, 0.0  ;;  %v3658_v3 = vadd.f32 %v3657_v4, %v3656_v28 }
 0x7fb   :  { %v3726_v35 = vmul.f32 %v9349_v56, %v9349_v56  ;;  %v3661_v2 = vsel %vm526_vm0, %v9349_v56, 0.0 }
 0x7fc   :  { %v3659_v10 = vsel %vm526_vm0, %v9351_v34, 0.0  ;;  %v3725_v22 = vmul.f32 %v9351_v34, %v9351_v34  ;;  %v3761_v40 = vadd.f32 %v3760_v0, %v3759_v46 }
 0x7fd   :  { %v5880_v42 = vpop.f32.mrb[116].mxu1  ;;  %v3660_v59 = vadd.f32 %v3659_v10, %v3658_v3  ;;  %v3764_v1 = vsel %vm526_vm0, %v3726_v35, 0.0 }
 0x7fe   :  { %v3762_v53 = vsel %vm526_vm0, %v3725_v22, 0.0  ;;  %v3591_v15 = vadd.f32 %v5880_v42, %v9286_v26  ;;  %v3459_v7 = vpop.f32.mrb[117].mxu1 }
 0x7ff   :  { %v3590_v61 = vadd.f32 %v9286_v26, %v3459_v7  ;;  %v3763_v25 = vadd.f32 %v3762_v53, %v3761_v40  ;;  %v3662_v14 = vadd.f32 %v3661_v2, %v3660_v59 }
 0x800   :  { %v9363_v20 = vmax.f32 %v3591_v15, 0.0 }
 0x801   :  { %v9367_v58 = vmax.f32 %v3590_v61, 0.0  ;;  %v3765_v33 = vadd.f32 %v3764_v1, %v3763_v25 }
 0x802   :  { %v5883_v27 = vpop.f32.mrb[118].mxu1  ;;  %v3728_v57 = vmul.f32 %v9363_v20, %v9363_v20  ;;  %v3665_v19 = vsel %vm526_vm0, %v9363_v20, 0.0 }
 0x803   :  { %v3663_v55 = vsel %vm526_vm0, %v9367_v58, 0.0  ;;  %v3727_v60 = vmul.f32 %v9367_v58, %v9367_v58  ;;  %v3593_v39 = vadd.f32 %v5883_v27, %v9286_v26  ;;  %v3469_v63 = vpop.f32.mrb[119].mxu1 }
 0x804   :  { %v3664_v41 = vadd.f32 %v3663_v55, %v3662_v14  ;;  %v3592_v31 = vadd.f32 %v9286_v26, %v3469_v63  ;;  %v3768_v52 = vsel %vm526_vm0, %v3728_v57, 0.0 }
 0x805   :  { %v3766_v18 = vsel %vm526_vm0, %v3727_v60, 0.0  ;;  %v9381_v13 = vmax.f32 %v3593_v39, 0.0 }
 0x806   :  { %v3767_v30 = vadd.f32 %v3766_v18, %v3765_v33  ;;  %v9383_v21 = vmax.f32 %v3592_v31, 0.0  ;;  %v3666_v36 = vadd.f32 %v3665_v19, %v3664_v41 }
 0x807   :  { %v3730_v44 = vmul.f32 %v9381_v13, %v9381_v13  ;;  %v3669_v28 = vsel %vm526_vm0, %v9381_v13, 0.0 }
 0x808   :  { %v3667_v11 = vsel %vm526_vm0, %v9383_v21, 0.0  ;;  %v3729_v29 = vmul.f32 %v9383_v21, %v9383_v21  ;;  %v3769_v37 = vadd.f32 %v3768_v52, %v3767_v30 }
 0x809   :  { %v5886_v9 = vpop.f32.mrb[120].mxu1  ;;  %v3668_v16 = vadd.f32 %v3667_v11, %v3666_v36  ;;  %v3772_v49 = vsel %vm526_vm0, %v3730_v44, 0.0 }
 0x80a   :  { %v3770_v47 = vsel %vm526_vm0, %v3729_v29, 0.0  ;;  %v3595_v50 = vadd.f32 %v5886_v9, %v9286_v26  ;;  %v3479_v51 = vpop.f32.mrb[121].mxu1 }
 0x80b   :  { %v3594_v24 = vadd.f32 %v9286_v26, %v3479_v51  ;;  %v3771_v32 = vadd.f32 %v3770_v47, %v3769_v37  ;;  %v3670_v4 = vadd.f32 %v3669_v28, %v3668_v16 }
 0x80c   :  { %v9395_v23 = vmax.f32 %v3595_v50, 0.0 }
 0x80d   :  { %v9399_v43 = vmax.f32 %v3594_v24, 0.0  ;;  %v3773_v42 = vadd.f32 %v3772_v49, %v3771_v32 }
 0x80e   :  { %v5889_v5 = vpop.f32.mrb[122].mxu1  ;;  %v3732_v46 = vmul.f32 %v9395_v23, %v9395_v23  ;;  %v3673_v59 = vsel %vm526_vm0, %v9395_v23, 0.0 }
 0x80f   :  { %v3671_v3 = vsel %vm526_vm0, %v9399_v43, 0.0  ;;  %v3731_v0 = vmul.f32 %v9399_v43, %v9399_v43  ;;  %v3597_v10 = vadd.f32 %v5889_v5, %v9286_v26  ;;  %v3489_v22 = vpop.f32.mrb[123].mxu1 }
 0x810   :  { %v3672_v40 = vadd.f32 %v3671_v3, %v3670_v4  ;;  %v3596_v35 = vadd.f32 %v9286_v26, %v3489_v22  ;;  %v3776_v1 = vsel %vm526_vm0, %v3732_v46, 0.0 }
 0x811   :  { %v3774_v53 = vsel %vm526_vm0, %v3731_v0, 0.0  ;;  %v9413_v15 = vmax.f32 %v3597_v10, 0.0 }
 0x812   :  { %v3775_v7 = vadd.f32 %v3774_v53, %v3773_v42  ;;  %v9415_v61 = vmax.f32 %v3596_v35, 0.0  ;;  %v3674_v25 = vadd.f32 %v3673_v59, %v3672_v40  ;;  %v5892_v2 = vpop.f32.mrb[124].mxu1 }
 0x813   :  { %v3734_v14 = vmul.f32 %v9413_v15, %v9413_v15  ;;  %v3599_v27 = vadd.f32 %v5892_v2, %v9286_v26  ;;  %v3499_v57 = vpop.f32.mrb[125].mxu1  ;;  %v3677_v33 = vsel %vm526_vm0, %v9413_v15, 0.0 }
 0x814   :  { %v3675_v55 = vsel %vm526_vm0, %v9415_v61, 0.0  ;;  %v3733_v60 = vmul.f32 %v9415_v61, %v9415_v61  ;;  %v3777_v39 = vadd.f32 %v3776_v1, %v3775_v7  ;;  %v3598_v63 = vadd.f32 %v9286_v26, %v3499_v57 }
 0x815   :  { %v3676_v41 = vadd.f32 %v3675_v55, %v3674_v25  ;;  %v9429_v19 = vmax.f32 %v3599_v27, 0.0  ;;  %v3780_v52 = vsel %vm526_vm0, %v3734_v14, 0.0 }
 0x816   :  { %v3778_v31 = vsel %vm526_vm0, %v3733_v60, 0.0  ;;  %v9431_v18 = vmax.f32 %v3598_v63, 0.0 }
 0x817   :  { %v3779_v30 = vadd.f32 %v3778_v31, %v3777_v39  ;;  %v3678_v36 = vadd.f32 %v3677_v33, %v3676_v41  ;;  %v3736_v50 = vmul.f32 %v9429_v19, %v9429_v19  ;;  %v3681_v49 = vsel %vm526_vm0, %v9429_v19, 0.0 }
 0x818   :  { %v3679_v11 = vsel %vm526_vm0, %v9431_v18, 0.0  ;;  %v3735_v29 = vmul.f32 %v9431_v18, %v9431_v18  ;;  %v5895_v37 = vpop.f32.mrb[126].mxu1 }
 0x819   :  { %v3680_v9 = vadd.f32 %v3679_v11, %v3678_v36  ;;  %v3781_v44 = vadd.f32 %v3780_v52, %v3779_v30  ;;  %v3601_v16 = vadd.f32 %v5895_v37, %v9286_v26  ;;  %v3509_v47 = vpop.f32.mrb[127].mxu1  ;;  %v3784_v46 = vsel %vm526_vm0, %v3736_v50, 0.0 }
 0x81a   :  { %v3782_v51 = vsel %vm526_vm0, %v3735_v29, 0.0  ;;  %v3600_v24 = vadd.f32 %v9286_v26, %v3509_v47 }
 0x81b   :  { %v3783_v32 = vadd.f32 %v3782_v51, %v3781_v44  ;;  %v9443_v28 = vmax.f32 %v3601_v16, 0.0  ;;  %v3682_v5 = vadd.f32 %v3681_v49, %v3680_v9 }
 0x81c   :  { %v9447_v4 = vmax.f32 %v3600_v24, 0.0 }
 0x81d   :  { %v3738_v3 = vmul.f32 %v9443_v28, %v9443_v28  ;;  %v3785_v42 = vadd.f32 %v3784_v46, %v3783_v32  ;;  %v3685_v53 = vsel %vm526_vm0, %v9443_v28, 0.0 }
 0x81e   :  { %v3683_v0 = vsel %vm526_vm0, %v9447_v4, 0.0  ;;  %v3737_v10 = vmul.f32 %v9447_v4, %v9447_v4  ;;  %v5898_v22 = vpop.f32.mrb[128].mxu1 }
 0x81f   :  { %v3684_v40 = vadd.f32 %v3683_v0, %v3682_v5  ;;  %v3603_v35 = vadd.f32 %v5898_v22, %v9286_v26  ;;  %v3519_v59 = vpop.f32.mrb[129].mxu1  ;;  %v3788_v27 = vsel %vm526_vm0, %v3738_v3, 0.0 }
 0x820   :  { %v3786_v7 = vsel %vm526_vm0, %v3737_v10, 0.0  ;;  %v3602_v25 = vadd.f32 %v9286_v26, %v3519_v59 }
 0x821   :  { %v3787_v2 = vadd.f32 %v3786_v7, %v3785_v42  ;;  %v9461_v1 = vmax.f32 %v3603_v35, 0.0  ;;  %v3686_v14 = vadd.f32 %v3685_v53, %v3684_v40 }
 0x822   :  { %v9464_v57 = vmax.f32 %v3602_v25, 0.0 }
 0x823   :  { %v3789_v55 = vadd.f32 %v3788_v27, %v3787_v2  ;;  %v3740_v60 = vmul.f32 %v9461_v1, %v9461_v1  ;;  %v3689_v36 = vsel %vm526_vm0, %v9461_v1, 0.0 }
 0x824   :  { %v3687_v39 = vsel %vm526_vm0, %v9464_v57, 0.0  ;;  %v3739_v63 = vmul.f32 %v9464_v57, %v9464_v57  ;;  %v5901_v41 = vpop.f32.mrb[130].mxu1 }
 0x825   :  { %v3688_v33 = vadd.f32 %v3687_v39, %v3686_v14  ;;  %v3605_v31 = vadd.f32 %v5901_v41, %v9286_v26  ;;  %v3529_v30 = vpop.f32.mrb[131].mxu1  ;;  %v3792_v44 = vsel %vm526_vm0, %v3740_v60, 0.0 }
 0x826   :  { %v3790_v52 = vsel %vm526_vm0, %v3739_v63, 0.0  ;;  %v3604_v11 = vadd.f32 %v9286_v26, %v3529_v30 }
 0x827   :  { %v3791_v29 = vadd.f32 %v3790_v52, %v3789_v55  ;;  %v9477_v37 = vmax.f32 %v3605_v31, 0.0  ;;  %v3690_v9 = vadd.f32 %v3689_v36, %v3688_v33 }
 0x828   :  { %v9480_v16 = vmax.f32 %v3604_v11, 0.0 }
 0x829   :  { %v3793_v47 = vadd.f32 %v3792_v44, %v3791_v29  ;;  %v3742_v50 = vmul.f32 %v9477_v37, %v9477_v37  ;;  %v3693_v3 = vsel %vm526_vm0, %v9477_v37, 0.0 }
 0x82a   :  { %v3691_v51 = vsel %vm526_vm0, %v9480_v16, 0.0  ;;  %v3741_v24 = vmul.f32 %v9480_v16, %v9480_v16  ;;  %v5904_v32 = vpop.f32.mrb[132].mxu1 }
 0x82b   :  { %v3692_v49 = vadd.f32 %v3691_v51, %v3690_v9  ;;  %v3607_v5 = vadd.f32 %v5904_v32, %v9286_v26  ;;  %v3539_v46 = vpop.f32.mrb[133].mxu1  ;;  %v3796_v35 = vsel %vm526_vm0, %v3742_v50, 0.0 }
 0x82c   :  { %v3794_v0 = vsel %vm526_vm0, %v3741_v24, 0.0  ;;  %v3606_v10 = vadd.f32 %v9286_v26, %v3539_v46 }
 0x82d   :  { %v3795_v22 = vadd.f32 %v3794_v0, %v3793_v47  ;;  %v9493_v40 = vmax.f32 %v3607_v5, 0.0  ;;  %v3694_v42 = vadd.f32 %v3693_v3, %v3692_v49 }
 0x82e   :  { %v9496_v59 = vmax.f32 %v3606_v10, 0.0 }
 0x82f   :  { %v3797_v53 = vadd.f32 %v3796_v35, %v3795_v22  ;;  %v3744_v7 = vmul.f32 %v9493_v40, %v9493_v40  ;;  %v3697_v39 = vsel %vm526_vm0, %v9493_v40, 0.0 }
 0x830   :  { %v3695_v25 = vsel %vm526_vm0, %v9496_v59, 0.0  ;;  %v3743_v2 = vmul.f32 %v9496_v59, %v9496_v59  ;;  %v5907_v14 = vpop.f32.mrb[134].mxu1 }
 0x831   :  { %v3696_v27 = vadd.f32 %v3695_v25, %v3694_v42  ;;  %v3609_v55 = vadd.f32 %v5907_v14, %v9286_v26  ;;  %v3549_v60 = vpop.f32.mrb[135].mxu1  ;;  %v3800_v36 = vsel %vm526_vm0, %v3744_v7, 0.0 }
 0x832   :  { %v3798_v63 = vsel %vm526_vm0, %v3743_v2, 0.0  ;;  %v3608_v41 = vadd.f32 %v9286_v26, %v3549_v60 }
 0x833   :  { %v3799_v33 = vadd.f32 %v3798_v63, %v3797_v53  ;;  %v9509_v31 = vmax.f32 %v3609_v55, 0.0  ;;  %v3698_v30 = vadd.f32 %v3697_v39, %v3696_v27 }
 0x834   :  { %v9512_v52 = vmax.f32 %v3608_v41, 0.0 }
 0x835   :  { %v3801_v11 = vadd.f32 %v3800_v36, %v3799_v33  ;;  %v3746_v29 = vmul.f32 %v9509_v31, %v9509_v31  ;;  %v3701_v32 = vsel %vm526_vm0, %v9509_v31, 0.0 }
 0x836   :  { %v3699_v9 = vsel %vm526_vm0, %v9512_v52, 0.0  ;;  %v3745_v44 = vmul.f32 %v9512_v52, %v9512_v52  ;;  %v5910_v47 = vpop.f32.mrb[136].mxu1 }
 0x837   :  { %v3700_v50 = vadd.f32 %v3699_v9, %v3698_v30  ;;  %v3611_v51 = vadd.f32 %v5910_v47, %v9286_v26  ;;  %v3559_v24 = vpop.f32.mrb[137].mxu1  ;;  %v3804_v10 = vsel %vm526_vm0, %v3746_v29, 0.0 }
 0x838   :  { %v3802_v49 = vsel %vm526_vm0, %v3745_v44, 0.0  ;;  %v3610_v5 = vadd.f32 %v9286_v26, %v3559_v24 }
 0x839   :  { %v3803_v46 = vadd.f32 %v3802_v49, %v3801_v11  ;;  %v9525_v3 = vmax.f32 %v3611_v51, 0.0  ;;  %v3702_v0 = vadd.f32 %v3701_v32, %v3700_v50 }
 0x83a   :  { %v9528_v22 = vmax.f32 %v3610_v5, 0.0  ;;  %v5913_v42 = vpop.f32.mrb[138].mxu1 }
 0x83b   :  { %v3805_v35 = vadd.f32 %v3804_v10, %v3803_v46  ;;  %v3613_v53 = vadd.f32 %v5913_v42, %v9286_v26  ;;  %v3569_v7 = vpop.f32.mrb[139].mxu1  ;;  %v3748_v25 = vmul.f32 %v9525_v3, %v9525_v3  ;;  %v3705_v39 = vsel %vm526_vm0, %v9525_v3, 0.0 }
 0x83c   :  { %v3703_v2 = vsel %vm526_vm0, %v9528_v22, 0.0  ;;  %v3747_v14 = vmul.f32 %v9528_v22, %v9528_v22  ;;  %v3612_v27 = vadd.f32 %v9286_v26, %v3569_v7 }
 0x83d   :  { %v3704_v55 = vadd.f32 %v3703_v2, %v3702_v0  ;;  %v9538_v60 = vmax.f32 %v3613_v53, 0.0  ;;  %v3808_v36 = vsel %vm526_vm0, %v3748_v25, 0.0  ;;  %v154_v53 = vld [vmem:[%s10573_s2 + $0x128] sm:$0xff] }
 0x83e   :  { %v3806_v63 = vsel %vm526_vm0, %v3747_v14, 0.0  ;;  %v9543_v41 = vmax.f32 %v3612_v27, 0.0 }
 0x83f   :  { %v3807_v33 = vadd.f32 %v3806_v63, %v3805_v35  ;;  %v3706_v30 = vadd.f32 %v3705_v39, %v3704_v55  ;;  %v3750_v11 = vmul.f32 %v9538_v60, %v9538_v60  ;;  %v3709_v47 = vsel %vm526_vm0, %v9538_v60, 0.0  ;;  %v153_v35 = vld [vmem:[%s10573_s2 + $0x120] sm:$0xff] }
 0x840   :  { %v3707_v26 = vsel %vm526_vm0, %v9543_v41, 0.0  ;;  %v3749_v29 = vmul.f32 %v9543_v41, %v9543_v41  ;;  %v9562_v2 = vpack.c.bf16 %v154_v53, %v153_v35 }
 0x841   :  { %v3708_v9 = vadd.f32 %v3707_v26, %v3706_v30  ;;  %v3809_v44 = vadd.f32 %v3808_v36, %v3807_v33  ;;  %v3812_v32 = vsel %vm526_vm0, %v3750_v11, 0.0 }
 0x842   :  { %v3810_v50 = vsel %vm526_vm0, %v3749_v29, 0.0  ;;  %6227 = vmatprep.subr.bf16.mxu0 %v9562_v2 }
 0x843   :  { %v3710_v51 = vadd.f32 %v3709_v47, %v3708_v9  ;;  %v3811_v24 = vadd.f32 %v3810_v50, %v3809_v44 }
 0x845   :  { %v3711_v49 = vrot.slane %v3710_v51, 4  ;;  %v3813_v5 = vadd.f32 %v3812_v32, %v3811_v24 }
 0x847   :  { %v3712_v46 = vadd.f32 %v3711_v49, %v3710_v51  ;;  %v3814_v0 = vrot.slane %v3813_v5, 4 }
 0x849   :  { %v3713_v10 = vrot.slane %v3712_v46, 2  ;;  %v3815_v42 = vadd.f32 %v3814_v0, %v3813_v5 }
 0x84b   :  { %v3714_v7 = vadd.f32 %v3713_v10, %v3712_v46  ;;  %v3816_v25 = vrot.slane %v3815_v42, 2 }
 0x84d   :  { %v3715_v14 = vrot.slane %v3714_v7, 1  ;;  %v3817_v27 = vadd.f32 %v3816_v25, %v3815_v42 }
 0x84f   :  { %v3716_v55 = vadd.f32 %v3715_v14, %v3714_v7  ;;  %v3818_v39 = vrot.slane %v3817_v27, 1 }
 0x851   :  { %v9565_v63 = vmul.f32 0.00390625, %v3716_v55  ;;  %v3819_v33 = vadd.f32 %v3818_v39, %v3817_v27 }
 0x853   :  { %v3820_v30 = vmul.f32 0.00390625, %v3819_v33  ;;  %v3821_v36 = vmul.f32 %v9565_v63, %v9565_v63  ;;  %v3853_v11 = vsub.f32 %v9543_v41, %v9565_v63  ;;  %v3839_v9 = vsub.f32 %v9431_v18, %v9565_v63 }
 0x854   :  { %v3841_v44 = vsub.f32 %v9447_v4, %v9565_v63  ;;  %v3842_v47 = vsub.f32 %v9443_v28, %v9565_v63  ;;  %v3843_v50 = vsub.f32 %v9464_v57, %v9565_v63  ;;  %v3844_v51 = vsub.f32 %v9461_v1, %v9565_v63 }
 0x855   :  { %v3822_v26 = vsub.f32 %v3820_v30, %v3821_v36  ;;  %v3845_v41 = vsub.f32 %v9480_v16, %v9565_v63  ;;  %v3846_v24 = vsub.f32 %v9477_v37, %v9565_v63  ;;  %v3847_v18 = vsub.f32 %v9496_v59, %v9565_v63 }
 0x856   :  { %v3848_v4 = vsub.f32 %v9493_v40, %v9565_v63  ;;  %v3849_v28 = vsub.f32 %v9512_v52, %v9565_v63  ;;  %v3850_v57 = vsub.f32 %v9509_v31, %v9565_v63  ;;  %v3851_v1 = vsub.f32 %v9528_v22, %v9565_v63 }
 0x857   :  { %v3855_v29 = vadd.f32 1e-05, %v3822_v26  ;;  %v3852_v16 = vsub.f32 %v9525_v3, %v9565_v63  ;;  %v3854_v37 = vsub.f32 %v9538_v60, %v9565_v63  ;;  %v3823_v59 = vsub.f32 %v9292_v54, %v9565_v63 }
 0x858   :  { %v3824_v40 = vsub.f32 %v9290_v48, %v9565_v63  ;;  %v3825_v52 = vsub.f32 %v9308_v8, %v9565_v63  ;;  %v3826_v31 = vsub.f32 %v9304_v17, %v9565_v63  ;;  %v3827_v22 = vsub.f32 %v9329_v6, %v9565_v63 }
 0x859   :  { %6789 = vrsqrt.f32 %v3855_v29  ;;  %v3828_v3 = vsub.f32 %v9325_v45, %v9565_v63  ;;  %v3829_v60 = vsub.f32 %v9351_v34, %v9565_v63  ;;  %v3830_v54 = vsub.f32 %v9349_v56, %v9565_v63 }
 0x85a   :  { %v3831_v48 = vsub.f32 %v9367_v58, %v9565_v63  ;;  %v3832_v8 = vsub.f32 %v9363_v20, %v9565_v63  ;;  %v3833_v17 = vsub.f32 %v9383_v21, %v9565_v63  ;;  %v3834_v6 = vsub.f32 %v9381_v13, %v9565_v63 }
 0x85b   :  { %v3835_v45 = vsub.f32 %v9399_v43, %v9565_v63  ;;  %v3836_v34 = vsub.f32 %v9395_v23, %v9565_v63  ;;  %v3837_v56 = vsub.f32 %v9415_v61, %v9565_v63  ;;  %v3838_v58 = vsub.f32 %v9413_v15, %v9565_v63 }
 0x85c   :  { %v3840_v20 = vsub.f32 %v9429_v19, %v9565_v63 }
 0x863   :  { %v6790_v32 = vpop.eup %6789 }
 0x864   :  { %v9633_v21 = vmul.f32 %v6790_v32, %v3853_v11  ;;  %v3857_v49 = vmul.f32 %v6790_v32, %v3823_v59  ;;  %v3858_v13 = vmul.f32 %v6790_v32, %v3824_v40  ;;  %v3859_v5 = vmul.f32 %v6790_v32, %v3825_v52 }
 0x865   :  { %v3860_v46 = vmul.f32 %v6790_v32, %v3826_v31  ;;  %v3861_v43 = vmul.f32 %v6790_v32, %v3827_v22  ;;  %v3862_v0 = vmul.f32 %v6790_v32, %v3828_v3  ;;  %v3863_v10 = vmul.f32 %v6790_v32, %v3829_v60 }
 0x866   :  { %v3864_v42 = vmul.f32 %v6790_v32, %v3830_v54  ;;  %v3865_v23 = vmul.f32 %v6790_v32, %v3831_v48  ;;  %v3866_v35 = vmul.f32 %v6790_v32, %v3832_v8  ;;  %v3867_v53 = vmul.f32 %v6790_v32, %v3833_v17 }
 0x867   :  { %v9635_v61 = vmul.f32 %v6790_v32, %v3834_v6  ;;  %v3869_v7 = vmul.f32 %v6790_v32, %v3835_v45  ;;  %v3870_v15 = vmul.f32 %v6790_v32, %v3836_v34  ;;  %v3871_v25 = vmul.f32 %v6790_v32, %v3837_v56 }
 0x868   :  { %v3872_v14 = vmul.f32 %v6790_v32, %v3838_v58  ;;  %v9637_v19 = vmul.f32 %v6790_v32, %v3839_v9  ;;  %v9639_v27 = vmul.f32 %v6790_v32, %v3840_v20  ;;  %v9641_v55 = vmul.f32 %v6790_v32, %v3841_v44 }
 0x869   :  { %v9643_v39 = vmul.f32 %v6790_v32, %v3842_v47  ;;  %v9645_v63 = vmul.f32 %v6790_v32, %v3843_v50  ;;  %v9647_v33 = vmul.f32 %v6790_v32, %v3844_v51  ;;  %v9649_v30 = vmul.f32 %v6790_v32, %v3845_v41  ;;  %v9666_v50 = vld [vmem:[%s10575_s4 + $0x1] ss:$0 sm:$0xff] }
 0x86a   :  { %v9651_v36 = vmul.f32 %v6790_v32, %v3846_v24  ;;  %v9653_v11 = vmul.f32 %v6790_v32, %v3847_v18  ;;  %v9655_v26 = vmul.f32 %v6790_v32, %v3848_v4  ;;  %v9657_v29 = vmul.f32 %v6790_v32, %v3849_v28  ;;  %v9673_v24 = vld [vmem:[%s10575_s4 + $0x2] ss:$0 sm:$0xff] }
 0x86b   :  { %v9659_v9 = vmul.f32 %v6790_v32, %v3850_v57  ;;  %v3885_v44 = vmul.f32 %v6790_v32, %v3851_v1  ;;  %v3886_v59 = vmul.f32 %v6790_v32, %v3852_v16  ;;  %v9661_v47 = vmul.f32 %v6790_v32, %v3854_v37  ;;  %v155_v16 = vld [vmem:[%s10573_s2 + $0x130] sm:$0xff]  ;;  %v156_v37 = vld [vmem:[%s10573_s2 + $0x138] sm:$0xff] }
 0x86c   :  { %v3897_v51 = vmul.f32 %v9666_v50, %v3861_v43  ;;  %v3898_v41 = vmul.f32 %v9666_v50, %v3862_v0  ;;  %v3893_v18 = vmul.f32 %v9666_v50, %v3857_v49  ;;  %v3894_v4 = vmul.f32 %v9666_v50, %v3858_v13  ;;  %v157_v13 = vld [vmem:[%s10573_s2 + $0x140] sm:$0xff] }
 0x86d   :  { %v3895_v28 = vmul.f32 %v9666_v50, %v3859_v5  ;;  %v3896_v57 = vmul.f32 %v9666_v50, %v3860_v46  ;;  %v3899_v1 = vmul.f32 %v9666_v50, %v3863_v10  ;;  %v3900_v54 = vmul.f32 %v9666_v50, %v3864_v42  ;;  %v158_v5 = vld [vmem:[%s10573_s2 + $0x148] sm:$0xff] }
 0x86e   :  { %v9687_v40 = vadd.f32 %v9673_v24, %v3897_v51  ;;  %v9690_v52 = vadd.f32 %v9673_v24, %v3898_v41  ;;  %v9693_v31 = vadd.f32 %v9673_v24, %v3893_v18  ;;  %v9696_v22 = vadd.f32 %v9673_v24, %v3894_v4 }
 0x86f   :  { %v9699_v3 = vadd.f32 %v9673_v24, %v3895_v28  ;;  %v9702_v60 = vadd.f32 %v9673_v24, %v3896_v57  ;;  %v9706_v48 = vadd.f32 %v9673_v24, %v3899_v1  ;;  %v6230_v8 = vpack.c.bf16 %v156_v37, %v155_v16  ;;  %v159_v28 = vld [vmem:[%s10573_s2 + $0x150] sm:$0xff]  ;;  %v161_v1 = vld [vmem:[%s10573_s2 + $0x160] sm:$0xff]  ;;  %v162_v16 = vld [vmem:[%s10573_s2 + $0x168] sm:$0xff] }
 0x870   :  { %5922 = vmatprep.mubr.msk.f32.mxu0 %vm526_vm0, %v9687_v40  ;;  %v3901_v17 = vmul.f32 %v9666_v50, %v3865_v23  ;;  %v6561_v45 = vpack.i.bf16 %v9696_v22, %v9693_v31  ;;  %v3902_v32 = vmul.f32 %v9666_v50, %v3866_v35  ;;  %v3903_v34 = vmul.f32 %v9666_v50, %v3867_v53 }
 0x871   :  { %5923 = vmatmul.mubr.msk.f32.vlgmr.msra.gmra.mrb[84].mxu0 %vm526_vm0, %v9690_v52  ;;  %v6566_v6 = vpack.i.bf16 %v9702_v60, %v9699_v3  ;;  %v9723_v56 = vadd.f32 %v9673_v24, %v3900_v54  ;;  %v3905_v58 = vmul.f32 %v9666_v50, %v3869_v7  ;;  %v3906_v49 = vmul.f32 %v9666_v50, %v3870_v15 }
 0x872   :  { %5925 = vmatprep.mubr.msk.f32.mxu0 %vm526_vm0, %v9706_v48  ;;  %6229 = vmatpush3.bf16.msra.mxu0 %v9562_v2  ;;  %v9727_v20 = vadd.f32 %v9673_v24, %v3901_v17  ;;  %v3907_v2 = vmul.f32 %v9666_v50, %v3871_v25  ;;  %v3908_v43 = vmul.f32 %v9666_v50, %v3872_v14 }
 0x873   :  { %6231 = vmatprep.subr.bf16.mxu0 %v6230_v8  ;;  %6567 = vrot.lane.b32.xlu1 %v6566_v6, %s6883_s20  ;;  %v3941_v46 = vadd.f32 %v9673_v24, %v3905_v58  ;;  %v3942_v0 = vadd.f32 %v9673_v24, %v3906_v49  ;;  %v3904_v42 = vmul.f32 %v9666_v50, %v9635_v61  ;;  %v165_v49 = vld [vmem:[%s10573_s2 + $0x180] sm:$0xff] }
 0x874   :  { %6562 = vrot.lane.b32.xlu0 %v6561_v45, %s6885_s25  ;;  %v3943_v10 = vadd.f32 %v9673_v24, %v3907_v2  ;;  %v9750_v23 = vadd.f32 %v9673_v24, %v3902_v32  ;;  %v3944_v35 = vadd.f32 %v9673_v24, %v3908_v43  ;;  %v6234_v53 = vpack.c.bf16 %v158_v5, %v157_v13  ;;  %v164_v32 = vld [vmem:[%s10573_s2 + $0x178] sm:$0xff]  ;;  %v166_v2 = vld [vmem:[%s10573_s2 + $0x188] sm:$0xff]  ;;  %v167_v43 = vld [vmem:[%s10573_s2 + $0x190] sm:$0xff] }
 0x875   :  { %5926 = vmatmul.mubr.msk.f32.gmra.mrb[86].mxu0 %vm526_vm0, %v9723_v56  ;;  %v9754_v7 = vadd.f32 %v9673_v24, %v3903_v34  ;;  %v9758_v15 = vpack.i.bf16 %v3942_v0, %v3941_v46  ;;  %v6581_v25 = vpack.i.bf16 %v9690_v52, %v9687_v40  ;;  %v3921_v14 = vmul.f32 %v9666_v50, %v3885_v44  ;;  %v160_v44 = vld [vmem:[%s10573_s2 + $0x158] sm:$0xff] }
 0x876   :  { %5928 = vmatprep.mubr.msk.f32.mxu0 %vm526_vm0, %v9727_v20  ;;  %6233 = vmatpush3.bf16.msra.mxu0 %v6230_v8  ;;  %v9762_v61 = vpack.i.bf16 %v3944_v35, %v3943_v10  ;;  %v3922_v51 = vmul.f32 %v9666_v50, %v3886_v59  ;;  %v9771_v41 = vadd.f32 %v9673_v24, %v3904_v42 }
 0x877   :  { %6577 = vrot.lane.b32.xlu1 %v6566_v6, %s6885_s25  ;;  %v3923_v18 = vmul.f32 %v9666_v50, %v9633_v21  ;;  %v3924_v4 = vmul.f32 %v9666_v50, %v9661_v47  ;;  %6235 = vmatprep.subr.bf16.mxu0 %v6234_v53  ;;  %v9786_v59 = vadd.f32 %v9673_v24, %v3921_v14 }
 0x878   :  { %6572 = vrot.lane.b32.xlu0 %v6561_v45, %s6881_s10  ;;  %v9789_v21 = vadd.f32 %v9673_v24, %v3922_v51  ;;  %v6596_v37 = vpack.i.bf16 %v9723_v56, %v9706_v48  ;;  %v6238_v54 = vpack.c.bf16 %v160_v44, %v159_v28  ;;  %v6242_v17 = vpack.c.bf16 %v162_v16, %v161_v1  ;;  %v163_v45 = vld [vmem:[%s10573_s2 + $0x170] sm:$0xff] }
 0x879   :  { %5929 = vmatmul.mubr.msk.f32.gmra.mrb[88].mxu0 %vm526_vm0, %v9750_v23  ;;  %v9794_v47 = vadd.f32 %v9673_v24, %v3923_v18  ;;  %v9797_v57 = vadd.f32 %v9673_v24, %v3924_v4  ;;  %v6246_v34 = vpack.c.bf16 %v164_v32, %v163_v45  ;;  %v6611_v58 = vpack.i.bf16 %v9750_v23, %v9727_v20 }
 0x87a   :  { %5931 = vmatprep.mubr.msk.f32.mxu0 %vm526_vm0, %v9754_v7  ;;  %6237 = vmatpush3.bf16.msra.mxu0 %v6234_v53  ;;  %v9812_v8 = vpack.i.bf16 %v9789_v21, %v9786_v59  ;;  %v3913_v13 = vmul.f32 %v9666_v50, %v9645_v63  ;;  %v6250_v5 = vpack.c.bf16 %v166_v2, %v165_v49  ;;  %v168_v63 = vld [vmem:[%s10573_s2 + $0x198] sm:$0xff] }
 0x87b   :  { %6587 = vrot.lane.b32.xlu1 %v6566_v6, %s6881_s10  ;;  %v9817_v6 = vpack.i.bf16 %v9797_v57, %v9794_v47  ;;  %6239 = vmatprep.subr.bf16.mxu0 %v6238_v54  ;;  %v3910_v18 = vmul.f32 %v9666_v50, %v9639_v27  ;;  %v3912_v4 = vmul.f32 %v9666_v50, %v9643_v39 }
 0x87c   :  { %6582 = vrot.lane.b32.xlu0 %v6581_v25, %s6883_s20  ;;  %v9857_v42 = vadd.f32 %v9673_v24, %v3913_v13  ;;  %v3920_v28 = vmul.f32 %v9666_v50, %v9659_v9 }
 0x87d   :  { %5932 = vmatmul.mubr.msk.f32.gmra.mrb[90].mxu0 %vm526_vm0, %v9771_v41  ;;  %v9929_v9 = vadd.f32 %v9673_v24, %v3912_v4 }
 0x87e   :  { %5934 = vmatprep.mubr.msk.f32.mxu0 %vm526_vm0, %v3941_v46  ;;  %6241 = vmatpush3.bf16.msra.mxu0 %v6238_v54  ;;  %v6626_v46 = vpack.i.bf16 %v9771_v41, %v9754_v7 }
 0x87f   :  { %6597 = vrot.lane.b32.xlu1 %v6596_v37, %s6883_s20  ;;  %6243 = vmatprep.subr.bf16.mxu0 %v6242_v17 }
 0x880   :  { %6592 = vrot.lane.b32.xlu0 %v6581_v25, %s6885_s25 }
 0x881   :  { %5935 = vmatmul.mubr.msk.f32.gmra.mrb[92].mxu0 %vm526_vm0, %v3942_v0  ;;  %v3914_v0 = vmul.f32 %v9666_v50, %v9647_v33  ;;  %v3916_v33 = vmul.f32 %v9666_v50, %v9651_v36  ;;  %v3918_v36 = vmul.f32 %v9666_v50, %v9655_v26  ;;  %v3909_v26 = vmul.f32 %v9666_v50, %v9637_v19 }
 0x882   :  { %5937 = vmatprep.mubr.msk.f32.mxu0 %vm526_vm0, %v3943_v10  ;;  %6245 = vmatpush3.bf16.msra.mxu0 %v6242_v17  ;;  %v3915_v10 = vmul.f32 %v9666_v50, %v9649_v30  ;;  %v3917_v30 = vmul.f32 %v9666_v50, %v9653_v11  ;;  %v3919_v11 = vmul.f32 %v9666_v50, %v9657_v29 }
 0x883   :  { %6607 = vrot.lane.b32.xlu1 %v6596_v37, %s6885_s25  ;;  %6247 = vmatprep.subr.bf16.mxu0 %v6246_v34  ;;  %v9867_v53 = vadd.f32 %v9673_v24, %v3914_v0  ;;  %v9883_v14 = vadd.f32 %v9673_v24, %v3916_v33  ;;  %v3911_v29 = vmul.f32 %v9666_v50, %v9641_v55 }
 0x884   :  { %6602 = vrot.lane.b32.xlu0 %v6581_v25, %s6881_s10  ;;  %v9872_v25 = vadd.f32 %v9673_v24, %v3915_v10  ;;  %v9888_v51 = vadd.f32 %v9673_v24, %v3917_v30  ;;  %v9908_v44 = vadd.f32 %v9673_v24, %v3918_v36  ;;  %v9911_v19 = vadd.f32 %v9673_v24, %v3919_v11 }
 0x885   :  { %5938 = vmatmul.mubr.msk.f32.gmra.mrb[94].mxu0 %vm526_vm0, %v3944_v35  ;;  %v6254_v35 = vpack.c.bf16 %v168_v63, %v167_v43  ;;  %v9920_v27 = vadd.f32 %v9673_v24, %v3909_v26  ;;  %v9923_v55 = vadd.f32 %v9673_v24, %v3910_v18  ;;  %v9926_v39 = vadd.f32 %v9673_v24, %v3911_v29 }
 0x886   :  { %5940 = vmatprep.mubr.f32.mxu0 %v6884_v38  ;;  %6249 = vmatpush3.bf16.msra.mxu0 %v6246_v34  ;;  %v9934_v50 = vadd.f32 %v9673_v24, %v3920_v28  ;;  %v6691_v24 = vpack.i.bf16 %v9867_v53, %v9857_v42 }
 0x887   :  { %6617 = vrot.lane.b32.xlu1 %v6596_v37, %s6881_s10  ;;  %6251 = vmatprep.subr.bf16.mxu0 %v6250_v5  ;;  %v6676_v1 = vpack.i.bf16 %v9929_v9, %v9926_v39  ;;  %v6671_v16 = vpack.i.bf16 %v9923_v55, %v9920_v27 }
 0x888   :  { %6612 = vrot.lane.b32.xlu0 %v6611_v58, %s6883_s20 }
 0x889   :  { %5941 = vmatmul.mubr.f32.gmra.mrb[96].mxu0 %v6884_v38 }
 0x88a   :  { %5943 = vmatprep.mubr.f32.mxu0 %v6884_v38  ;;  %6253 = vmatpush3.bf16.msra.mxu0 %v6250_v5 }
 0x88b   :  { %6627 = vrot.lane.b32.xlu1 %v6626_v46, %s6883_s20  ;;  %6255 = vmatprep.subr.bf16.mxu0 %v6254_v35 }
 0x88c   :  { %6622 = vrot.lane.b32.xlu0 %v6611_v58, %s6885_s25 }
 0x88d   :  { %5944 = vmatmul.mubr.f32.gmra.mrb[98].mxu0 %v6884_v38 }
 0x88e   :  { %5946 = vmatprep.mubr.msk.f32.mxu0 %vm526_vm0, %v9857_v42  ;;  %6257 = vmatpush3.bf16.msra.mxu0 %v6254_v35 }
 0x88f   :  { %6637 = vrot.lane.b32.xlu1 %v6626_v46, %s6885_s25 }
 0x890   :  { %6632 = vrot.lane.b32.xlu0 %v6611_v58, %s6881_s10 }
 0x891   :  { %5947 = vmatmul.mubr.msk.f32.gmra.mrb[100].mxu0 %vm526_vm0, %v9867_v53 }
 0x892   :  { %5949 = vmatprep.mubr.msk.f32.mxu0 %vm526_vm0, %v9872_v25 }
 0x893   :  { %6647 = vrot.lane.b32.xlu1 %v6626_v46, %s6881_s10 }
 0x894   :  { %6642 = vrot.lane.b32.xlu0 %v9758_v15, %s6883_s20 }
 0x895   :  { %5950 = vmatmul.mubr.msk.f32.gmra.mrb[102].mxu0 %vm526_vm0, %v9883_v14 }
 0x896   :  { %5952 = vmatprep.mubr.msk.f32.mxu0 %vm526_vm0, %v9888_v51 }
 0x897   :  { %6657 = vrot.lane.b32.xlu1 %v9762_v61, %s6883_s20 }
 0x898   :  { %6652 = vrot.lane.b32.xlu0 %v9758_v15, %s6885_s25 }
 0x899   :  { %5953 = vmatmul.mubr.msk.f32.gmra.mrb[104].mxu0 %vm526_vm0, %v9908_v44 }
 0x89a   :  { %5955 = vmatprep.mubr.msk.f32.mxu0 %vm526_vm0, %v9911_v19 }
 0x89b   :  { %6667 = vrot.lane.b32.xlu1 %v9762_v61, %s6885_s25  ;;  %v6721_v61 = vpack.i.bf16 %v9908_v44, %v9888_v51 }
 0x89c   :  { %6662 = vrot.lane.b32.xlu0 %v9758_v15, %s6881_s10  ;;  %v6706_v15 = vpack.i.bf16 %v9883_v14, %v9872_v25 }
 0x89d   :  { %5956 = vmatmul.mubr.msk.f32.gmra.mrb[106].mxu0 %vm526_vm0, %v9934_v50 }
 0x89e   :  { %5958 = vmatprep.mubr.msk.f32.mxu0 %vm526_vm0, %v9786_v59  ;;  %v6736_v59 = vpack.i.bf16 %v9934_v50, %v9911_v19 }
 0x89f   :  { %6677 = vrot.lane.b32.xlu1 %v6676_v1, %s6883_s20 }
 0x8a0   :  { %6672 = vrot.lane.b32.xlu0 %v6671_v16, %s6885_s25 }
 0x8a1   :  { %5959 = vmatmul.mubr.msk.f32.gmra.mrb[108].mxu0 %vm526_vm0, %v9789_v21 }
 0x8a2   :  { %5961 = vmatprep.mubr.msk.f32.mxu0 %vm526_vm0, %v9794_v47 }
 0x8a3   :  { %6687 = vrot.lane.b32.xlu1 %v6676_v1, %s6885_s25 }
 0x8a4   :  { %6682 = vrot.lane.b32.xlu0 %v6671_v16, %s6881_s10 }
 0x8a5   :  { %5962 = vmatmul.mubr.msk.f32.gmra.mrb[110].mxu0 %vm526_vm0, %v9797_v57 }
 0x8a6   :  { %5964 = vmatprep.mubr.f32.mxu0 %v6884_v38 }
 0x8a7   :  { %6697 = vrot.lane.b32.xlu1 %v6676_v1, %s6881_s10 }
 0x8a8   :  { %6692 = vrot.lane.b32.xlu0 %v6691_v24, %s6883_s20 }
 0x8a9   :  { %5965 = vmatmul.mubr.f32.gmra.mrb[112].mxu0 %v6884_v38 }
 0x8aa   :  { %5967 = vmatprep.mubr.f32.mxu0 %v6884_v38 }
 0x8ab   :  { %6707 = vrot.lane.b32.xlu1 %v6706_v15, %s6883_s20 }
 0x8ac   :  { %6702 = vrot.lane.b32.xlu0 %v6691_v24, %s6885_s25 }
 0x8ad   :  { %5968 = vmatmul.mubr.f32.gmra.mrb[114].mxu0 %v6884_v38 }
 0x8af   :  { %6717 = vrot.lane.b32.xlu1 %v6706_v15, %s6885_s25 }
 0x8b0   :  { %6712 = vrot.lane.b32.xlu0 %v6691_v24, %s6881_s10 }
 0x8b3   :  { %6727 = vrot.lane.b32.xlu1 %v6706_v15, %s6881_s10 }
 0x8b4   :  { %6722 = vrot.lane.b32.xlu0 %v6721_v61, %s6883_s20 }
 0x8b7   :  { %6737 = vrot.lane.b32.xlu1 %v6736_v59, %s6883_s20 }
 0x8b8   :  { %6732 = vrot.lane.b32.xlu0 %v6721_v61, %s6885_s25 }
 0x8bb   :  { %6747 = vrot.lane.b32.xlu1 %v6736_v59, %s6885_s25 }
 0x8bc   :  { %6742 = vrot.lane.b32.xlu0 %v6721_v61, %s6881_s10 }
 0x8bf   :  { %6757 = vrot.lane.b32.xlu1 %v6736_v59, %s6881_s10 }
 0x8c0   :  { %6752 = vrot.lane.b32.xlu0 %v9812_v8, %s6883_s20 }
 0x8c3   :  { %6767 = vrot.lane.b32.xlu1 %v9817_v6, %s6883_s20 }
 0x8c4   :  { %6762 = vrot.lane.b32.xlu0 %v9812_v8, %s6885_s25 }
 0x8c7   :  { %6777 = vrot.lane.b32.xlu1 %v9817_v6, %s6885_s25 }
 0x8c8   :  { %6772 = vrot.lane.b32.xlu0 %v9812_v8, %s6881_s10 }
 0x8e5   :  { %v6568_v38 = vpop.permute.xlu1 %6567 }
 0x8e6   :  { %v6563_v21 = vpop.permute.xlu0 %6562  ;;  %v6570_v47 = vunpack.i.h.bf16 %v6568_v38  ;;  %v6569_v57 = vunpack.i.l.bf16 %v6568_v38 }
 0x8e7   :  { %v6565_v37 = vunpack.i.h.bf16 %v6563_v21  ;;  %v6564_v54 = vunpack.i.l.bf16 %v6563_v21 }
 0x8e9   :  { %v4287_v17 = vsel %vm559_vm1, %v9154_v62, %v6565_v37  ;;  %v4286_v45 = vsel %vm559_vm1, %v9154_v62, %v6564_v54  ;;  %v6578_v32 = vpop.permute.xlu1 %6577 }
 0x8ea   :  { %v6573_v34 = vpop.permute.xlu0 %6572  ;;  %v4318_v58 = vsel %vm3045_vm2, %v4286_v45, %v6569_v57  ;;  %v4319_v6 = vsel %vm3045_vm2, %v4287_v17, %v6570_v47  ;;  %v6580_v2 = vunpack.i.h.bf16 %v6578_v32  ;;  %v6579_v13 = vunpack.i.l.bf16 %v6578_v32 }
 0x8eb   :  { %v6575_v49 = vunpack.i.h.bf16 %v6573_v34  ;;  %v6574_v8 = vunpack.i.l.bf16 %v6573_v34  ;;  %6002 = vmatprep.mubr.f32.mxu0 %v4318_v58 }
 0x8ec   :  { %6003 = vmatmul.mubr.f32.vlgmr.msra.gmra.mrb[84].mxu0 %v4319_v6 }
 0x8ed   :  { %v4259_v5 = vsel %vm526_vm0, 0.0, %v6575_v49  ;;  %v4258_v46 = vsel %vm526_vm0, 0.0, %v6574_v8  ;;  %v6588_v43 = vpop.permute.xlu1 %6587 }
 0x8ee   :  { %v6583_v63 = vpop.permute.xlu0 %6582  ;;  %v6590_v35 = vunpack.i.h.bf16 %v6588_v43  ;;  %v6589_v33 = vunpack.i.l.bf16 %v6588_v43  ;;  %v4288_v30 = vsel %vm559_vm1, %v4258_v46, %v6579_v13  ;;  %v4289_v36 = vsel %vm559_vm1, %v4259_v5, %v6580_v2 }
 0x8ef   :  { %v6585_v0 = vunpack.i.h.bf16 %v6583_v63  ;;  %v6584_v10 = vunpack.i.l.bf16 %v6583_v63 }
 0x8f0   :  { %v4260_v24 = vsel %vm526_vm0, %v9693_v31, %v6589_v33  ;;  %v4261_v15 = vsel %vm526_vm0, %v9696_v22, %v6590_v35 }
 0x8f1   :  { %v4320_v11 = vsel %vm3045_vm2, %v4288_v30, %v6584_v10  ;;  %v4321_v26 = vsel %vm3045_vm2, %v4289_v36, %v6585_v0  ;;  %v6598_v18 = vpop.permute.xlu1 %6597 }
 0x8f2   :  { %v6593_v29 = vpop.permute.xlu0 %6592  ;;  %6005 = vmatprep.mubr.f32.mxu0 %v4320_v11  ;;  %v6600_v4 = vunpack.i.h.bf16 %v6598_v18  ;;  %v6599_v28 = vunpack.i.l.bf16 %v6598_v18 }
 0x8f3   :  { %v6595_v1 = vunpack.i.h.bf16 %v6593_v29  ;;  %v6594_v16 = vunpack.i.l.bf16 %v6593_v29  ;;  %6006 = vmatmul.mubr.f32.gmra.mrb[86].mxu0 %v4321_v26 }
 0x8f5   :  { %v4290_v61 = vsel %vm559_vm1, %v4260_v24, %v6594_v16  ;;  %v4291_v59 = vsel %vm559_vm1, %v4261_v15, %v6595_v1  ;;  %v6608_v38 = vpop.permute.xlu1 %6607 }
 0x8f6   :  { %v6603_v21 = vpop.permute.xlu0 %6602  ;;  %v4322_v47 = vsel %vm3045_vm2, %v4290_v61, %v6599_v28  ;;  %v4323_v57 = vsel %vm3045_vm2, %v4291_v59, %v6600_v4  ;;  %v6610_v17 = vunpack.i.h.bf16 %v6608_v38  ;;  %v6609_v45 = vunpack.i.l.bf16 %v6608_v38 }
 0x8f7   :  { %v6605_v37 = vunpack.i.h.bf16 %v6603_v21  ;;  %v6604_v54 = vunpack.i.l.bf16 %v6603_v21  ;;  %6008 = vmatprep.mubr.f32.mxu0 %v4322_v47 }
 0x8f8   :  { %6009 = vmatmul.mubr.f32.gmra.mrb[88].mxu0 %v4323_v57 }
 0x8f9   :  { %v4262_v31 = vsel %vm526_vm0, %v9699_v3, %v6604_v54  ;;  %v4263_v22 = vsel %vm526_vm0, %v9702_v60, %v6605_v37  ;;  %v6618_v32 = vpop.permute.xlu1 %6617 }
 0x8fa   :  { %v6613_v34 = vpop.permute.xlu0 %6612  ;;  %v6620_v49 = vunpack.i.h.bf16 %v6618_v32  ;;  %v6619_v8 = vunpack.i.l.bf16 %v6618_v32  ;;  %v4292_v2 = vsel %vm559_vm1, %v4262_v31, %v6609_v45  ;;  %v4293_v13 = vsel %vm559_vm1, %v4263_v22, %v6610_v17 }
 0x8fb   :  { %v6615_v58 = vunpack.i.h.bf16 %v6613_v34  ;;  %v6614_v6 = vunpack.i.l.bf16 %v6613_v34 }
 0x8fc   :  { %v4264_v35 = vsel %vm526_vm0, %v9687_v40, %v6619_v8  ;;  %v4265_v33 = vsel %vm526_vm0, %v9690_v52, %v6620_v49 }
 0x8fd   :  { %v4324_v5 = vsel %vm3045_vm2, %v4292_v2, %v6614_v6  ;;  %v4325_v46 = vsel %vm3045_vm2, %v4293_v13, %v6615_v58  ;;  %v6628_v43 = vpop.permute.xlu1 %6627 }
 0x8fe   :  { %v6623_v63 = vpop.permute.xlu0 %6622  ;;  %6011 = vmatprep.mubr.f32.mxu0 %v4324_v5  ;;  %v6630_v3 = vunpack.i.h.bf16 %v6628_v43  ;;  %v6629_v0 = vunpack.i.l.bf16 %v6628_v43 }
 0x8ff   :  { %v6625_v60 = vunpack.i.h.bf16 %v6623_v63  ;;  %v6624_v10 = vunpack.i.l.bf16 %v6623_v63  ;;  %6012 = vmatmul.mubr.f32.gmra.mrb[90].mxu0 %v4325_v46 }
 0x901   :  { %v4294_v30 = vsel %vm559_vm1, %v4264_v35, %v6624_v10  ;;  %v4295_v36 = vsel %vm559_vm1, %v4265_v33, %v6625_v60  ;;  %v6638_v11 = vpop.permute.xlu1 %6637 }
 0x902   :  { %v6633_v26 = vpop.permute.xlu0 %6632  ;;  %v4326_v18 = vsel %vm3045_vm2, %v4294_v30, %v6629_v0  ;;  %v4327_v29 = vsel %vm3045_vm2, %v4295_v36, %v6630_v3  ;;  %v6640_v1 = vunpack.i.h.bf16 %v6638_v11  ;;  %v6639_v16 = vunpack.i.l.bf16 %v6638_v11 }
 0x903   :  { %v6635_v4 = vunpack.i.h.bf16 %v6633_v26  ;;  %v6634_v28 = vunpack.i.l.bf16 %v6633_v26  ;;  %6014 = vmatprep.mubr.f32.mxu0 %v4326_v18 }
 0x904   :  { %6015 = vmatmul.mubr.f32.gmra.mrb[92].mxu0 %v4327_v29 }
 0x905   :  { %v4266_v40 = vsel %vm526_vm0, %v9706_v48, %v6634_v28  ;;  %v4267_v52 = vsel %vm526_vm0, %v9723_v56, %v6635_v4  ;;  %v6648_v24 = vpop.permute.xlu1 %6647 }
 0x906   :  { %v6643_v15 = vpop.permute.xlu0 %6642  ;;  %v6650_v38 = vunpack.i.h.bf16 %v6648_v24  ;;  %v6649_v21 = vunpack.i.l.bf16 %v6648_v24  ;;  %v4296_v47 = vsel %vm559_vm1, %v4266_v40, %v6639_v16  ;;  %v4297_v57 = vsel %vm559_vm1, %v4267_v52, %v6640_v1 }
 0x907   :  { %v6645_v61 = vunpack.i.h.bf16 %v6643_v15  ;;  %v6644_v59 = vunpack.i.l.bf16 %v6643_v15 }
 0x908   :  { %v4268_v32 = vsel %vm526_vm0, %v9727_v20, %v6649_v21  ;;  %v4269_v34 = vsel %vm526_vm0, %v9750_v23, %v6650_v38 }
 0x909   :  { %v4328_v37 = vsel %vm3045_vm2, %v4296_v47, %v6644_v59  ;;  %v4329_v54 = vsel %vm3045_vm2, %v4297_v57, %v6645_v61  ;;  %v6658_v17 = vpop.permute.xlu1 %6657 }
 0x90a   :  { %v6653_v45 = vpop.permute.xlu0 %6652  ;;  %6017 = vmatprep.mubr.f32.mxu0 %v4328_v37  ;;  %v6660_v48 = vunpack.i.h.bf16 %v6658_v17  ;;  %v6659_v31 = vunpack.i.l.bf16 %v6658_v17 }
 0x90b   :  { %v6655_v56 = vunpack.i.h.bf16 %v6653_v45  ;;  %v6654_v22 = vunpack.i.l.bf16 %v6653_v45  ;;  %6018 = vmatmul.mubr.f32.gmra.mrb[94].mxu0 %v4329_v54 }
 0x90d   :  { %v4298_v58 = vsel %vm559_vm1, %v4268_v32, %v6654_v22  ;;  %v4299_v6 = vsel %vm559_vm1, %v4269_v34, %v6655_v56  ;;  %v6668_v49 = vpop.permute.xlu1 %6667 }
 0x90e   :  { %v6663_v8 = vpop.permute.xlu0 %6662  ;;  %v4330_v2 = vsel %vm3045_vm2, %v4298_v58, %v6659_v31  ;;  %v4331_v13 = vsel %vm3045_vm2, %v4299_v6, %v6660_v48  ;;  %v6670_v5 = vunpack.i.h.bf16 %v6668_v49  ;;  %v6669_v46 = vunpack.i.l.bf16 %v6668_v49 }
 0x90f   :  { %v6665_v43 = vunpack.i.h.bf16 %v6663_v8  ;;  %v6664_v63 = vunpack.i.l.bf16 %v6663_v8  ;;  %6020 = vmatprep.mubr.f32.mxu0 %v4330_v2 }
 0x910   :  { %6021 = vmatmul.mubr.f32.gmra.mrb[96].mxu0 %v4331_v13 }
 0x911   :  { %v4270_v20 = vsel %vm526_vm0, %v9754_v7, %v6664_v63  ;;  %v4271_v23 = vsel %vm526_vm0, %v9771_v41, %v6665_v43  ;;  %v6678_v3 = vpop.permute.xlu1 %6677 }
 0x912   :  { %v6673_v0 = vpop.permute.xlu0 %6672  ;;  %v4300_v60 = vsel %vm559_vm1, %v4270_v20, %v6669_v46  ;;  %v4301_v10 = vsel %vm559_vm1, %v4271_v23, %v6670_v5  ;;  %v6679_v35 = vunpack.i.l.bf16 %v6678_v3  ;;  %v6680_v26 = vunpack.i.h.bf16 %v6678_v3 }
 0x913   :  { %v6675_v33 = vunpack.i.h.bf16 %v6673_v0  ;;  %v6674_v30 = vunpack.i.l.bf16 %v6673_v0  ;;  %v4332_v36 = vsel %vm3045_vm2, %v4300_v60, %v9208_v12  ;;  %v4333_v11 = vsel %vm3045_vm2, %v4301_v10, %v9208_v12 }
 0x914   :  { %6023 = vmatprep.mubr.f32.mxu0 %v4332_v36 }
 0x915   :  { %v4302_v7 = vsel %vm559_vm1, %v9154_v62, %v6674_v30  ;;  %6024 = vmatmul.mubr.f32.gmra.mrb[98].mxu0 %v4333_v11  ;;  %v6688_v41 = vpop.permute.xlu1 %6687  ;;  %v4303_v4 = vsel %vm559_vm1, %v9154_v62, %v6675_v33 }
 0x916   :  { %v6683_v18 = vpop.permute.xlu0 %6682  ;;  %v4334_v29 = vsel %vm3045_vm2, %v4302_v7, %v6679_v35  ;;  %v6690_v16 = vunpack.i.h.bf16 %v6688_v41  ;;  %v6689_v40 = vunpack.i.l.bf16 %v6688_v41  ;;  %v4335_v15 = vsel %vm3045_vm2, %v4303_v4, %v6680_v26 }
 0x917   :  { %v6685_v28 = vunpack.i.h.bf16 %v6683_v18  ;;  %v6684_v1 = vunpack.i.l.bf16 %v6683_v18  ;;  %6026 = vmatprep.mubr.f32.mxu0 %v4334_v29 }
 0x919   :  { %v4273_v52 = vsel %vm526_vm0, 0.0, %v6685_v28  ;;  %v4272_v24 = vsel %vm526_vm0, 0.0, %v6684_v1  ;;  %6027 = vmatmul.mubr.f32.gmra.mrb[100].mxu0 %v4335_v15  ;;  %v6698_v61 = vpop.permute.xlu1 %6697 }
 0x91a   :  { %v6693_v59 = vpop.permute.xlu0 %6692  ;;  %v6700_v47 = vunpack.i.h.bf16 %v6698_v61  ;;  %v6699_v57 = vunpack.i.l.bf16 %v6698_v61  ;;  %v4304_v62 = vsel %vm559_vm1, %v4272_v24, %v6689_v40  ;;  %v4305_v37 = vsel %vm559_vm1, %v4273_v52, %v6690_v16 }
 0x91b   :  { %v6695_v38 = vunpack.i.h.bf16 %v6693_v59  ;;  %v6694_v21 = vunpack.i.l.bf16 %v6693_v59 }
 0x91c   :  { %v4274_v34 = vsel %vm526_vm0, %v9920_v27, %v6699_v57  ;;  %v4275_v58 = vsel %vm526_vm0, %v9923_v55, %v6700_v47 }
 0x91d   :  { %v4336_v54 = vsel %vm3045_vm2, %v4304_v62, %v6694_v21  ;;  %v4337_v17 = vsel %vm3045_vm2, %v4305_v37, %v6695_v38  ;;  %v6708_v45 = vpop.permute.xlu1 %6707 }
 0x91e   :  { %v6703_v48 = vpop.permute.xlu0 %6702  ;;  %6029 = vmatprep.mubr.f32.mxu0 %v4336_v54  ;;  %v6710_v31 = vunpack.i.h.bf16 %v6708_v45  ;;  %v6709_v56 = vunpack.i.l.bf16 %v6708_v45 }
 0x91f   :  { %v6705_v22 = vunpack.i.h.bf16 %v6703_v48  ;;  %v6704_v32 = vunpack.i.l.bf16 %v6703_v48  ;;  %6030 = vmatmul.mubr.f32.gmra.mrb[102].mxu0 %v4337_v17 }
 0x921   :  { %v4306_v6 = vsel %vm559_vm1, %v4274_v34, %v6704_v32  ;;  %v4307_v49 = vsel %vm559_vm1, %v4275_v58, %v6705_v22  ;;  %v6718_v8 = vpop.permute.xlu1 %6717 }
 0x922   :  { %v6713_v2 = vpop.permute.xlu0 %6712  ;;  %v4338_v13 = vsel %vm3045_vm2, %v4306_v6, %v6709_v56  ;;  %v4339_v5 = vsel %vm3045_vm2, %v4307_v49, %v6710_v31  ;;  %v6720_v63 = vunpack.i.h.bf16 %v6718_v8  ;;  %v6719_v20 = vunpack.i.l.bf16 %v6718_v8 }
 0x923   :  { %v6715_v46 = vunpack.i.h.bf16 %v6713_v2  ;;  %v6714_v43 = vunpack.i.l.bf16 %v6713_v2  ;;  %6032 = vmatprep.mubr.f32.mxu0 %v4338_v13 }
 0x924   :  { %6033 = vmatmul.mubr.f32.gmra.mrb[104].mxu0 %v4339_v5 }
 0x925   :  { %v4276_v27 = vsel %vm526_vm0, %v9926_v39, %v6714_v43  ;;  %v4277_v55 = vsel %vm526_vm0, %v9929_v9, %v6715_v46  ;;  %v6728_v23 = vpop.permute.xlu1 %6727 }
 0x926   :  { %v6723_v3 = vpop.permute.xlu0 %6722  ;;  %v6730_v10 = vunpack.i.h.bf16 %v6728_v23  ;;  %v6729_v35 = vunpack.i.l.bf16 %v6728_v23  ;;  %v4308_v33 = vsel %vm559_vm1, %v4276_v27, %v6719_v20  ;;  %v4309_v30 = vsel %vm559_vm1, %v4277_v55, %v6720_v63 }
 0x927   :  { %v6725_v0 = vunpack.i.h.bf16 %v6723_v3  ;;  %v6724_v60 = vunpack.i.l.bf16 %v6723_v3 }
 0x928   :  { %v4278_v29 = vsel %vm526_vm0, %v9857_v42, %v6729_v35  ;;  %v4279_v4 = vsel %vm526_vm0, %v9867_v53, %v6730_v10 }
 0x929   :  { %v4340_v36 = vsel %vm3045_vm2, %v4308_v33, %v6724_v60  ;;  %v4341_v11 = vsel %vm3045_vm2, %v4309_v30, %v6725_v0  ;;  %v6738_v26 = vpop.permute.xlu1 %6737  ;;  %v10120_v60 = vld [vmem:[%s10575_s4 + $0x3] ss:$0 sm:$0xff] }
 0x92a   :  { %v6733_v7 = vpop.permute.xlu0 %6732  ;;  %6035 = vmatprep.mubr.f32.mxu0 %v4340_v36  ;;  %v6740_v39 = vunpack.i.h.bf16 %v6738_v26  ;;  %v6739_v41 = vunpack.i.l.bf16 %v6738_v26 }
 0x92b   :  { %v6735_v9 = vunpack.i.h.bf16 %v6733_v7  ;;  %v6734_v18 = vunpack.i.l.bf16 %v6733_v7  ;;  %6036 = vmatmul.mubr.f32.gmra.mrb[106].mxu0 %v4341_v11 }
 0x92d   :  { %v4310_v28 = vsel %vm559_vm1, %v4278_v29, %v6734_v18  ;;  %v4311_v1 = vsel %vm559_vm1, %v4279_v4, %v6735_v9  ;;  %v6748_v16 = vpop.permute.xlu1 %6747 }
 0x92e   :  { %v6743_v40 = vpop.permute.xlu0 %6742  ;;  %v4342_v52 = vsel %vm3045_vm2, %v4310_v28, %v6739_v41  ;;  %v4343_v24 = vsel %vm3045_vm2, %v4311_v1, %v6740_v39  ;;  %v6750_v59 = vunpack.i.h.bf16 %v6748_v16  ;;  %v6749_v38 = vunpack.i.l.bf16 %v6748_v16 }
 0x92f   :  { %v6745_v15 = vunpack.i.h.bf16 %v6743_v40  ;;  %v6744_v61 = vunpack.i.l.bf16 %v6743_v40  ;;  %6038 = vmatprep.mubr.f32.mxu0 %v4342_v52 }
 0x930   :  { %6039 = vmatmul.mubr.f32.gmra.mrb[108].mxu0 %v4343_v24 }
 0x931   :  { %v4280_v42 = vsel %vm526_vm0, %v9872_v25, %v6744_v61  ;;  %v4281_v53 = vsel %vm526_vm0, %v9883_v14, %v6745_v15  ;;  %v6758_v21 = vpop.permute.xlu1 %6757 }
 0x932   :  { %v6753_v47 = vpop.permute.xlu0 %6752  ;;  %v6760_v37 = vunpack.i.h.bf16 %v6758_v21  ;;  %v6759_v54 = vunpack.i.l.bf16 %v6758_v21  ;;  %v4312_v17 = vsel %vm559_vm1, %v4280_v42, %v6749_v38  ;;  %v4313_v45 = vsel %vm559_vm1, %v4281_v53, %v6750_v59 }
 0x933   :  { %v6755_v57 = vunpack.i.h.bf16 %v6753_v47  ;;  %v6754_v62 = vunpack.i.l.bf16 %v6753_v47 }
 0x934   :  { %v4282_v58 = vsel %vm526_vm0, %v9888_v51, %v6759_v54  ;;  %v4283_v6 = vsel %vm526_vm0, %v9908_v44, %v6760_v37 }
 0x935   :  { %v4344_v48 = vsel %vm3045_vm2, %v4312_v17, %v6754_v62  ;;  %v4345_v31 = vsel %vm3045_vm2, %v4313_v45, %v6755_v57  ;;  %v6768_v56 = vpop.permute.xlu1 %6767 }
 0x936   :  { %v6763_v22 = vpop.permute.xlu0 %6762  ;;  %6041 = vmatprep.mubr.f32.mxu0 %v4344_v48  ;;  %v6770_v25 = vunpack.i.h.bf16 %v6768_v56  ;;  %v6769_v32 = vunpack.i.l.bf16 %v6768_v56 }
 0x937   :  { %v6765_v14 = vunpack.i.h.bf16 %v6763_v22  ;;  %v6764_v34 = vunpack.i.l.bf16 %v6763_v22  ;;  %6042 = vmatmul.mubr.f32.gmra.mrb[110].mxu0 %v4345_v31 }
 0x939   :  { %v4314_v49 = vsel %vm559_vm1, %v4282_v58, %v6764_v34  ;;  %v4315_v8 = vsel %vm559_vm1, %v4283_v6, %v6765_v14  ;;  %v6778_v2 = vpop.permute.xlu1 %6777 }
 0x93a   :  { %v6773_v13 = vpop.permute.xlu0 %6772  ;;  %v4346_v5 = vsel %vm3045_vm2, %v4314_v49, %v6769_v32  ;;  %v4347_v46 = vsel %vm3045_vm2, %v4315_v8, %v6770_v25  ;;  %v6780_v43 = vunpack.i.h.bf16 %v6778_v2  ;;  %v6779_v63 = vunpack.i.l.bf16 %v6778_v2 }
 0x93b   :  { %v6775_v20 = vunpack.i.h.bf16 %v6773_v13  ;;  %v6774_v27 = vunpack.i.l.bf16 %v6773_v13  ;;  %6044 = vmatprep.mubr.f32.mxu0 %v4346_v5 }
 0x93c   :  { %6045 = vmatmul.mubr.f32.gmra.mrb[112].mxu0 %v4347_v46 }
 0x93d   :  { %v4285_v51 = vsel %vm526_vm0, %v9934_v50, %v6775_v20  ;;  %v4284_v44 = vsel %vm526_vm0, %v9911_v19, %v6774_v27 }
 0x93e   :  { %v4316_v55 = vsel %vm559_vm1, %v4284_v44, %v6779_v63  ;;  %v4317_v23 = vsel %vm559_vm1, %v4285_v51, %v6780_v43 }
 0x93f   :  { %v4348_v3 = vsel %vm3045_vm2, %v4316_v55, %v9208_v12  ;;  %v4349_v0 = vsel %vm3045_vm2, %v4317_v23, %v9208_v12 }
 0x940   :  { %6047 = vmatprep.mubr.f32.mxu0 %v4348_v3 }
 0x941   :  { %6048 = vmatmul.mubr.f32.gmra.mrb[114].mxu0 %v4349_v0 }
 0x9bf   :  { %v6004_v50 = vpop.f32.mrb[84].mxu0 }
 0x9c0   :  { %v4853_v19 = vadd.f32 %v6004_v50, %v10120_v60  ;;  %v4689_v10 = vpop.f32.mrb[85].mxu0 }
 0x9c1   :  { %v4852_v35 = vadd.f32 %v10120_v60, %v4689_v10 }
 0x9c2   :  { %v10124_v33 = vmax.f32 %v4853_v19, 0.0 }
 0x9c3   :  { %v10126_v30 = vmax.f32 %v4852_v35, 0.0 }
 0x9c4   :  { %v4989_v12 = vmul.f32 %v10124_v33, %v10124_v33  ;;  %v4919_v39 = vsel %vm526_vm0, %v10124_v33, 0.0 }
 0x9c5   :  { %v4988_v36 = vmul.f32 %v10126_v30, %v10126_v30  ;;  %v4918_v41 = vsel %vm526_vm0, %v10126_v30, 0.0 }
 0x9c6   :  { %v6007_v11 = vpop.f32.mrb[86].mxu0  ;;  %v5021_v29 = vsel %vm526_vm0, %v4989_v12, 0.0  ;;  %v4920_v1 = vadd.f32 %v4919_v39, %v4918_v41 }
 0x9c7   :  { %v4855_v26 = vadd.f32 %v6007_v11, %v10120_v60  ;;  %v4699_v7 = vpop.f32.mrb[87].mxu0  ;;  %v5020_v4 = vsel %vm526_vm0, %v4988_v36, 0.0 }
 0x9c8   :  { %v4854_v9 = vadd.f32 %v10120_v60, %v4699_v7  ;;  %v5022_v59 = vadd.f32 %v5021_v29, %v5020_v4 }
 0x9c9   :  { %v10138_v18 = vmax.f32 %v4855_v26, 0.0 }
 0x9ca   :  { %v10142_v28 = vmax.f32 %v4854_v9, 0.0 }
 0x9cb   :  { %v6010_v16 = vpop.f32.mrb[88].mxu0  ;;  %v4991_v40 = vmul.f32 %v10138_v18, %v10138_v18  ;;  %v4923_v53 = vsel %vm526_vm0, %v10138_v18, 0.0 }
 0x9cc   :  { %v4921_v52 = vsel %vm526_vm0, %v10142_v28, 0.0  ;;  %v4990_v24 = vmul.f32 %v10142_v28, %v10142_v28  ;;  %v4857_v15 = vadd.f32 %v6010_v16, %v10120_v60  ;;  %v4709_v61 = vpop.f32.mrb[89].mxu0 }
 0x9cd   :  { %v4922_v38 = vadd.f32 %v4921_v52, %v4920_v1  ;;  %v4856_v42 = vadd.f32 %v10120_v60, %v4709_v61  ;;  %v5025_v54 = vsel %vm526_vm0, %v4991_v40, 0.0 }
 0x9ce   :  { %v5023_v21 = vsel %vm526_vm0, %v4990_v24, 0.0  ;;  %v10155_v57 = vmax.f32 %v4857_v15, 0.0 }
 0x9cf   :  { %v5024_v47 = vadd.f32 %v5023_v21, %v5022_v59  ;;  %v10157_v62 = vmax.f32 %v4856_v42, 0.0  ;;  %v4924_v37 = vadd.f32 %v4923_v53, %v4922_v38 }
 0x9d0   :  { %v4993_v56 = vmul.f32 %v10155_v57, %v10155_v57  ;;  %v4927_v49 = vsel %vm526_vm0, %v10155_v57, 0.0 }
 0x9d1   :  { %v4925_v17 = vsel %vm526_vm0, %v10157_v62, 0.0  ;;  %v4992_v45 = vmul.f32 %v10157_v62, %v10157_v62  ;;  %v5026_v48 = vadd.f32 %v5025_v54, %v5024_v47 }
 0x9d2   :  { %v6013_v31 = vpop.f32.mrb[90].mxu0  ;;  %v4926_v22 = vadd.f32 %v4925_v17, %v4924_v37  ;;  %v5029_v2 = vsel %vm526_vm0, %v4993_v56, 0.0 }
 0x9d3   :  { %v5027_v25 = vsel %vm526_vm0, %v4992_v45, 0.0  ;;  %v4859_v32 = vadd.f32 %v6013_v31, %v10120_v60  ;;  %v4719_v14 = vpop.f32.mrb[91].mxu0 }
 0x9d4   :  { %v4858_v34 = vadd.f32 %v10120_v60, %v4719_v14  ;;  %v5028_v58 = vadd.f32 %v5027_v25, %v5026_v48  ;;  %v4928_v13 = vadd.f32 %v4927_v49, %v4926_v22 }
 0x9d5   :  { %v10169_v6 = vmax.f32 %v4859_v32, 0.0 }
 0x9d6   :  { %v10173_v8 = vmax.f32 %v4858_v34, 0.0  ;;  %v5030_v44 = vadd.f32 %v5029_v2, %v5028_v58 }
 0x9d7   :  { %v6016_v5 = vpop.f32.mrb[92].mxu0  ;;  %v4995_v46 = vmul.f32 %v10169_v6, %v10169_v6  ;;  %v4931_v23 = vsel %vm526_vm0, %v10169_v6, 0.0 }
 0x9d8   :  { %v4929_v43 = vsel %vm526_vm0, %v10173_v8, 0.0  ;;  %v4994_v63 = vmul.f32 %v10173_v8, %v10173_v8  ;;  %v4861_v20 = vadd.f32 %v6016_v5, %v10120_v60  ;;  %v4729_v27 = vpop.f32.mrb[93].mxu0 }
 0x9d9   :  { %v4930_v51 = vadd.f32 %v4929_v43, %v4928_v13  ;;  %v4860_v55 = vadd.f32 %v10120_v60, %v4729_v27  ;;  %v5033_v35 = vsel %vm526_vm0, %v4995_v46, 0.0 }
 0x9da   :  { %v5031_v3 = vsel %vm526_vm0, %v4994_v63, 0.0  ;;  %v10187_v50 = vmax.f32 %v4861_v20, 0.0 }
 0x9db   :  { %v5032_v0 = vadd.f32 %v5031_v3, %v5030_v44  ;;  %v10189_v19 = vmax.f32 %v4860_v55, 0.0  ;;  %v4932_v10 = vadd.f32 %v4931_v23, %v4930_v51 }
 0x9dc   :  { %v4997_v7 = vmul.f32 %v10187_v50, %v10187_v50  ;;  %v4935_v40 = vsel %vm526_vm0, %v10187_v50, 0.0 }
 0x9dd   :  { %v4933_v12 = vsel %vm526_vm0, %v10189_v19, 0.0  ;;  %v4996_v36 = vmul.f32 %v10189_v19, %v10189_v19  ;;  %v5034_v11 = vadd.f32 %v5033_v35, %v5032_v0 }
 0x9de   :  { %v6019_v26 = vpop.f32.mrb[94].mxu0  ;;  %v4934_v39 = vadd.f32 %v4933_v12, %v4932_v10  ;;  %v5037_v24 = vsel %vm526_vm0, %v4997_v7, 0.0 }
 0x9df   :  { %v5035_v41 = vsel %vm526_vm0, %v4996_v36, 0.0  ;;  %v4863_v9 = vadd.f32 %v6019_v26, %v10120_v60  ;;  %v4739_v29 = vpop.f32.mrb[95].mxu0 }
 0x9e0   :  { %v4862_v4 = vadd.f32 %v10120_v60, %v4739_v29  ;;  %v5036_v1 = vadd.f32 %v5035_v41, %v5034_v11  ;;  %v4936_v15 = vadd.f32 %v4935_v40, %v4934_v39 }
 0x9e1   :  { %v10201_v16 = vmax.f32 %v4863_v9, 0.0 }
 0x9e2   :  { %v10205_v52 = vmax.f32 %v4862_v4, 0.0  ;;  %v5038_v37 = vadd.f32 %v5037_v24, %v5036_v1 }
 0x9e3   :  { %v6022_v61 = vpop.f32.mrb[96].mxu0  ;;  %v4999_v59 = vmul.f32 %v10201_v16, %v10201_v16  ;;  %v4939_v17 = vsel %vm526_vm0, %v10201_v16, 0.0 }
 0x9e4   :  { %v4937_v38 = vsel %vm526_vm0, %v10205_v52, 0.0  ;;  %v4998_v42 = vmul.f32 %v10205_v52, %v10205_v52  ;;  %v4865_v53 = vadd.f32 %v6022_v61, %v10120_v60  ;;  %v4749_v21 = vpop.f32.mrb[97].mxu0 }
 0x9e5   :  { %v4938_v47 = vadd.f32 %v4937_v38, %v4936_v15  ;;  %v4864_v54 = vadd.f32 %v10120_v60, %v4749_v21  ;;  %v5041_v25 = vsel %vm526_vm0, %v4999_v59, 0.0 }
 0x9e6   :  { %v5039_v45 = vsel %vm526_vm0, %v4998_v42, 0.0  ;;  %v10219_v48 = vmax.f32 %v4865_v53, 0.0 }
 0x9e7   :  { %v5040_v31 = vadd.f32 %v5039_v45, %v5038_v37  ;;  %v10221_v56 = vmax.f32 %v4864_v54, 0.0  ;;  %v4940_v22 = vadd.f32 %v4939_v17, %v4938_v47 }
 0x9e8   :  { %v5001_v32 = vmul.f32 %v10219_v48, %v10219_v48  ;;  %v6025_v49 = vpop.f32.mrb[98].mxu0  ;;  %v4943_v46 = vsel %vm526_vm0, %v10219_v48, 0.0 }
 0x9e9   :  { %v4941_v14 = vsel %vm526_vm0, %v10221_v56, 0.0  ;;  %v5000_v34 = vmul.f32 %v10221_v56, %v10221_v56  ;;  %v5042_v58 = vadd.f32 %v5041_v25, %v5040_v31  ;;  %v4867_v13 = vadd.f32 %v6025_v49, %v10120_v60  ;;  %v4759_v5 = vpop.f32.mrb[99].mxu0 }
 0x9ea   :  { %v4942_v2 = vadd.f32 %v4941_v14, %v4940_v22  ;;  %v4866_v63 = vadd.f32 %v10120_v60, %v4759_v5  ;;  %v5045_v44 = vsel %vm526_vm0, %v5001_v32, 0.0 }
 0x9eb   :  { %v5043_v43 = vsel %vm526_vm0, %v5000_v34, 0.0  ;;  %v10235_v27 = vmax.f32 %v4867_v13, 0.0 }
 0x9ec   :  { %v5044_v20 = vadd.f32 %v5043_v43, %v5042_v58  ;;  %v4944_v51 = vadd.f32 %v4943_v46, %v4942_v2  ;;  %v10238_v55 = vmax.f32 %v4866_v63, 0.0  ;;  %v6028_v23 = vpop.f32.mrb[100].mxu0 }
 0x9ed   :  { %v5003_v3 = vmul.f32 %v10235_v27, %v10235_v27  ;;  %v4869_v10 = vadd.f32 %v6028_v23, %v10120_v60  ;;  %v4769_v35 = vpop.f32.mrb[101].mxu0  ;;  %v4947_v39 = vsel %vm526_vm0, %v10235_v27, 0.0 }
 0x9ee   :  { %v5046_v0 = vadd.f32 %v5045_v44, %v5044_v20  ;;  %v4945_v12 = vsel %vm526_vm0, %v10238_v55, 0.0  ;;  %v5002_v36 = vmul.f32 %v10238_v55, %v10238_v55  ;;  %v4868_v11 = vadd.f32 %v10120_v60, %v4769_v35 }
 0x9ef   :  { %v4946_v26 = vadd.f32 %v4945_v12, %v4944_v51  ;;  %v10248_v7 = vmax.f32 %v4869_v10, 0.0  ;;  %v5049_v29 = vsel %vm526_vm0, %v5003_v3, 0.0 }
 0x9f0   :  { %v5047_v41 = vsel %vm526_vm0, %v5002_v36, 0.0  ;;  %v10253_v9 = vmax.f32 %v4868_v11, 0.0 }
 0x9f1   :  { %v5048_v4 = vadd.f32 %v5047_v41, %v5046_v0  ;;  %v4948_v1 = vadd.f32 %v4947_v39, %v4946_v26  ;;  %v5005_v24 = vmul.f32 %v10248_v7, %v10248_v7  ;;  %v4951_v47 = vsel %vm526_vm0, %v10248_v7, 0.0 }
 0x9f2   :  { %v6031_v40 = vpop.f32.mrb[102].mxu0  ;;  %v4949_v15 = vsel %vm526_vm0, %v10253_v9, 0.0  ;;  %v5004_v61 = vmul.f32 %v10253_v9, %v10253_v9 }
 0x9f3   :  { %v4871_v59 = vadd.f32 %v6031_v40, %v10120_v60  ;;  %v4779_v38 = vpop.f32.mrb[103].mxu0  ;;  %v4950_v42 = vadd.f32 %v4949_v15, %v4948_v1  ;;  %v5050_v53 = vadd.f32 %v5049_v29, %v5048_v4  ;;  %v5053_v22 = vsel %vm526_vm0, %v5005_v24, 0.0 }
 0x9f4   :  { %v4870_v21 = vadd.f32 %v10120_v60, %v4779_v38  ;;  %v5051_v37 = vsel %vm526_vm0, %v5004_v61, 0.0 }
 0x9f5   :  { %v10267_v54 = vmax.f32 %v4871_v59, 0.0  ;;  %v5052_v17 = vadd.f32 %v5051_v37, %v5050_v53  ;;  %v4952_v31 = vadd.f32 %v4951_v47, %v4950_v42 }
 0x9f6   :  { %v10269_v45 = vmax.f32 %v4870_v21, 0.0 }
 0x9f7   :  { %v5007_v25 = vmul.f32 %v10267_v54, %v10267_v54  ;;  %v6034_v32 = vpop.f32.mrb[104].mxu0  ;;  %v5054_v58 = vadd.f32 %v5053_v22, %v5052_v17  ;;  %v4955_v46 = vsel %vm526_vm0, %v10267_v54, 0.0 }
 0x9f8   :  { %v4953_v14 = vsel %vm526_vm0, %v10269_v45, 0.0  ;;  %v5006_v34 = vmul.f32 %v10269_v45, %v10269_v45  ;;  %v4873_v49 = vadd.f32 %v6034_v32, %v10120_v60  ;;  %v4789_v2 = vpop.f32.mrb[105].mxu0 }
 0x9f9   :  { %v4954_v13 = vadd.f32 %v4953_v14, %v4952_v31  ;;  %v4872_v5 = vadd.f32 %v10120_v60, %v4789_v2  ;;  %v5057_v23 = vsel %vm526_vm0, %v5007_v25, 0.0 }
 0x9fa   :  { %v5055_v43 = vsel %vm526_vm0, %v5006_v34, 0.0  ;;  %v10283_v63 = vmax.f32 %v4873_v49, 0.0 }
 0x9fb   :  { %v5056_v20 = vadd.f32 %v5055_v43, %v5054_v58  ;;  %v10285_v51 = vmax.f32 %v4872_v5, 0.0  ;;  %v4956_v44 = vadd.f32 %v4955_v46, %v4954_v13 }
 0x9fc   :  { %v5009_v3 = vmul.f32 %v10283_v63, %v10283_v63  ;;  %v4959_v11 = vsel %vm526_vm0, %v10283_v63, 0.0 }
 0x9fd   :  { %v4957_v0 = vsel %vm526_vm0, %v10285_v51, 0.0  ;;  %v5008_v10 = vmul.f32 %v10285_v51, %v10285_v51  ;;  %v5058_v35 = vadd.f32 %v5057_v23, %v5056_v20 }
 0x9fe   :  { %v4958_v12 = vadd.f32 %v4957_v0, %v4956_v44  ;;  %v6037_v36 = vpop.f32.mrb[106].mxu0  ;;  %v5061_v40 = vsel %vm526_vm0, %v5009_v3, 0.0 }
 0x9ff   :  { %v5059_v26 = vsel %vm526_vm0, %v5008_v10, 0.0  ;;  %v4875_v39 = vadd.f32 %v6037_v36, %v10120_v60  ;;  %v4799_v41 = vpop.f32.mrb[107].mxu0 }
 0xa00   :  { %v5060_v29 = vadd.f32 %v5059_v26, %v5058_v35  ;;  %v4874_v4 = vadd.f32 %v10120_v60, %v4799_v41  ;;  %v4960_v1 = vadd.f32 %v4959_v11, %v4958_v12 }
 0xa01   :  { %v10300_v24 = vmax.f32 %v4875_v39, 0.0 }
 0xa02   :  { %v10302_v15 = vmax.f32 %v4874_v4, 0.0  ;;  %v5062_v61 = vadd.f32 %v5061_v40, %v5060_v29 }
 0xa03   :  { %v6040_v59 = vpop.f32.mrb[108].mxu0  ;;  %v5011_v38 = vmul.f32 %v10300_v24, %v10300_v24  ;;  %v4963_v31 = vsel %vm526_vm0, %v10300_v24, 0.0 }
 0xa04   :  { %v4961_v42 = vsel %vm526_vm0, %v10302_v15, 0.0  ;;  %v5010_v53 = vmul.f32 %v10302_v15, %v10302_v15  ;;  %v4877_v21 = vadd.f32 %v6040_v59, %v10120_v60  ;;  %v4809_v47 = vpop.f32.mrb[109].mxu0 }
 0xa05   :  { %v4962_v37 = vadd.f32 %v4961_v42, %v4960_v1  ;;  %v4876_v17 = vadd.f32 %v10120_v60, %v4809_v47  ;;  %v5065_v58 = vsel %vm526_vm0, %v5011_v38, 0.0 }
 0xa06   :  { %v5063_v22 = vsel %vm526_vm0, %v5010_v53, 0.0  ;;  %v10315_v25 = vmax.f32 %v4877_v21, 0.0 }
 0xa07   :  { %v5064_v32 = vadd.f32 %v5063_v22, %v5062_v61  ;;  %v10317_v14 = vmax.f32 %v4876_v17, 0.0  ;;  %v4964_v34 = vadd.f32 %v4963_v31, %v4962_v37 }
 0xa08   :  { %v5013_v49 = vmul.f32 %v10315_v25, %v10315_v25  ;;  %v4967_v20 = vsel %vm526_vm0, %v10315_v25, 0.0 }
 0xa09   :  { %v4965_v2 = vsel %vm526_vm0, %v10317_v14, 0.0  ;;  %v5012_v13 = vmul.f32 %v10317_v14, %v10317_v14  ;;  %v5066_v5 = vadd.f32 %v5065_v58, %v5064_v32 }
 0xa0a   :  { %v4966_v46 = vadd.f32 %v4965_v2, %v4964_v34  ;;  %v6043_v43 = vpop.f32.mrb[110].mxu0  ;;  %v5069_v12 = vsel %vm526_vm0, %v5013_v49, 0.0 }
 0xa0b   :  { %v5067_v44 = vsel %vm526_vm0, %v5012_v13, 0.0  ;;  %v4879_v23 = vadd.f32 %v6043_v43, %v10120_v60  ;;  %v4819_v3 = vpop.f32.mrb[111].mxu0 }
 0xa0c   :  { %v5068_v0 = vadd.f32 %v5067_v44, %v5066_v5  ;;  %v4878_v10 = vadd.f32 %v10120_v60, %v4819_v3  ;;  %v4968_v35 = vadd.f32 %v4967_v20, %v4966_v46 }
 0xa0d   :  { %v10332_v36 = vmax.f32 %v4879_v23, 0.0 }
 0xa0e   :  { %v10334_v11 = vmax.f32 %v4878_v10, 0.0  ;;  %v5070_v26 = vadd.f32 %v5069_v12, %v5068_v0 }
 0xa0f   :  { %v6046_v39 = vpop.f32.mrb[112].mxu0  ;;  %v5015_v41 = vmul.f32 %v10332_v36, %v10332_v36  ;;  %v4971_v38 = vsel %vm526_vm0, %v10332_v36, 0.0 }
 0xa10   :  { %v4969_v29 = vsel %vm526_vm0, %v10334_v11, 0.0  ;;  %v5014_v4 = vmul.f32 %v10334_v11, %v10334_v11  ;;  %v4881_v1 = vadd.f32 %v6046_v39, %v10120_v60  ;;  %v4829_v40 = vpop.f32.mrb[113].mxu0 }
 0xa11   :  { %v4970_v61 = vadd.f32 %v4969_v29, %v4968_v35  ;;  %v4880_v59 = vadd.f32 %v10120_v60, %v4829_v40  ;;  %v5073_v17 = vsel %vm526_vm0, %v5015_v41, 0.0 }
 0xa12   :  { %v5071_v42 = vsel %vm526_vm0, %v5014_v4, 0.0  ;;  %v10347_v53 = vmax.f32 %v4881_v1, 0.0 }
 0xa13   :  { %v5072_v21 = vadd.f32 %v5071_v42, %v5070_v26  ;;  %v10349_v47 = vmax.f32 %v4880_v59, 0.0  ;;  %v4972_v37 = vadd.f32 %v4971_v38, %v4970_v61 }
 0xa14   :  { %v5017_v31 = vmul.f32 %v10347_v53, %v10347_v53  ;;  %v6049_v22 = vpop.f32.mrb[114].mxu0  ;;  %v4975_v46 = vsel %vm526_vm0, %v10347_v53, 0.0 }
 0xa15   :  { %v4973_v32 = vsel %vm526_vm0, %v10349_v47, 0.0  ;;  %v5016_v34 = vmul.f32 %v10349_v47, %v10349_v47  ;;  %v5074_v58 = vadd.f32 %v5073_v17, %v5072_v21  ;;  %v4883_v49 = vadd.f32 %v6049_v22, %v10120_v60  ;;  %v4839_v2 = vpop.f32.mrb[115].mxu0 }
 0xa16   :  { %v4974_v13 = vadd.f32 %v4973_v32, %v4972_v37  ;;  %v4882_v5 = vadd.f32 %v10120_v60, %v4839_v2  ;;  %v5077_v0 = vsel %vm526_vm0, %v5017_v31, 0.0 }
 0xa17   :  { %v5075_v43 = vsel %vm526_vm0, %v5016_v34, 0.0  ;;  %v10363_v20 = vmax.f32 %v4883_v49, 0.0 }
 0xa18   :  { %v5076_v44 = vadd.f32 %v5075_v43, %v5074_v58  ;;  %v10365_v23 = vmax.f32 %v4882_v5, 0.0  ;;  %v4976_v3 = vadd.f32 %v4975_v46, %v4974_v13 }
 0xa19   :  { %v5019_v10 = vmul.f32 %v10363_v20, %v10363_v20  ;;  %v4979_v39 = vsel %vm526_vm0, %v10363_v20, 0.0 }
 0xa1a   :  { %v4977_v35 = vsel %vm526_vm0, %v10365_v23, 0.0  ;;  %v5018_v60 = vmul.f32 %v10365_v23, %v10365_v23  ;;  %v5078_v12 = vadd.f32 %v5077_v0, %v5076_v44 }
 0xa1b   :  { %v4978_v26 = vadd.f32 %v4977_v35, %v4976_v3  ;;  %v5081_v1 = vsel %vm526_vm0, %v5019_v10, 0.0 }
 0xa1c   :  { %v5079_v41 = vsel %vm526_vm0, %v5018_v60, 0.0 }
 0xa1d   :  { %v4980_v29 = vadd.f32 %v4979_v39, %v4978_v26  ;;  %v5080_v4 = vadd.f32 %v5079_v41, %v5078_v12  ;;  %v10454_v41 = vld [vmem:[%s10575_s4 + $0x5] ss:$0 sm:$0xff] }
 0xa1f   :  { %v4981_v40 = vrot.slane %v4980_v29, 4  ;;  %v5082_v61 = vadd.f32 %v5081_v1, %v5080_v4 }
 0xa21   :  { %v4982_v59 = vadd.f32 %v4981_v40, %v4980_v29  ;;  %v5083_v38 = vrot.slane %v5082_v61, 4 }
 0xa23   :  { %v4983_v42 = vrot.slane %v4982_v59, 2  ;;  %v5084_v21 = vadd.f32 %v5083_v38, %v5082_v61 }
 0xa25   :  { %v4984_v37 = vadd.f32 %v4983_v42, %v4982_v59  ;;  %v5085_v17 = vrot.slane %v5084_v21, 2 }
 0xa27   :  { %v4985_v31 = vrot.slane %v4984_v37, 1  ;;  %v5086_v22 = vadd.f32 %v5085_v17, %v5084_v21 }
 0xa29   :  { %v4986_v32 = vadd.f32 %v4985_v31, %v4984_v37  ;;  %v5087_v34 = vrot.slane %v5086_v22, 1 }
 0xa2b   :  { %v10378_v58 = vmul.f32 0.00390625, %v4986_v32  ;;  %v5088_v49 = vadd.f32 %v5087_v34, %v5086_v22 }
 0xa2d   :  { %v5089_v2 = vmul.f32 0.00390625, %v5088_v49  ;;  %v5090_v13 = vmul.f32 %v10378_v58, %v10378_v58  ;;  %v5122_v5 = vsub.f32 %v10365_v23, %v10378_v58  ;;  %v5108_v44 = vsub.f32 %v10253_v9, %v10378_v58 }
 0xa2e   :  { %v5109_v3 = vsub.f32 %v10248_v7, %v10378_v58  ;;  %v5110_v0 = vsub.f32 %v10269_v45, %v10378_v58  ;;  %v5111_v10 = vsub.f32 %v10267_v54, %v10378_v58  ;;  %v5112_v35 = vsub.f32 %v10285_v51, %v10378_v58 }
 0xa2f   :  { %v5091_v46 = vsub.f32 %v5089_v2, %v5090_v13  ;;  %v5113_v23 = vsub.f32 %v10283_v63, %v10378_v58  ;;  %v5114_v60 = vsub.f32 %v10302_v15, %v10378_v58  ;;  %v5115_v9 = vsub.f32 %v10300_v24, %v10378_v58 }
 0xa30   :  { %v5116_v7 = vsub.f32 %v10317_v14, %v10378_v58  ;;  %v5117_v45 = vsub.f32 %v10315_v25, %v10378_v58  ;;  %v5118_v54 = vsub.f32 %v10334_v11, %v10378_v58  ;;  %v5119_v51 = vsub.f32 %v10332_v36, %v10378_v58 }
 0xa31   :  { %v5124_v43 = vadd.f32 1e-05, %v5091_v46  ;;  %v5120_v63 = vsub.f32 %v10349_v47, %v10378_v58  ;;  %v5121_v15 = vsub.f32 %v10347_v53, %v10378_v58  ;;  %v5123_v24 = vsub.f32 %v10363_v20, %v10378_v58 }
 0xa32   :  { %v5092_v14 = vsub.f32 %v10126_v30, %v10378_v58  ;;  %v5093_v25 = vsub.f32 %v10124_v33, %v10378_v58  ;;  %v5094_v11 = vsub.f32 %v10142_v28, %v10378_v58  ;;  %v5095_v36 = vsub.f32 %v10138_v18, %v10378_v58 }
 0xa33   :  { %6791 = vrsqrt.f32 %v5124_v43  ;;  %v5096_v47 = vsub.f32 %v10157_v62, %v10378_v58  ;;  %v5097_v53 = vsub.f32 %v10155_v57, %v10378_v58  ;;  %v5098_v20 = vsub.f32 %v10173_v8, %v10378_v58  ;;  %v10441_v57 = vld [vmem:[%s10575_s4 + $0x4] ss:$0 sm:$0xff]  ;;  %s6886_s4 = smov [#allocation2]  }
 0xa34   :  { %v5099_v30 = vsub.f32 %v10169_v6, %v10378_v58  ;;  %v5100_v33 = vsub.f32 %v10189_v19, %v10378_v58  ;;  %v5101_v28 = vsub.f32 %v10187_v50, %v10378_v58  ;;  %v5102_v18 = vsub.f32 %v10205_v52, %v10378_v58  ;;  %s5267_s22 = sshll.u32 %s6886_s4, 4  ;;  %s10536_s22 = int_to_ptr.vmem [resolvable:$true] %s5267_s22 }
 0xa35   :  { %v5103_v62 = vsub.f32 %v10201_v16, %v10378_v58  ;;  %v5104_v6 = vsub.f32 %v10221_v56, %v10378_v58  ;;  %v5105_v8 = vsub.f32 %v10219_v48, %v10378_v58  ;;  %v5106_v50 = vsub.f32 %v10238_v55, %v10378_v58  ;;  %s6856_s23 = scalar_lea.vmem %s10536_s22, 4096  ;;  %p6861_p1 = scmp.lt.s32.totalorder %s10536_s22, %s10536_s22 }
 0xa36   :  { %v5107_v19 = vsub.f32 %v10235_v27, %v10378_v58  ;;  %p6857_p0 = scmp.ne.s32.totalorder %s10536_s22, %s6856_s23  ;;  %p6862_p2 = scmp.lt.s32.totalorder %s6856_s23, %s6856_s23 }
 0xa38   :  { %p6863_p3 = por %p6862_p2, %p6861_p1 }
 0xa3a   :  { %p6864_p4 = pnand %p6863_p3, %p6857_p0 }
 0xa3d   :  { %v6792_v12 = vpop.eup %6791 }
 0xa3e   :  { %v5156_v52 = vmul.f32 %v6792_v12, %v5122_v5  ;;  %v5126_v16 = vmul.f32 %v6792_v12, %v5092_v14  ;;  %v5127_v26 = vmul.f32 %v6792_v12, %v5093_v25  ;;  %v5128_v39 = vmul.f32 %v6792_v12, %v5094_v11 }
 0xa3f   :  { %v5129_v29 = vmul.f32 %v6792_v12, %v5095_v36  ;;  %v5130_v56 = vmul.f32 %v6792_v12, %v5096_v47  ;;  %v5131_v4 = vmul.f32 %v6792_v12, %v5097_v53  ;;  %v5132_v1 = vmul.f32 %v6792_v12, %v5098_v20 }
 0xa40   :  { %v5192_v48 = vmul.f32 %v10441_v57, %v5156_v52  ;;  %v5133_v40 = vmul.f32 %v6792_v12, %v5099_v30  ;;  %v5134_v55 = vmul.f32 %v6792_v12, %v5100_v33  ;;  %v5135_v61 = vmul.f32 %v6792_v12, %v5101_v28 }
 0xa41   :  { %v5136_v59 = vmul.f32 %v6792_v12, %v5102_v18  ;;  %v5137_v27 = vmul.f32 %v6792_v12, %v5103_v62  ;;  %v5138_v38 = vmul.f32 %v6792_v12, %v5104_v6  ;;  %v5139_v42 = vmul.f32 %v6792_v12, %v5105_v8 }
 0xa42   :  { %v5228_v21 = vadd.f32 %v10454_v41, %v5192_v48  ;;  %v5140_v37 = vmul.f32 %v6792_v12, %v5106_v50  ;;  %v5141_v17 = vmul.f32 %v6792_v12, %v5107_v19  ;;  %v5142_v31 = vmul.f32 %v6792_v12, %v5108_v44 }
 0xa43   :  { %v5143_v22 = vmul.f32 %v6792_v12, %v5109_v3  ;;  %v5144_v32 = vmul.f32 %v6792_v12, %v5110_v0  ;;  %v5145_v34 = vmul.f32 %v6792_v12, %v5111_v10  ;;  %v5146_v58 = vmul.f32 %v6792_v12, %v5112_v35 }
 0xa44   :  { %5260 = vst.msk [vmem:[#allocation2 + $0xf0] sm:$0xff] %vm526_vm0, %v5228_v21  ;;  %v5147_v49 = vmul.f32 %v6792_v12, %v5113_v23  ;;  %v5148_v2 = vmul.f32 %v6792_v12, %v5114_v60  ;;  %v5149_v13 = vmul.f32 %v6792_v12, %v5115_v9  ;;  %v5150_v5 = vmul.f32 %v6792_v12, %v5116_v7 }
 0xa45   :  { %v5151_v46 = vmul.f32 %v6792_v12, %v5117_v45  ;;  %v5152_v43 = vmul.f32 %v6792_v12, %v5118_v54  ;;  %v5153_v14 = vmul.f32 %v6792_v12, %v5119_v51  ;;  %v5154_v25 = vmul.f32 %v6792_v12, %v5120_v63 }
 0xa46   :  { %v5155_v11 = vmul.f32 %v6792_v12, %v5121_v15  ;;  %v5157_v36 = vmul.f32 %v6792_v12, %v5123_v24  ;;  %v5162_v47 = vmul.f32 %v10441_v57, %v5126_v16  ;;  %v5163_v44 = vmul.f32 %v10441_v57, %v5127_v26 }
 0xa47   :  { %v5164_v3 = vmul.f32 %v10441_v57, %v5128_v39  ;;  %v5165_v0 = vmul.f32 %v10441_v57, %v5129_v29  ;;  %v5166_v10 = vmul.f32 %v10441_v57, %v5130_v56  ;;  %v5167_v35 = vmul.f32 %v10441_v57, %v5131_v4 }
 0xa48   :  { %v5168_v23 = vmul.f32 %v10441_v57, %v5132_v1  ;;  %v5169_v60 = vmul.f32 %v10441_v57, %v5133_v40  ;;  %v5170_v9 = vmul.f32 %v10441_v57, %v5134_v55  ;;  %v5171_v7 = vmul.f32 %v10441_v57, %v5135_v61 }
 0xa49   :  { %v5172_v45 = vmul.f32 %v10441_v57, %v5136_v59  ;;  %v5173_v54 = vmul.f32 %v10441_v57, %v5137_v27  ;;  %v5174_v51 = vmul.f32 %v10441_v57, %v5138_v38  ;;  %v5175_v63 = vmul.f32 %v10441_v57, %v5139_v42 }
 0xa4a   :  { %v5176_v15 = vmul.f32 %v10441_v57, %v5140_v37  ;;  %v5177_v24 = vmul.f32 %v10441_v57, %v5141_v17  ;;  %v5178_v53 = vmul.f32 %v10441_v57, %v5142_v31  ;;  %v5179_v20 = vmul.f32 %v10441_v57, %v5143_v22 }
 0xa4b   :  { %v5180_v30 = vmul.f32 %v10441_v57, %v5144_v32  ;;  %v5181_v33 = vmul.f32 %v10441_v57, %v5145_v34  ;;  %v5182_v28 = vmul.f32 %v10441_v57, %v5146_v58  ;;  %v5183_v18 = vmul.f32 %v10441_v57, %v5147_v49 }
 0xa4c   :  { %v5184_v62 = vmul.f32 %v10441_v57, %v5148_v2  ;;  %v5185_v12 = vmul.f32 %v10441_v57, %v5149_v13  ;;  %v5186_v6 = vmul.f32 %v10441_v57, %v5150_v5  ;;  %v5187_v8 = vmul.f32 %v10441_v57, %v5151_v46 }
 0xa4d   :  { %v5188_v50 = vmul.f32 %v10441_v57, %v5152_v43  ;;  %v5189_v19 = vmul.f32 %v10441_v57, %v5153_v14  ;;  %v5190_v52 = vmul.f32 %v10441_v57, %v5154_v25  ;;  %v5191_v16 = vmul.f32 %v10441_v57, %v5155_v11 }
 0xa4e   :  { %v5193_v26 = vmul.f32 %v10441_v57, %v5157_v36  ;;  %v5198_v39 = vadd.f32 %v10454_v41, %v5162_v47  ;;  %v5199_v29 = vadd.f32 %v10454_v41, %v5163_v44  ;;  %v5200_v56 = vadd.f32 %v10454_v41, %v5164_v3 }
 0xa4f   :  { %v5201_v4 = vadd.f32 %v10454_v41, %v5165_v0  ;;  %v5202_v1 = vadd.f32 %v10454_v41, %v5166_v10  ;;  %v5203_v48 = vadd.f32 %v10454_v41, %v5167_v35  ;;  %v5204_v40 = vadd.f32 %v10454_v41, %v5168_v23 }
 0xa50   :  { %v5205_v55 = vadd.f32 %v10454_v41, %v5169_v60  ;;  %v5206_v61 = vadd.f32 %v10454_v41, %v5170_v9  ;;  %v5207_v57 = vadd.f32 %v10454_v41, %v5171_v7  ;;  %v5208_v59 = vadd.f32 %v10454_v41, %v5172_v45  ;;  %5230 = vst.msk [vmem:[#allocation2] sm:$0xff] %vm526_vm0, %v5198_v39 }
 0xa51   :  { %5231 = vst.msk [vmem:[#allocation2 + $0x8] sm:$0xff] %vm526_vm0, %v5199_v29  ;;  %5232 = vst.msk [vmem:[#allocation2 + $0x10] sm:$0xff] %vm526_vm0, %v5200_v56  ;;  %v5209_v27 = vadd.f32 %v10454_v41, %v5173_v54  ;;  %v5210_v38 = vadd.f32 %v10454_v41, %v5174_v51  ;;  %v5211_v42 = vadd.f32 %v10454_v41, %v5175_v63 }
 0xa52   :  { %v5212_v21 = vadd.f32 %v10454_v41, %v5176_v15  ;;  %5233 = vst.msk [vmem:[#allocation2 + $0x18] sm:$0xff] %vm526_vm0, %v5201_v4  ;;  %5234 = vst.msk [vmem:[#allocation2 + $0x20] sm:$0xff] %vm526_vm0, %v5202_v1  ;;  %v5213_v37 = vadd.f32 %v10454_v41, %v5177_v24  ;;  %v5214_v17 = vadd.f32 %v10454_v41, %v5178_v53 }
 0xa53   :  { %5235 = vst.msk [vmem:[#allocation2 + $0x28] sm:$0xff] %vm526_vm0, %v5203_v48  ;;  %5236 = vst.msk [vmem:[#allocation2 + $0x30] sm:$0xff] %vm526_vm0, %v5204_v40  ;;  %v5215_v31 = vadd.f32 %v10454_v41, %v5179_v20  ;;  %v5216_v22 = vadd.f32 %v10454_v41, %v5180_v30  ;;  %v5217_v32 = vadd.f32 %v10454_v41, %v5181_v33 }
 0xa54   :  { %5237 = vst.msk [vmem:[#allocation2 + $0x38] sm:$0xff] %vm526_vm0, %v5205_v55  ;;  %5238 = vst.msk [vmem:[#allocation2 + $0x40] sm:$0xff] %vm526_vm0, %v5206_v61  ;;  %v5218_v34 = vadd.f32 %v10454_v41, %v5182_v28  ;;  %v5219_v58 = vadd.f32 %v10454_v41, %v5183_v18  ;;  %v5220_v49 = vadd.f32 %v10454_v41, %v5184_v62 }
 0xa55   :  { %5239 = vst.msk [vmem:[#allocation2 + $0x48] sm:$0xff] %vm526_vm0, %v5207_v57  ;;  %5240 = vst.msk [vmem:[#allocation2 + $0x50] sm:$0xff] %vm526_vm0, %v5208_v59  ;;  %v5221_v2 = vadd.f32 %v10454_v41, %v5185_v12  ;;  %v5222_v13 = vadd.f32 %v10454_v41, %v5186_v6  ;;  %v5223_v5 = vadd.f32 %v10454_v41, %v5187_v8 }
 0xa56   :  { %5241 = vst.msk [vmem:[#allocation2 + $0x58] sm:$0xff] %vm526_vm0, %v5209_v27  ;;  %5242 = vst.msk [vmem:[#allocation2 + $0x60] sm:$0xff] %vm526_vm0, %v5210_v38  ;;  %v5224_v46 = vadd.f32 %v10454_v41, %v5188_v50  ;;  %v5225_v43 = vadd.f32 %v10454_v41, %v5189_v19  ;;  %v5226_v14 = vadd.f32 %v10454_v41, %v5190_v52 }
 0xa57   :  { %5243 = vst.msk [vmem:[#allocation2 + $0x68] sm:$0xff] %vm526_vm0, %v5211_v42  ;;  %5244 = vst.msk [vmem:[#allocation2 + $0x70] sm:$0xff] %vm526_vm0, %v5212_v21  ;;  %v5227_v25 = vadd.f32 %v10454_v41, %v5191_v16  ;;  %v5229_v11 = vadd.f32 %v10454_v41, %v5193_v26 }
 0xa58   :  { %5245 = vst.msk [vmem:[#allocation2 + $0x78] sm:$0xff] %vm526_vm0, %v5213_v37  ;;  %5246 = vst.msk [vmem:[#allocation2 + $0x80] sm:$0xff] %vm526_vm0, %v5214_v17 }
 0xa59   :  { %5247 = vst.msk [vmem:[#allocation2 + $0x88] sm:$0xff] %vm526_vm0, %v5215_v31  ;;  %5248 = vst.msk [vmem:[#allocation2 + $0x90] sm:$0xff] %vm526_vm0, %v5216_v22 }
 0xa5a   :  { %5249 = vst.msk [vmem:[#allocation2 + $0x98] sm:$0xff] %vm526_vm0, %v5217_v32  ;;  %5250 = vst.msk [vmem:[#allocation2 + $0xa0] sm:$0xff] %vm526_vm0, %v5218_v34 }
 0xa5b   :  { %5251 = vst.msk [vmem:[#allocation2 + $0xa8] sm:$0xff] %vm526_vm0, %v5219_v58  ;;  %5252 = vst.msk [vmem:[#allocation2 + $0xb0] sm:$0xff] %vm526_vm0, %v5220_v49 }
 0xa5c   :  { %5253 = vst.msk [vmem:[#allocation2 + $0xb8] sm:$0xff] %vm526_vm0, %v5221_v2  ;;  %5254 = vst.msk [vmem:[#allocation2 + $0xc0] sm:$0xff] %vm526_vm0, %v5222_v13 }
 0xa5d   :  { %5255 = vst.msk [vmem:[#allocation2 + $0xc8] sm:$0xff] %vm526_vm0, %v5223_v5  ;;  %5256 = vst.msk [vmem:[#allocation2 + $0xd0] sm:$0xff] %vm526_vm0, %v5224_v46 }
 0xa5e   :  { %5257 = vst.msk [vmem:[#allocation2 + $0xd8] sm:$0xff] %vm526_vm0, %v5225_v43  ;;  %5258 = vst.msk [vmem:[#allocation2 + $0xe0] sm:$0xff] %vm526_vm0, %v5226_v14 }
 0xa5f   :  { %5259 = vst.msk [vmem:[#allocation2 + $0xe8] sm:$0xff] %vm526_vm0, %v5227_v25  ;;  %5261 = vst.msk [vmem:[#allocation2 + $0xf8] sm:$0xff] %vm526_vm0, %v5229_v11 }
 0xa60   :  { %6867 = shalt.err (!%p6864_p4)
}
 0xa61   :  { %s6868_s27 = scalar_lea.hbm %s10576_s5, 4096 }
 0xa62   :  { %p6869_p5 = scmp.ne.s32.totalorder %s10576_s5, %s6868_s27  ;;  %p6872_p6 = scmp.lt.u32.totalorder %s6868_s27, %s10576_s5 }
 0xa64   :  { %p6874_p7 = pnand %p6872_p6, %p6869_p5 }
 0xa66   :  { %6877 = shalt.err (!%p6874_p7)
}
 0xa67   :  { %s6887_s6 = smov 128   ;;  %s6888_s7 = smov 8  }
 0xa68   :  { %5273 = dma.vmem_to_hbm [thread:$0]  %s10536_s22, 4096, %s10576_s5, [#allocation3], %s6887_s6, %s6887_s6, %s6888_s7  }
 0xa69   :  { %6878 = dma.done.wait [#allocation3], 4096  }
 0xa6a   :  { %6879 = vsyncadd [#allocation3], 4294963200 }
 0xa6b   :  { %5277 = vsyncpa [#allocation3], 1 }

</bundles_post_ra>
